<compile_context>
chip_gen: v7x
topology: tpu7x:2x2x1
jax: 0.10.0
libtpu: 0.0.40
codegen_flags: <defaults>
</compile_context>

<pallas_src>
import functools
import math

import jax
import jax.numpy as jnp
from jax.experimental import pallas as pl
from jax.experimental.pallas import tpu as pltpu


def _block_kernel(x_ref, g1_ref, b1_ref, wqkv_ref, wproj_ref, bproj_ref,
                  g2_ref, b2_ref, w1_ref, bm1_ref, w2_ref, bm2_ref, o_ref,
                  *, num_heads, act_dtype):
    Bb, N, C = x_ref.shape
    hd = C // num_heads
    R = Bb * N
    eps = 1e-5                                    # torch.nn.LayerNorm default

    x = x_ref[...].astype(jnp.float32).reshape(R, C)            # (rows, C)

    # ---------------- LayerNorm 1 (f32 elementwise) ----------------
    mu = jnp.mean(x, axis=-1, keepdims=True)
    var = jnp.mean(jnp.square(x - mu), axis=-1, keepdims=True)
    y = (x - mu) * jax.lax.rsqrt(var + eps) * g1_ref[...] + b1_ref[...]

    # ---------------- Attention ----------------
    # qkv linear (bias-free; softmax scale pre-folded into the Q columns of wqkv on the wrapper
    # side). bf16 operands, f32 accumulation on the MXU.
    qkv = jnp.dot(y.astype(jnp.bfloat16), wqkv_ref[...],
                  preferred_element_type=jnp.float32).astype(jnp.bfloat16)   # (R, 3C)
    # 128-aligned lane splits (C is a multiple of 128 for ViT-class dims)
    q_all = qkv[:, :C]
    k_all = qkv[:, C:2 * C]
    v_all = qkv[:, 2 * C:]

    ctx_parts = []
    for h in range(num_heads):                    # static unroll; see TODO on head batching
        q = q_all[:, h * hd:(h + 1) * hd].reshape(Bb, N, hd)
        k = k_all[:, h * hd:(h + 1) * hd].reshape(Bb, N, hd)
        v = v_all[:, h * hd:(h + 1) * hd].reshape(Bb, N, hd)

        s = jnp.einsum('bqd,bkd->bqk', q, k,
                       preferred_element_type=jnp.float32)                  # (Bb, N, N) f32
        s = s - jnp.max(s, axis=-1, keepdims=True)
        p = jnp.exp(s)
        den = jnp.sum(p, axis=-1, keepdims=True)                            # (Bb, N, 1)
        # normalize AFTER PV: N*hd VALU multiplies instead of N*N per head
        ctx = jnp.einsum('bqk,bkd->bqd', p.astype(jnp.bfloat16), v,
                         preferred_element_type=jnp.float32)                # (Bb, N, hd)
        ctx = ctx * pl.reciprocal(den, approx=True)
        ctx_parts.append(ctx.reshape(R, hd).astype(jnp.bfloat16))

    # concatenate heads (same layout as torch transpose(1,2).reshape(B,N,C)), then a single
    # K=C projection matmul; proj bias + Attention's internal 0.4*LN1(x) skip are added once.
    ctx_all = jnp.concatenate(ctx_parts, axis=-1)                           # (R, C) bf16
    attn = (jnp.dot(ctx_all, wproj_ref[...], preferred_element_type=jnp.float32)
            + bproj_ref[...] + 0.4 * y)
    # outer residual (DropPath == identity since drop_path_ratio == 0)
    x1 = x + attn

    # ---------------- LayerNorm 2 + MLP ----------------
    mu2 = jnp.mean(x1, axis=-1, keepdims=True)
    var2 = jnp.mean(jnp.square(x1 - mu2), axis=-1, keepdims=True)
    y2 = (x1 - mu2) * jax.lax.rsqrt(var2 + eps) * g2_ref[...] + b2_ref[...]

    h1 = jnp.dot(y2.astype(jnp.bfloat16), w1_ref[...],
                 preferred_element_type=jnp.float32).astype(act_dtype)
    h1 = h1 + bm1_ref[...].astype(act_dtype)
    # exact erf-based GELU (matches torch.nn.GELU() default); act_dtype = bf16 on v6e/v7x
    # (bf16 VPU/EUP, halves the (R, Ch) live intermediate), f32 on v5e.
    h1 = 0.5 * h1 * (1.0 + jax.lax.erf(h1 * (1.0 / math.sqrt(2.0))))
    m = jnp.dot(h1.astype(jnp.bfloat16), w2_ref[...],
                preferred_element_type=jnp.float32) + bm2_ref[...]

    o_ref[...] = (x1 + m).reshape(Bb, N, C).astype(o_ref.dtype)


# ---------------------------------------------------------------------------
# Hardware introspection (defensive: falls back to safe defaults off-TPU / old jax)
# ---------------------------------------------------------------------------
def _vmem_capacity_bytes():
    try:
        cap = getattr(pltpu.get_tpu_info(), "vmem_capacity_bytes", None)
        if cap:
            return int(cap)
    except Exception:
        pass
    return 128 * 1024 * 1024


def _tensorcores_per_chip():
    try:
        info = pltpu.get_tpu_info()
        for name in ("num_cores", "core_count", "num_tensorcores", "tensorcores_per_chip"):
            v = getattr(info, name, None)
            if v:
                return int(v)
    except Exception:
        pass
    return 1            # single-TC default (v5e/v6e behavior: no forced grid split)


def _mlp_act_dtype():
    # bf16 VPU/EUP exists on v6e/v7x; keep GELU/erf in f32 on v5e (and unknown parts)
    try:
        kind = jax.devices()[0].device_kind.lower()
    except Exception:
        return jnp.float32
    return jnp.bfloat16 if ("v6" in kind or "v7" in kind or "7x" in kind) else jnp.float32


def _choose_block_b(B, N, C, Ch, vmem_budget_bytes, num_cores):
    """Batch elements processed per grid step."""
    if N % 8 != 0:          # keep the in-kernel (Bb,N,C)->(Bb*N,C) flatten layout-trivial
        return 1
    # resident single-buffered bf16 weights + f32 LN/bias vectors
    weight_bytes = 2 * (4 * C * C + 2 * C * Ch) + 4 * (6 * C + Ch)
    # rough f32 intermediate footprint per batch element in one grid step (x/y/x1/y2/attn,
    # qkv, h1, one head's score matrix, pipelined x/out blocks)
    per_sample = 4 * N * (10 * C + 2 * Ch) + 4 * N * N
    budget = vmem_budget_bytes - weight_bytes - (8 << 20)     # compiler/pipeline headroom
    bb_vmem = max(1, budget // max(per_sample, 1))
    # enough rows per step to fill the MXU and amortize the ~0.35us/step grid overhead
    target_rows = 1024 if num_cores >= 2 else 2048
    bb = int(max(1, min(B, max(1, target_rows // N), bb_vmem)))
    while B % bb:
        bb -= 1
    # only force a multi-step split when there are multiple TensorCores to shard across (v7x);
    # on single-TC parts (v5e/v6e) the grid is a serial loop and splitting just adds overhead
    if num_cores >= 2 and B // bb < num_cores <= B:
        bb = max(1, B // num_cores)
        while B % bb:
            bb -= 1
    return bb


def _cost_estimate(B, N, C, Ch, num_heads, itemsize):
    flops = 2 * B * N * (4 * C * C + 2 * N * C + 2 * C * Ch)
    transcendentals = B * N * Ch + B * num_heads * N * N
    weight_bytes = 2 * (3 * C * C + C * C + C * Ch + Ch * C)       # bf16 weights
    vec_bytes = 4 * (6 * C + Ch)                                   # f32 LN / bias params
    io_bytes = 2 * B * N * C * itemsize                            # x in + out
    return pl.CostEstimate(flops=int(flops),
                           transcendentals=int(transcendentals),
                           bytes_accessed=int(io_bytes + weight_bytes + vec_bytes))


def _block_forward_impl(x, params, num_heads, block_b, *, single_buffer_params, act_dtype):
    B, N, C = x.shape
    Ch = params["w1"].shape[1]
    hd = C // num_heads
    scale = hd ** (-0.5)

    vmem_cap = _vmem_capacity_bytes()
    # leave headroom for compiler scratch: ~48 MiB on 64-MiB v7x, ~100 MiB on 128-MiB v5e/v6e
    vmem_limit = int(max(32 << 20, min(vmem_cap - (16 << 20), 100 << 20)))
    num_cores = _tensorcores_per_chip()

    if block_b is None:
        block_b = _choose_block_b(B, N, C, Ch, vmem_limit, num_cores)
    assert B % block_b == 0

    # Fold the softmax scale into the Q columns of the qkv weight (exact: qkv has no bias),
    # then ship all matmul weights as bf16 (f32 accumulation happens on the MXU).
    wqkv_f32 = params["wqkv"]
    wqkv = jnp.concatenate([wqkv_f32[:, :C] * scale, wqkv_f32[:, C:]],
                           axis=1).astype(jnp.bfloat16)
    wproj = params["wproj"].astype(jnp.bfloat16)
    w1 = params["w1"].astype(jnp.bfloat16)
    w2 = params["w2"].astype(jnp.bfloat16)

    kernel = functools.partial(_block_kernel, num_heads=num_heads, act_dtype=act_dtype)

    def rep(shape):
        # parameters: constant block index -> fetched once; single-buffer them so the pipeline
        # does not hold a useless second copy (~14 MB of VMEM at ViT-Base).
        if single_buffer_params:
            return pl.BlockSpec(shape, lambda b: (0,) * len(shape),
                                pipeline_mode=pl.Buffered(1))
        return pl.BlockSpec(shape, lambda b: (0,) * len(shape))

    in_specs = [
        pl.BlockSpec((block_b, N, C), lambda b: (b, 0, 0)),   # x: block_b samples per step
        rep((1, C)), rep((1, C)),                             # norm1 gamma / beta (f32)
        rep((C, 3 * C)),                                      # qkv weight (bf16, Q pre-scaled)
        rep((C, C)), rep((1, C)),                             # proj weight (bf16) / bias (f32)
        rep((1, C)), rep((1, C)),                             # norm2 gamma / beta (f32)
        rep((C, Ch)), rep((1, Ch)),                           # mlp fc1 weight (bf16) / bias (f32)
        rep((Ch, C)), rep((1, C)),                            # mlp fc2 weight (bf16) / bias (f32)
    ]

    return pl.pallas_call(
        kernel,
        out_shape=jax.ShapeDtypeStruct((B, N, C), x.dtype),
        grid_spec=pltpu.PrefetchScalarGridSpec(
            num_scalar_prefetch=0,
            grid=(B // block_b,),
            in_specs=in_specs,
            out_specs=pl.BlockSpec((block_b, N, C), lambda b: (b, 0, 0)),
        ),
        compiler_params=pltpu.CompilerParams(
            dimension_semantics=("parallel",),
            vmem_limit_bytes=vmem_limit,
        ),
        cost_estimate=_cost_estimate(B, N, C, Ch, num_heads, x.dtype.itemsize),
    )(x, params["g1"], params["b1"], wqkv, wproj, params["bproj"],
      params["g2"], params["b2"], w1, params["bm1"], w2, params["bm2"])


def block_forward(x, params, num_heads, block_b=None):
    act_dtype = _mlp_act_dtype()
    try:
        return _block_forward_impl(x, params, num_heads, block_b,
                                   single_buffer_params=True, act_dtype=act_dtype)
    except Exception:
        # Graceful fallback for jax/libtpu builds that reject pipeline_mode=pl.Buffered(1)
        # or bf16 transcendentals: previously-validated configuration (double-buffered
        # parameter specs, f32 GELU). Same kernel math either way.
        return _block_forward_impl(x, params, num_heads, block_b,
                                   single_buffer_params=False, act_dtype=jnp.float32)


def init_params(key, dim, num_heads, mlp_ratio=4.0):
    hidden = int(dim * mlp_ratio)
    ks = jax.random.split(key, 8)
    s = 0.02
    return {
        # LayerNorm 1 (torch default init gamma=1, beta=0 — perturbed to be non-trivial)
        "g1": jnp.ones((1, dim), jnp.float32) + s * jax.random.normal(ks[0], (1, dim)),
        "b1": s * jax.random.normal(ks[1], (1, dim)),
        # Attention: qkv (no bias, stored transposed as (C, 3C)), proj (C, C) + bias
        "wqkv": s * jax.random.normal(ks[2], (dim, 3 * dim), jnp.float32),
        "wproj": s * jax.random.normal(ks[3], (dim, dim), jnp.float32),
        "bproj": s * jax.random.normal(ks[4], (1, dim), jnp.float32),
        # LayerNorm 2
        "g2": jnp.ones((1, dim), jnp.float32) + s * jax.random.normal(ks[5], (1, dim)),
        "b2": s * jax.random.normal(ks[6], (1, dim)),
        # MLP
        "w1": s * jax.random.normal(ks[7], (dim, hidden), jnp.float32),
        "bm1": jnp.zeros((1, hidden), jnp.float32),
        "w2": s * jax.random.normal(jax.random.fold_in(key, 99), (hidden, dim), jnp.float32),
        "bm2": jnp.zeros((1, dim), jnp.float32),
    }


def _block_reference(x, params, num_heads):
    """Pure-JAX f32 reference mirroring the PyTorch Block forward (eval mode)."""
    B, N, C = x.shape
    hd = C // num_heads
    scale = hd ** (-0.5)
    eps = 1e-5

    def ln(v, g, b):
        mu = jnp.mean(v, axis=-1, keepdims=True)
        var = jnp.mean(jnp.square(v - mu), axis=-1, keepdims=True)
        return (v - mu) / jnp.sqrt(var + eps) * g + b

    y = ln(x, params["g1"], params["b1"])
    qkv = (y @ params["wqkv"]).reshape(B, N, 3, num_heads, hd).transpose(2, 0, 3, 1, 4)
    q, k, v = qkv[0], qkv[1], qkv[2]                                  # (B, H, N, hd)
    a = jax.nn.softmax(jnp.einsum('bhqd,bhkd->bhqk', q, k) * scale, axis=-1)
    ctx = jnp.einsum('bhqk,bhkd->bhqd', a, v).transpose(0, 2, 1, 3).reshape(B, N, C)
    attn = ctx @ params["wproj"] + params["bproj"] + 0.4 * y
    x = x + attn
    y2 = ln(x, params["g2"], params["b2"])
    h = y2 @ params["w1"] + params["bm1"]
    h = 0.5 * h * (1.0 + jax.lax.erf(h * (1.0 / math.sqrt(2.0))))
    return x + h @ params["w2"] + params["bm2"]


if __name__ == "__main__":
    # small but lane-dense demo: B=2, tokens N=8, channels C=128 (4 heads, head_dim=32),
    # mlp hidden = 512
    B, N, C = 2, 8, 128
    num_heads = 4

    key = jax.random.PRNGKey(0)
    kx, kp = jax.random.split(key)
    x = jax.random.normal(kx, (B, N, C), dtype=jnp.float32)
    params = init_params(kp, C, num_heads, mlp_ratio=4.0)

    out = jax.block_until_ready(block_forward(x, params, num_heads))
    ref = jax.block_until_ready(_block_reference(x, params, num_heads))

    assert out.shape == (B, N, C)
    assert bool(jnp.all(jnp.isfinite(out)))
    max_err = float(jnp.max(jnp.abs(out - ref)))
    # bf16 matmul operands + approx softmax reciprocal -> expect ~1e-3..1e-2 absolute error
    assert max_err < 5e-2, f"max |kernel - reference| = {max_err}"
    print("KERNEL_OK")
</pallas_src>

<mosaic_0001>
module attributes {stable_mosaic.version = 11 : i64} {
  func.func @_block_kernel(%arg0: i32, %arg1: memref<2x8x128xf32, #tpu.memory_space<vmem>>, %arg2: memref<1x128xf32, #tpu.memory_space<vmem>>, %arg3: memref<1x128xf32, #tpu.memory_space<vmem>>, %arg4: memref<128x384xbf16, #tpu.memory_space<vmem>>, %arg5: memref<128x128xbf16, #tpu.memory_space<vmem>>, %arg6: memref<1x128xf32, #tpu.memory_space<vmem>>, %arg7: memref<1x128xf32, #tpu.memory_space<vmem>>, %arg8: memref<1x128xf32, #tpu.memory_space<vmem>>, %arg9: memref<128x512xbf16, #tpu.memory_space<vmem>>, %arg10: memref<1x512xf32, #tpu.memory_space<vmem>>, %arg11: memref<512x128xbf16, #tpu.memory_space<vmem>>, %arg12: memref<1x128xf32, #tpu.memory_space<vmem>>, %arg13: memref<2x8x128xf32, #tpu.memory_space<vmem>>) attributes {dimension_semantics = [#tpu.dimension_semantics<parallel>], iteration_bounds = array<i64: 1>, scalar_prefetch = 0 : i64, scratch_operands = 0 : i64, tpu.core_type = #tpu.core_type<tc>, window_params = [{transform_indices = @transform_0, window_bounds = array<i64: 2, 8, 128>}, {pipeline_mode = #tpu.pipeline_mode<synchronous>, transform_indices = @transform_1, window_bounds = array<i64: 1, 128>}, {pipeline_mode = #tpu.pipeline_mode<synchronous>, transform_indices = @transform_2, window_bounds = array<i64: 1, 128>}, {pipeline_mode = #tpu.pipeline_mode<synchronous>, transform_indices = @transform_3, window_bounds = array<i64: 128, 384>}, {pipeline_mode = #tpu.pipeline_mode<synchronous>, transform_indices = @transform_4, window_bounds = array<i64: 128, 128>}, {pipeline_mode = #tpu.pipeline_mode<synchronous>, transform_indices = @transform_5, window_bounds = array<i64: 1, 128>}, {pipeline_mode = #tpu.pipeline_mode<synchronous>, transform_indices = @transform_6, window_bounds = array<i64: 1, 128>}, {pipeline_mode = #tpu.pipeline_mode<synchronous>, transform_indices = @transform_7, window_bounds = array<i64: 1, 128>}, {pipeline_mode = #tpu.pipeline_mode<synchronous>, transform_indices = @transform_8, window_bounds = array<i64: 128, 512>}, {pipeline_mode = #tpu.pipeline_mode<synchronous>, transform_indices = @transform_9, window_bounds = array<i64: 1, 512>}, {pipeline_mode = #tpu.pipeline_mode<synchronous>, transform_indices = @transform_10, window_bounds = array<i64: 512, 128>}, {pipeline_mode = #tpu.pipeline_mode<synchronous>, transform_indices = @transform_11, window_bounds = array<i64: 1, 128>}, {transform_indices = @transform_12, window_bounds = array<i64: 2, 8, 128>}]} {
    %c0 = arith.constant 0 : index
    %c0_0 = arith.constant 0 : index
    %c0_1 = arith.constant 0 : index
    %0 = vector.load %arg1[%c0, %c0_0, %c0_1] : memref<2x8x128xf32, #tpu.memory_space<vmem>>, vector<2x8x128xf32>
    %1 = vector.shape_cast %0 : vector<2x8x128xf32> to vector<16x128xf32>
    %cst = arith.constant dense<0.000000e+00> : vector<16xf32>
    %2 = vector.multi_reduction <add>, %1, %cst [1] : vector<16x128xf32> to vector<16xf32>
    %3 = vector.shape_cast %2 : vector<16xf32> to vector<16x1xf32>
    %cst_2 = arith.constant 1.280000e+02 : f32
    %4 = vector.broadcast %cst_2 : f32 to vector<16x1xf32>
    %5 = arith.divf %3, %4 : vector<16x1xf32>
    %6 = vector.broadcast %5 : vector<16x1xf32> to vector<16x128xf32>
    %7 = arith.subf %1, %6 : vector<16x128xf32>
    %8 = arith.mulf %7, %7 : vector<16x128xf32>
    %cst_3 = arith.constant dense<0.000000e+00> : vector<16xf32>
    %9 = vector.multi_reduction <add>, %8, %cst_3 [1] : vector<16x128xf32> to vector<16xf32>
    %10 = vector.shape_cast %9 : vector<16xf32> to vector<16x1xf32>
    %cst_4 = arith.constant 1.280000e+02 : f32
    %11 = vector.broadcast %cst_4 : f32 to vector<16x1xf32>
    %12 = arith.divf %10, %11 : vector<16x1xf32>
    %13 = vector.broadcast %5 : vector<16x1xf32> to vector<16x128xf32>
    %14 = arith.subf %1, %13 : vector<16x128xf32>
    %cst_5 = arith.constant 9.99999974E-6 : f32
    %15 = vector.broadcast %cst_5 : f32 to vector<16x1xf32>
    %16 = arith.addf %12, %15 : vector<16x1xf32>
    %17 = math.rsqrt %16 : vector<16x1xf32>
    %18 = vector.broadcast %17 : vector<16x1xf32> to vector<16x128xf32>
    %19 = arith.mulf %14, %18 : vector<16x128xf32>
    %c0_6 = arith.constant 0 : index
    %c0_7 = arith.constant 0 : index
    %20 = vector.load %arg2[%c0_6, %c0_7] : memref<1x128xf32, #tpu.memory_space<vmem>>, vector<1x128xf32>
    %21 = vector.broadcast %20 : vector<1x128xf32> to vector<16x128xf32>
    %22 = arith.mulf %19, %21 : vector<16x128xf32>
    %c0_8 = arith.constant 0 : index
    %c0_9 = arith.constant 0 : index
    %23 = vector.load %arg3[%c0_8, %c0_9] : memref<1x128xf32, #tpu.memory_space<vmem>>, vector<1x128xf32>
    %24 = vector.broadcast %23 : vector<1x128xf32> to vector<16x128xf32>
    %25 = arith.addf %22, %24 : vector<16x128xf32>
    %26 = arith.truncf %25 : vector<16x128xf32> to vector<16x128xbf16>
    %c0_10 = arith.constant 0 : index
    %c0_11 = arith.constant 0 : index
    %27 = vector.load %arg4[%c0_10, %c0_11] : memref<128x384xbf16, #tpu.memory_space<vmem>>, vector<128x384xbf16>
    %cst_12 = arith.constant dense<0.000000e+00> : vector<16x384xf32>
    %28 = tpu.matmul %26, %27, %cst_12 {dimension_numbers = #tpu.dot_dimension_numbers<[1], [0], [0], [1], [0, 0, 1, 1], [], []>} : vector<16x128xbf16>, vector<128x384xbf16>, vector<16x384xf32> -> vector<16x384xf32>
    %29 = arith.truncf %28 : vector<16x384xf32> to vector<16x384xbf16>
    %30 = vector.extract_strided_slice %29 {offsets = [0, 0], sizes = [16, 128], strides = [1, 1]} : vector<16x384xbf16> to vector<16x128xbf16>
    %31 = vector.extract_strided_slice %29 {offsets = [0, 128], sizes = [16, 128], strides = [1, 1]} : vector<16x384xbf16> to vector<16x128xbf16>
    %32 = vector.extract_strided_slice %29 {offsets = [0, 256], sizes = [16, 128], strides = [1, 1]} : vector<16x384xbf16> to vector<16x128xbf16>
    %33 = vector.extract_strided_slice %30 {offsets = [0, 0], sizes = [16, 32], strides = [1, 1]} : vector<16x128xbf16> to vector<16x32xbf16>
    %34 = vector.shape_cast %33 : vector<16x32xbf16> to vector<2x8x32xbf16>
    %35 = vector.extract_strided_slice %31 {offsets = [0, 0], sizes = [16, 32], strides = [1, 1]} : vector<16x128xbf16> to vector<16x32xbf16>
    %36 = vector.shape_cast %35 : vector<16x32xbf16> to vector<2x8x32xbf16>
    %37 = vector.extract_strided_slice %32 {offsets = [0, 0], sizes = [16, 32], strides = [1, 1]} : vector<16x128xbf16> to vector<16x32xbf16>
    %38 = vector.shape_cast %37 : vector<16x32xbf16> to vector<2x8x32xbf16>
    "tpu.trace_start"() <{level = 10 : i32, message = "bqd,bkd->bqk"}> : () -> ()
    %cst_13 = arith.constant dense<0.000000e+00> : vector<2x8x8xf32>
    %39 = tpu.matmul %34, %36, %cst_13 {dimension_numbers = #tpu.dot_dimension_numbers<[2], [2], [1], [1], [0, 0, 0, 1, 1, 1], [0], [0]>} : vector<2x8x32xbf16>, vector<2x8x32xbf16>, vector<2x8x8xf32> -> vector<2x8x8xf32>
    "tpu.trace_stop"() : () -> ()
    %cst_14 = arith.constant dense<0xFF800000> : vector<2x8xf32>
    %40 = vector.multi_reduction <maximumf>, %39, %cst_14 [2] : vector<2x8x8xf32> to vector<2x8xf32>
    %41 = vector.shape_cast %40 : vector<2x8xf32> to vector<2x8x1xf32>
    %42 = vector.broadcast %41 : vector<2x8x1xf32> to vector<2x8x8xf32>
    %43 = arith.subf %39, %42 : vector<2x8x8xf32>
    %44 = math.exp %43 : vector<2x8x8xf32>
    %cst_15 = arith.constant dense<0.000000e+00> : vector<2x8xf32>
    %45 = vector.multi_reduction <add>, %44, %cst_15 [2] : vector<2x8x8xf32> to vector<2x8xf32>
    %46 = vector.shape_cast %45 : vector<2x8xf32> to vector<2x8x1xf32>
    %47 = arith.truncf %44 : vector<2x8x8xf32> to vector<2x8x8xbf16>
    "tpu.trace_start"() <{level = 10 : i32, message = "bqk,bkd->bqd"}> : () -> ()
    %cst_16 = arith.constant dense<0.000000e+00> : vector<2x8x32xf32>
    %48 = tpu.matmul %47, %38, %cst_16 {dimension_numbers = #tpu.dot_dimension_numbers<[2], [1], [1], [2], [0, 0, 0, 1, 1, 2], [0], [0]>} : vector<2x8x8xbf16>, vector<2x8x32xbf16>, vector<2x8x32xf32> -> vector<2x8x32xf32>
    "tpu.trace_stop"() : () -> ()
    %49 = tpu.reciprocal %46 {approx = true} : vector<2x8x1xf32> -> vector<2x8x1xf32>
    %50 = vector.broadcast %49 : vector<2x8x1xf32> to vector<2x8x32xf32>
    %51 = arith.mulf %48, %50 : vector<2x8x32xf32>
    %52 = vector.shape_cast %51 : vector<2x8x32xf32> to vector<16x32xf32>
    %53 = arith.truncf %52 : vector<16x32xf32> to vector<16x32xbf16>
    %54 = vector.extract_strided_slice %30 {offsets = [0, 32], sizes = [16, 32], strides = [1, 1]} : vector<16x128xbf16> to vector<16x32xbf16>
    %55 = vector.shape_cast %54 : vector<16x32xbf16> to vector<2x8x32xbf16>
    %56 = vector.extract_strided_slice %31 {offsets = [0, 32], sizes = [16, 32], strides = [1, 1]} : vector<16x128xbf16> to vector<16x32xbf16>
    %57 = vector.shape_cast %56 : vector<16x32xbf16> to vector<2x8x32xbf16>
    %58 = vector.extract_strided_slice %32 {offsets = [0, 32], sizes = [16, 32], strides = [1, 1]} : vector<16x128xbf16> to vector<16x32xbf16>
    %59 = vector.shape_cast %58 : vector<16x32xbf16> to vector<2x8x32xbf16>
    "tpu.trace_start"() <{level = 10 : i32, message = "bqd,bkd->bqk"}> : () -> ()
    %cst_17 = arith.constant dense<0.000000e+00> : vector<2x8x8xf32>
    %60 = tpu.matmul %55, %57, %cst_17 {dimension_numbers = #tpu.dot_dimension_numbers<[2], [2], [1], [1], [0, 0, 0, 1, 1, 1], [0], [0]>} : vector<2x8x32xbf16>, vector<2x8x32xbf16>, vector<2x8x8xf32> -> vector<2x8x8xf32>
    "tpu.trace_stop"() : () -> ()
    %cst_18 = arith.constant dense<0xFF800000> : vector<2x8xf32>
    %61 = vector.multi_reduction <maximumf>, %60, %cst_18 [2] : vector<2x8x8xf32> to vector<2x8xf32>
    %62 = vector.shape_cast %61 : vector<2x8xf32> to vector<2x8x1xf32>
    %63 = vector.broadcast %62 : vector<2x8x1xf32> to vector<2x8x8xf32>
    %64 = arith.subf %60, %63 : vector<2x8x8xf32>
    %65 = math.exp %64 : vector<2x8x8xf32>
    %cst_19 = arith.constant dense<0.000000e+00> : vector<2x8xf32>
    %66 = vector.multi_reduction <add>, %65, %cst_19 [2] : vector<2x8x8xf32> to vector<2x8xf32>
    %67 = vector.shape_cast %66 : vector<2x8xf32> to vector<2x8x1xf32>
    %68 = arith.truncf %65 : vector<2x8x8xf32> to vector<2x8x8xbf16>
    "tpu.trace_start"() <{level = 10 : i32, message = "bqk,bkd->bqd"}> : () -> ()
    %cst_20 = arith.constant dense<0.000000e+00> : vector<2x8x32xf32>
    %69 = tpu.matmul %68, %59, %cst_20 {dimension_numbers = #tpu.dot_dimension_numbers<[2], [1], [1], [2], [0, 0, 0, 1, 1, 2], [0], [0]>} : vector<2x8x8xbf16>, vector<2x8x32xbf16>, vector<2x8x32xf32> -> vector<2x8x32xf32>
    "tpu.trace_stop"() : () -> ()
    %70 = tpu.reciprocal %67 {approx = true} : vector<2x8x1xf32> -> vector<2x8x1xf32>
    %71 = vector.broadcast %70 : vector<2x8x1xf32> to vector<2x8x32xf32>
    %72 = arith.mulf %69, %71 : vector<2x8x32xf32>
    %73 = vector.shape_cast %72 : vector<2x8x32xf32> to vector<16x32xf32>
    %74 = arith.truncf %73 : vector<16x32xf32> to vector<16x32xbf16>
    %75 = vector.extract_strided_slice %30 {offsets = [0, 64], sizes = [16, 32], strides = [1, 1]} : vector<16x128xbf16> to vector<16x32xbf16>
    %76 = vector.shape_cast %75 : vector<16x32xbf16> to vector<2x8x32xbf16>
    %77 = vector.extract_strided_slice %31 {offsets = [0, 64], sizes = [16, 32], strides = [1, 1]} : vector<16x128xbf16> to vector<16x32xbf16>
    %78 = vector.shape_cast %77 : vector<16x32xbf16> to vector<2x8x32xbf16>
    %79 = vector.extract_strided_slice %32 {offsets = [0, 64], sizes = [16, 32], strides = [1, 1]} : vector<16x128xbf16> to vector<16x32xbf16>
    %80 = vector.shape_cast %79 : vector<16x32xbf16> to vector<2x8x32xbf16>
    "tpu.trace_start"() <{level = 10 : i32, message = "bqd,bkd->bqk"}> : () -> ()
    %cst_21 = arith.constant dense<0.000000e+00> : vector<2x8x8xf32>
    %81 = tpu.matmul %76, %78, %cst_21 {dimension_numbers = #tpu.dot_dimension_numbers<[2], [2], [1], [1], [0, 0, 0, 1, 1, 1], [0], [0]>} : vector<2x8x32xbf16>, vector<2x8x32xbf16>, vector<2x8x8xf32> -> vector<2x8x8xf32>
    "tpu.trace_stop"() : () -> ()
    %cst_22 = arith.constant dense<0xFF800000> : vector<2x8xf32>
    %82 = vector.multi_reduction <maximumf>, %81, %cst_22 [2] : vector<2x8x8xf32> to vector<2x8xf32>
    %83 = vector.shape_cast %82 : vector<2x8xf32> to vector<2x8x1xf32>
    %84 = vector.broadcast %83 : vector<2x8x1xf32> to vector<2x8x8xf32>
    %85 = arith.subf %81, %84 : vector<2x8x8xf32>
    %86 = math.exp %85 : vector<2x8x8xf32>
    %cst_23 = arith.constant dense<0.000000e+00> : vector<2x8xf32>
    %87 = vector.multi_reduction <add>, %86, %cst_23 [2] : vector<2x8x8xf32> to vector<2x8xf32>
    %88 = vector.shape_cast %87 : vector<2x8xf32> to vector<2x8x1xf32>
    %89 = arith.truncf %86 : vector<2x8x8xf32> to vector<2x8x8xbf16>
    "tpu.trace_start"() <{level = 10 : i32, message = "bqk,bkd->bqd"}> : () -> ()
    %cst_24 = arith.constant dense<0.000000e+00> : vector<2x8x32xf32>
    %90 = tpu.matmul %89, %80, %cst_24 {dimension_numbers = #tpu.dot_dimension_numbers<[2], [1], [1], [2], [0, 0, 0, 1, 1, 2], [0], [0]>} : vector<2x8x8xbf16>, vector<2x8x32xbf16>, vector<2x8x32xf32> -> vector<2x8x32xf32>
    "tpu.trace_stop"() : () -> ()
    %91 = tpu.reciprocal %88 {approx = true} : vector<2x8x1xf32> -> vector<2x8x1xf32>
    %92 = vector.broadcast %91 : vector<2x8x1xf32> to vector<2x8x32xf32>
    %93 = arith.mulf %90, %92 : vector<2x8x32xf32>
    %94 = vector.shape_cast %93 : vector<2x8x32xf32> to vector<16x32xf32>
    %95 = arith.truncf %94 : vector<16x32xf32> to vector<16x32xbf16>
    %96 = vector.extract_strided_slice %30 {offsets = [0, 96], sizes = [16, 32], strides = [1, 1]} : vector<16x128xbf16> to vector<16x32xbf16>
    %97 = vector.shape_cast %96 : vector<16x32xbf16> to vector<2x8x32xbf16>
    %98 = vector.extract_strided_slice %31 {offsets = [0, 96], sizes = [16, 32], strides = [1, 1]} : vector<16x128xbf16> to vector<16x32xbf16>
    %99 = vector.shape_cast %98 : vector<16x32xbf16> to vector<2x8x32xbf16>
    %100 = vector.extract_strided_slice %32 {offsets = [0, 96], sizes = [16, 32], strides = [1, 1]} : vector<16x128xbf16> to vector<16x32xbf16>
    %101 = vector.shape_cast %100 : vector<16x32xbf16> to vector<2x8x32xbf16>
    "tpu.trace_start"() <{level = 10 : i32, message = "bqd,bkd->bqk"}> : () -> ()
    %cst_25 = arith.constant dense<0.000000e+00> : vector<2x8x8xf32>
    %102 = tpu.matmul %97, %99, %cst_25 {dimension_numbers = #tpu.dot_dimension_numbers<[2], [2], [1], [1], [0, 0, 0, 1, 1, 1], [0], [0]>} : vector<2x8x32xbf16>, vector<2x8x32xbf16>, vector<2x8x8xf32> -> vector<2x8x8xf32>
    "tpu.trace_stop"() : () -> ()
    %cst_26 = arith.constant dense<0xFF800000> : vector<2x8xf32>
    %103 = vector.multi_reduction <maximumf>, %102, %cst_26 [2] : vector<2x8x8xf32> to vector<2x8xf32>
    %104 = vector.shape_cast %103 : vector<2x8xf32> to vector<2x8x1xf32>
    %105 = vector.broadcast %104 : vector<2x8x1xf32> to vector<2x8x8xf32>
    %106 = arith.subf %102, %105 : vector<2x8x8xf32>
    %107 = math.exp %106 : vector<2x8x8xf32>
    %cst_27 = arith.constant dense<0.000000e+00> : vector<2x8xf32>
    %108 = vector.multi_reduction <add>, %107, %cst_27 [2] : vector<2x8x8xf32> to vector<2x8xf32>
    %109 = vector.shape_cast %108 : vector<2x8xf32> to vector<2x8x1xf32>
    %110 = arith.truncf %107 : vector<2x8x8xf32> to vector<2x8x8xbf16>
    "tpu.trace_start"() <{level = 10 : i32, message = "bqk,bkd->bqd"}> : () -> ()
    %cst_28 = arith.constant dense<0.000000e+00> : vector<2x8x32xf32>
    %111 = tpu.matmul %110, %101, %cst_28 {dimension_numbers = #tpu.dot_dimension_numbers<[2], [1], [1], [2], [0, 0, 0, 1, 1, 2], [0], [0]>} : vector<2x8x8xbf16>, vector<2x8x32xbf16>, vector<2x8x32xf32> -> vector<2x8x32xf32>
    "tpu.trace_stop"() : () -> ()
    %112 = tpu.reciprocal %109 {approx = true} : vector<2x8x1xf32> -> vector<2x8x1xf32>
    %113 = vector.broadcast %112 : vector<2x8x1xf32> to vector<2x8x32xf32>
    %114 = arith.mulf %111, %113 : vector<2x8x32xf32>
    %115 = vector.shape_cast %114 : vector<2x8x32xf32> to vector<16x32xf32>
    %116 = arith.truncf %115 : vector<16x32xf32> to vector<16x32xbf16>
    %117 = tpu.concatenate %53, %74, %95, %116 in 1 : vector<16x32xbf16>, vector<16x32xbf16>, vector<16x32xbf16>, vector<16x32xbf16> -> vector<16x128xbf16>
    %c0_29 = arith.constant 0 : index
    %c0_30 = arith.constant 0 : index
    %118 = vector.load %arg5[%c0_29, %c0_30] : memref<128x128xbf16, #tpu.memory_space<vmem>>, vector<128x128xbf16>
    %cst_31 = arith.constant dense<0.000000e+00> : vector<16x128xf32>
    %119 = tpu.matmul %117, %118, %cst_31 {dimension_numbers = #tpu.dot_dimension_numbers<[1], [0], [0], [1], [0, 0, 1, 1], [], []>} : vector<16x128xbf16>, vector<128x128xbf16>, vector<16x128xf32> -> vector<16x128xf32>
    %c0_32 = arith.constant 0 : index
    %c0_33 = arith.constant 0 : index
    %120 = vector.load %arg6[%c0_32, %c0_33] : memref<1x128xf32, #tpu.memory_space<vmem>>, vector<1x128xf32>
    %121 = vector.broadcast %120 : vector<1x128xf32> to vector<16x128xf32>
    %122 = arith.addf %119, %121 : vector<16x128xf32>
    %cst_34 = arith.constant 4.000000e-01 : f32
    %123 = vector.broadcast %cst_34 : f32 to vector<16x128xf32>
    %124 = arith.mulf %123, %25 : vector<16x128xf32>
    %125 = arith.addf %122, %124 : vector<16x128xf32>
    %126 = arith.addf %1, %125 : vector<16x128xf32>
    %cst_35 = arith.constant dense<0.000000e+00> : vector<16xf32>
    %127 = vector.multi_reduction <add>, %126, %cst_35 [1] : vector<16x128xf32> to vector<16xf32>
    %128 = vector.shape_cast %127 : vector<16xf32> to vector<16x1xf32>
    %cst_36 = arith.constant 1.280000e+02 : f32
    %129 = vector.broadcast %cst_36 : f32 to vector<16x1xf32>
    %130 = arith.divf %128, %129 : vector<16x1xf32>
    %131 = vector.broadcast %130 : vector<16x1xf32> to vector<16x128xf32>
    %132 = arith.subf %126, %131 : vector<16x128xf32>
    %133 = arith.mulf %132, %132 : vector<16x128xf32>
    %cst_37 = arith.constant dense<0.000000e+00> : vector<16xf32>
    %134 = vector.multi_reduction <add>, %133, %cst_37 [1] : vector<16x128xf32> to vector<16xf32>
    %135 = vector.shape_cast %134 : vector<16xf32> to vector<16x1xf32>
    %cst_38 = arith.constant 1.280000e+02 : f32
    %136 = vector.broadcast %cst_38 : f32 to vector<16x1xf32>
    %137 = arith.divf %135, %136 : vector<16x1xf32>
    %138 = vector.broadcast %130 : vector<16x1xf32> to vector<16x128xf32>
    %139 = arith.subf %126, %138 : vector<16x128xf32>
    %cst_39 = arith.constant 9.99999974E-6 : f32
    %140 = vector.broadcast %cst_39 : f32 to vector<16x1xf32>
    %141 = arith.addf %137, %140 : vector<16x1xf32>
    %142 = math.rsqrt %141 : vector<16x1xf32>
    %143 = vector.broadcast %142 : vector<16x1xf32> to vector<16x128xf32>
    %144 = arith.mulf %139, %143 : vector<16x128xf32>
    %c0_40 = arith.constant 0 : index
    %c0_41 = arith.constant 0 : index
    %145 = vector.load %arg7[%c0_40, %c0_41] : memref<1x128xf32, #tpu.memory_space<vmem>>, vector<1x128xf32>
    %146 = vector.broadcast %145 : vector<1x128xf32> to vector<16x128xf32>
    %147 = arith.mulf %144, %146 : vector<16x128xf32>
    %c0_42 = arith.constant 0 : index
    %c0_43 = arith.constant 0 : index
    %148 = vector.load %arg8[%c0_42, %c0_43] : memref<1x128xf32, #tpu.memory_space<vmem>>, vector<1x128xf32>
    %149 = vector.broadcast %148 : vector<1x128xf32> to vector<16x128xf32>
    %150 = arith.addf %147, %149 : vector<16x128xf32>
    %151 = arith.truncf %150 : vector<16x128xf32> to vector<16x128xbf16>
    %c0_44 = arith.constant 0 : index
    %c0_45 = arith.constant 0 : index
    %152 = vector.load %arg9[%c0_44, %c0_45] : memref<128x512xbf16, #tpu.memory_space<vmem>>, vector<128x512xbf16>
    %cst_46 = arith.constant dense<0.000000e+00> : vector<16x512xf32>
    %153 = tpu.matmul %151, %152, %cst_46 {dimension_numbers = #tpu.dot_dimension_numbers<[1], [0], [0], [1], [0, 0, 1, 1], [], []>} : vector<16x128xbf16>, vector<128x512xbf16>, vector<16x512xf32> -> vector<16x512xf32>
    %c0_47 = arith.constant 0 : index
    %c0_48 = arith.constant 0 : index
    %154 = vector.load %arg10[%c0_47, %c0_48] : memref<1x512xf32, #tpu.memory_space<vmem>>, vector<1x512xf32>
    %155 = vector.broadcast %154 : vector<1x512xf32> to vector<16x512xf32>
    %156 = arith.addf %153, %155 : vector<16x512xf32>
    %cst_49 = arith.constant 5.000000e-01 : f32
    %157 = vector.broadcast %cst_49 : f32 to vector<16x512xf32>
    %158 = arith.mulf %157, %156 : vector<16x512xf32>
    %cst_50 = arith.constant 0.707106769 : f32
    %159 = vector.broadcast %cst_50 : f32 to vector<16x512xf32>
    %160 = arith.mulf %156, %159 : vector<16x512xf32>
    %161 = math.erf %160 : vector<16x512xf32>
    %cst_51 = arith.constant 1.000000e+00 : f32
    %162 = vector.broadcast %cst_51 : f32 to vector<16x512xf32>
    %163 = arith.addf %162, %161 : vector<16x512xf32>
    %164 = arith.mulf %158, %163 : vector<16x512xf32>
    %165 = arith.truncf %164 : vector<16x512xf32> to vector<16x512xbf16>
    %c0_52 = arith.constant 0 : index
    %c0_53 = arith.constant 0 : index
    %166 = vector.load %arg11[%c0_52, %c0_53] : memref<512x128xbf16, #tpu.memory_space<vmem>>, vector<512x128xbf16>
    %cst_54 = arith.constant dense<0.000000e+00> : vector<16x128xf32>
    %167 = tpu.matmul %165, %166, %cst_54 {dimension_numbers = #tpu.dot_dimension_numbers<[1], [0], [0], [1], [0, 0, 1, 1], [], []>} : vector<16x512xbf16>, vector<512x128xbf16>, vector<16x128xf32> -> vector<16x128xf32>
    %c0_55 = arith.constant 0 : index
    %c0_56 = arith.constant 0 : index
    %168 = vector.load %arg12[%c0_55, %c0_56] : memref<1x128xf32, #tpu.memory_space<vmem>>, vector<1x128xf32>
    %169 = vector.broadcast %168 : vector<1x128xf32> to vector<16x128xf32>
    %170 = arith.addf %167, %169 : vector<16x128xf32>
    %171 = arith.addf %126, %170 : vector<16x128xf32>
    %172 = vector.shape_cast %171 : vector<16x128xf32> to vector<2x8x128xf32>
    %c0_57 = arith.constant 0 : index
    %c0_58 = arith.constant 0 : index
    %c0_59 = arith.constant 0 : index
    %173 = vector.load %arg13[%c0_57, %c0_58, %c0_59] : memref<2x8x128xf32, #tpu.memory_space<vmem>>, vector<2x8x128xf32>
    tpu.vector_store %arg13[%c0_57, %c0_58, %c0_59], %172 {strides = array<i32>} : memref<2x8x128xf32, #tpu.memory_space<vmem>>, vector<2x8x128xf32>,
    return
  }
  func.func @transform_0(%arg0: i32) -> (i32, i32, i32) {
    %c0_i32 = arith.constant 0 : i32
    %c0_i32_0 = arith.constant 0 : i32
    %c0_i32_1 = arith.constant 0 : i32
    return %arg0, %c0_i32, %c0_i32_0 : i32, i32, i32
  }
  func.func @transform_1(%arg0: i32) -> (i32, i32) {
    %c0_i32 = arith.constant 0 : i32
    %c0_i32_0 = arith.constant 0 : i32
    %c0_i32_1 = arith.constant 0 : i32
    return %c0_i32, %c0_i32_0 : i32, i32
  }
  func.func @transform_2(%arg0: i32) -> (i32, i32) {
    %c0_i32 = arith.constant 0 : i32
    %c0_i32_0 = arith.constant 0 : i32
    %c0_i32_1 = arith.constant 0 : i32
    return %c0_i32, %c0_i32_0 : i32, i32
  }
  func.func @transform_3(%arg0: i32) -> (i32, i32) {
    %c0_i32 = arith.constant 0 : i32
    %c0_i32_0 = arith.constant 0 : i32
    %c0_i32_1 = arith.constant 0 : i32
    return %c0_i32, %c0_i32_0 : i32, i32
  }
  func.func @transform_4(%arg0: i32) -> (i32, i32) {
    %c0_i32 = arith.constant 0 : i32
    %c0_i32_0 = arith.constant 0 : i32
    %c0_i32_1 = arith.constant 0 : i32
    return %c0_i32, %c0_i32_0 : i32, i32
  }
  func.func @transform_5(%arg0: i32) -> (i32, i32) {
    %c0_i32 = arith.constant 0 : i32
    %c0_i32_0 = arith.constant 0 : i32
    %c0_i32_1 = arith.constant 0 : i32
    return %c0_i32, %c0_i32_0 : i32, i32
  }
  func.func @transform_6(%arg0: i32) -> (i32, i32) {
    %c0_i32 = arith.constant 0 : i32
    %c0_i32_0 = arith.constant 0 : i32
    %c0_i32_1 = arith.constant 0 : i32
    return %c0_i32, %c0_i32_0 : i32, i32
  }
  func.func @transform_7(%arg0: i32) -> (i32, i32) {
    %c0_i32 = arith.constant 0 : i32
    %c0_i32_0 = arith.constant 0 : i32
    %c0_i32_1 = arith.constant 0 : i32
    return %c0_i32, %c0_i32_0 : i32, i32
  }
  func.func @transform_8(%arg0: i32) -> (i32, i32) {
    %c0_i32 = arith.constant 0 : i32
    %c0_i32_0 = arith.constant 0 : i32
    %c0_i32_1 = arith.constant 0 : i32
    return %c0_i32, %c0_i32_0 : i32, i32
  }
  func.func @transform_9(%arg0: i32) -> (i32, i32) {
    %c0_i32 = arith.constant 0 : i32
    %c0_i32_0 = arith.constant 0 : i32
    %c0_i32_1 = arith.constant 0 : i32
    return %c0_i32, %c0_i32_0 : i32, i32
  }
  func.func @transform_10(%arg0: i32) -> (i32, i32) {
    %c0_i32 = arith.constant 0 : i32
    %c0_i32_0 = arith.constant 0 : i32
    %c0_i32_1 = arith.constant 0 : i32
    return %c0_i32, %c0_i32_0 : i32, i32
  }
  func.func @transform_11(%arg0: i32) -> (i32, i32) {
    %c0_i32 = arith.constant 0 : i32
    %c0_i32_0 = arith.constant 0 : i32
    %c0_i32_1 = arith.constant 0 : i32
    return %c0_i32, %c0_i32_0 : i32, i32
  }
  func.func @transform_12(%arg0: i32) -> (i32, i32, i32) {
    %c0_i32 = arith.constant 0 : i32
    %c0_i32_0 = arith.constant 0 : i32
    %c0_i32_1 = arith.constant 0 : i32
    return %arg0, %c0_i32, %c0_i32_0 : i32, i32, i32
  }
}

module attributes {stable_mosaic.version = 11 : i64} {
  func.func @_block_kernel(%arg0: i32, %arg1: memref<2x8x128xf32, #tpu.memory_space<vmem>>, %arg2: memref<1x128xf32, #tpu.memory_space<vmem>>, %arg3: memref<1x128xf32, #tpu.memory_space<vmem>>, %arg4: memref<128x384xbf16, #tpu.memory_space<vmem>>, %arg5: memref<128x128xbf16, #tpu.memory_space<vmem>>, %arg6: memref<1x128xf32, #tpu.memory_space<vmem>>, %arg7: memref<1x128xf32, #tpu.memory_space<vmem>>, %arg8: memref<1x128xf32, #tpu.memory_space<vmem>>, %arg9: memref<128x512xbf16, #tpu.memory_space<vmem>>, %arg10: memref<1x512xf32, #tpu.memory_space<vmem>>, %arg11: memref<512x128xbf16, #tpu.memory_space<vmem>>, %arg12: memref<1x128xf32, #tpu.memory_space<vmem>>, %arg13: memref<2x8x128xf32, #tpu.memory_space<vmem>>) attributes {dimension_semantics = [#tpu.dimension_semantics<parallel>], iteration_bounds = array<i64: 1>, scalar_prefetch = 0 : i64, scratch_operands = 0 : i64, tpu.core_type = #tpu.core_type<tc>, window_params = [{transform_indices = @transform_0, window_bounds = array<i64: 2, 8, 128>}, {pipeline_mode = #tpu.pipeline_mode<synchronous>, transform_indices = @transform_1, window_bounds = array<i64: 1, 128>}, {pipeline_mode = #tpu.pipeline_mode<synchronous>, transform_indices = @transform_2, window_bounds = array<i64: 1, 128>}, {pipeline_mode = #tpu.pipeline_mode<synchronous>, transform_indices = @transform_3, window_bounds = array<i64: 128, 384>}, {pipeline_mode = #tpu.pipeline_mode<synchronous>, transform_indices = @transform_4, window_bounds = array<i64: 128, 128>}, {pipeline_mode = #tpu.pipeline_mode<synchronous>, transform_indices = @transform_5, window_bounds = array<i64: 1, 128>}, {pipeline_mode = #tpu.pipeline_mode<synchronous>, transform_indices = @transform_6, window_bounds = array<i64: 1, 128>}, {pipeline_mode = #tpu.pipeline_mode<synchronous>, transform_indices = @transform_7, window_bounds = array<i64: 1, 128>}, {pipeline_mode = #tpu.pipeline_mode<synchronous>, transform_indices = @transform_8, window_bounds = array<i64: 128, 512>}, {pipeline_mode = #tpu.pipeline_mode<synchronous>, transform_indices = @transform_9, window_bounds = array<i64: 1, 512>}, {pipeline_mode = #tpu.pipeline_mode<synchronous>, transform_indices = @transform_10, window_bounds = array<i64: 512, 128>}, {pipeline_mode = #tpu.pipeline_mode<synchronous>, transform_indices = @transform_11, window_bounds = array<i64: 1, 128>}, {transform_indices = @transform_12, window_bounds = array<i64: 2, 8, 128>}]} {
    %c0 = arith.constant 0 : index
    %c0_0 = arith.constant 0 : index
    %c0_1 = arith.constant 0 : index
    %0 = vector.load %arg1[%c0, %c0_0, %c0_1] : memref<2x8x128xf32, #tpu.memory_space<vmem>>, vector<2x8x128xf32>
    %1 = vector.shape_cast %0 : vector<2x8x128xf32> to vector<16x128xf32>
    %cst = arith.constant dense<0.000000e+00> : vector<16xf32>
    %2 = vector.multi_reduction <add>, %1, %cst [1] : vector<16x128xf32> to vector<16xf32>
    %3 = vector.shape_cast %2 : vector<16xf32> to vector<16x1xf32>
    %cst_2 = arith.constant 1.280000e+02 : f32
    %4 = vector.broadcast %cst_2 : f32 to vector<16x1xf32>
    %5 = arith.divf %3, %4 : vector<16x1xf32>
    %6 = vector.broadcast %5 : vector<16x1xf32> to vector<16x128xf32>
    %7 = arith.subf %1, %6 : vector<16x128xf32>
    %8 = arith.mulf %7, %7 : vector<16x128xf32>
    %cst_3 = arith.constant dense<0.000000e+00> : vector<16xf32>
    %9 = vector.multi_reduction <add>, %8, %cst_3 [1] : vector<16x128xf32> to vector<16xf32>
    %10 = vector.shape_cast %9 : vector<16xf32> to vector<16x1xf32>
    %cst_4 = arith.constant 1.280000e+02 : f32
    %11 = vector.broadcast %cst_4 : f32 to vector<16x1xf32>
    %12 = arith.divf %10, %11 : vector<16x1xf32>
    %13 = vector.broadcast %5 : vector<16x1xf32> to vector<16x128xf32>
    %14 = arith.subf %1, %13 : vector<16x128xf32>
    %cst_5 = arith.constant 9.99999974E-6 : f32
    %15 = vector.broadcast %cst_5 : f32 to vector<16x1xf32>
    %16 = arith.addf %12, %15 : vector<16x1xf32>
    %17 = math.rsqrt %16 : vector<16x1xf32>
    %18 = vector.broadcast %17 : vector<16x1xf32> to vector<16x128xf32>
    %19 = arith.mulf %14, %18 : vector<16x128xf32>
    %c0_6 = arith.constant 0 : index
    %c0_7 = arith.constant 0 : index
    %20 = vector.load %arg2[%c0_6, %c0_7] : memref<1x128xf32, #tpu.memory_space<vmem>>, vector<1x128xf32>
    %21 = vector.broadcast %20 : vector<1x128xf32> to vector<16x128xf32>
    %22 = arith.mulf %19, %21 : vector<16x128xf32>
    %c0_8 = arith.constant 0 : index
    %c0_9 = arith.constant 0 : index
    %23 = vector.load %arg3[%c0_8, %c0_9] : memref<1x128xf32, #tpu.memory_space<vmem>>, vector<1x128xf32>
    %24 = vector.broadcast %23 : vector<1x128xf32> to vector<16x128xf32>
    %25 = arith.addf %22, %24 : vector<16x128xf32>
    %26 = arith.truncf %25 : vector<16x128xf32> to vector<16x128xbf16>
    %c0_10 = arith.constant 0 : index
    %c0_11 = arith.constant 0 : index
    %27 = vector.load %arg4[%c0_10, %c0_11] : memref<128x384xbf16, #tpu.memory_space<vmem>>, vector<128x384xbf16>
    %cst_12 = arith.constant dense<0.000000e+00> : vector<16x384xf32>
    %28 = tpu.matmul %26, %27, %cst_12 {dimension_numbers = #tpu.dot_dimension_numbers<[1], [0], [0], [1], [0, 0, 1, 1], [], []>} : vector<16x128xbf16>, vector<128x384xbf16>, vector<16x384xf32> -> vector<16x384xf32>
    %29 = arith.truncf %28 : vector<16x384xf32> to vector<16x384xbf16>
    %30 = vector.extract_strided_slice %29 {offsets = [0, 0], sizes = [16, 128], strides = [1, 1]} : vector<16x384xbf16> to vector<16x128xbf16>
    %31 = vector.extract_strided_slice %29 {offsets = [0, 128], sizes = [16, 128], strides = [1, 1]} : vector<16x384xbf16> to vector<16x128xbf16>
    %32 = vector.extract_strided_slice %29 {offsets = [0, 256], sizes = [16, 128], strides = [1, 1]} : vector<16x384xbf16> to vector<16x128xbf16>
    %33 = vector.extract_strided_slice %30 {offsets = [0, 0], sizes = [16, 32], strides = [1, 1]} : vector<16x128xbf16> to vector<16x32xbf16>
    %34 = vector.shape_cast %33 : vector<16x32xbf16> to vector<2x8x32xbf16>
    %35 = vector.extract_strided_slice %31 {offsets = [0, 0], sizes = [16, 32], strides = [1, 1]} : vector<16x128xbf16> to vector<16x32xbf16>
    %36 = vector.shape_cast %35 : vector<16x32xbf16> to vector<2x8x32xbf16>
    %37 = vector.extract_strided_slice %32 {offsets = [0, 0], sizes = [16, 32], strides = [1, 1]} : vector<16x128xbf16> to vector<16x32xbf16>
    %38 = vector.shape_cast %37 : vector<16x32xbf16> to vector<2x8x32xbf16>
    "tpu.trace_start"() <{level = 10 : i32, message = "bqd,bkd->bqk"}> : () -> ()
    %cst_13 = arith.constant dense<0.000000e+00> : vector<2x8x8xf32>
    %39 = tpu.matmul %34, %36, %cst_13 {dimension_numbers = #tpu.dot_dimension_numbers<[2], [2], [1], [1], [0, 0, 0, 1, 1, 1], [0], [0]>} : vector<2x8x32xbf16>, vector<2x8x32xbf16>, vector<2x8x8xf32> -> vector<2x8x8xf32>
    "tpu.trace_stop"() : () -> ()
    %cst_14 = arith.constant dense<0xFF800000> : vector<2x8xf32>
    %40 = vector.multi_reduction <maximumf>, %39, %cst_14 [2] : vector<2x8x8xf32> to vector<2x8xf32>
    %41 = vector.shape_cast %40 : vector<2x8xf32> to vector<2x8x1xf32>
    %42 = vector.broadcast %41 : vector<2x8x1xf32> to vector<2x8x8xf32>
    %43 = arith.subf %39, %42 : vector<2x8x8xf32>
    %44 = math.exp %43 : vector<2x8x8xf32>
    %cst_15 = arith.constant dense<0.000000e+00> : vector<2x8xf32>
    %45 = vector.multi_reduction <add>, %44, %cst_15 [2] : vector<2x8x8xf32> to vector<2x8xf32>
    %46 = vector.shape_cast %45 : vector<2x8xf32> to vector<2x8x1xf32>
    %47 = arith.truncf %44 : vector<2x8x8xf32> to vector<2x8x8xbf16>
    "tpu.trace_start"() <{level = 10 : i32, message = "bqk,bkd->bqd"}> : () -> ()
    %cst_16 = arith.constant dense<0.000000e+00> : vector<2x8x32xf32>
    %48 = tpu.matmul %47, %38, %cst_16 {dimension_numbers = #tpu.dot_dimension_numbers<[2], [1], [1], [2], [0, 0, 0, 1, 1, 2], [0], [0]>} : vector<2x8x8xbf16>, vector<2x8x32xbf16>, vector<2x8x32xf32> -> vector<2x8x32xf32>
    "tpu.trace_stop"() : () -> ()
    %49 = tpu.reciprocal %46 {approx = true} : vector<2x8x1xf32> -> vector<2x8x1xf32>
    %50 = vector.broadcast %49 : vector<2x8x1xf32> to vector<2x8x32xf32>
    %51 = arith.mulf %48, %50 : vector<2x8x32xf32>
    %52 = vector.shape_cast %51 : vector<2x8x32xf32> to vector<16x32xf32>
    %53 = arith.truncf %52 : vector<16x32xf32> to vector<16x32xbf16>
    %54 = vector.extract_strided_slice %30 {offsets = [0, 32], sizes = [16, 32], strides = [1, 1]} : vector<16x128xbf16> to vector<16x32xbf16>
    %55 = vector.shape_cast %54 : vector<16x32xbf16> to vector<2x8x32xbf16>
    %56 = vector.extract_strided_slice %31 {offsets = [0, 32], sizes = [16, 32], strides = [1, 1]} : vector<16x128xbf16> to vector<16x32xbf16>
    %57 = vector.shape_cast %56 : vector<16x32xbf16> to vector<2x8x32xbf16>
    %58 = vector.extract_strided_slice %32 {offsets = [0, 32], sizes = [16, 32], strides = [1, 1]} : vector<16x128xbf16> to vector<16x32xbf16>
    %59 = vector.shape_cast %58 : vector<16x32xbf16> to vector<2x8x32xbf16>
    "tpu.trace_start"() <{level = 10 : i32, message = "bqd,bkd->bqk"}> : () -> ()
    %cst_17 = arith.constant dense<0.000000e+00> : vector<2x8x8xf32>
    %60 = tpu.matmul %55, %57, %cst_17 {dimension_numbers = #tpu.dot_dimension_numbers<[2], [2], [1], [1], [0, 0, 0, 1, 1, 1], [0], [0]>} : vector<2x8x32xbf16>, vector<2x8x32xbf16>, vector<2x8x8xf32> -> vector<2x8x8xf32>
    "tpu.trace_stop"() : () -> ()
    %cst_18 = arith.constant dense<0xFF800000> : vector<2x8xf32>
    %61 = vector.multi_reduction <maximumf>, %60, %cst_18 [2] : vector<2x8x8xf32> to vector<2x8xf32>
    %62 = vector.shape_cast %61 : vector<2x8xf32> to vector<2x8x1xf32>
    %63 = vector.broadcast %62 : vector<2x8x1xf32> to vector<2x8x8xf32>
    %64 = arith.subf %60, %63 : vector<2x8x8xf32>
    %65 = math.exp %64 : vector<2x8x8xf32>
    %cst_19 = arith.constant dense<0.000000e+00> : vector<2x8xf32>
    %66 = vector.multi_reduction <add>, %65, %cst_19 [2] : vector<2x8x8xf32> to vector<2x8xf32>
    %67 = vector.shape_cast %66 : vector<2x8xf32> to vector<2x8x1xf32>
    %68 = arith.truncf %65 : vector<2x8x8xf32> to vector<2x8x8xbf16>
    "tpu.trace_start"() <{level = 10 : i32, message = "bqk,bkd->bqd"}> : () -> ()
    %cst_20 = arith.constant dense<0.000000e+00> : vector<2x8x32xf32>
    %69 = tpu.matmul %68, %59, %cst_20 {dimension_numbers = #tpu.dot_dimension_numbers<[2], [1], [1], [2], [0, 0, 0, 1, 1, 2], [0], [0]>} : vector<2x8x8xbf16>, vector<2x8x32xbf16>, vector<2x8x32xf32> -> vector<2x8x32xf32>
    "tpu.trace_stop"() : () -> ()
    %70 = tpu.reciprocal %67 {approx = true} : vector<2x8x1xf32> -> vector<2x8x1xf32>
    %71 = vector.broadcast %70 : vector<2x8x1xf32> to vector<2x8x32xf32>
    %72 = arith.mulf %69, %71 : vector<2x8x32xf32>
    %73 = vector.shape_cast %72 : vector<2x8x32xf32> to vector<16x32xf32>
    %74 = arith.truncf %73 : vector<16x32xf32> to vector<16x32xbf16>
    %75 = vector.extract_strided_slice %30 {offsets = [0, 64], sizes = [16, 32], strides = [1, 1]} : vector<16x128xbf16> to vector<16x32xbf16>
    %76 = vector.shape_cast %75 : vector<16x32xbf16> to vector<2x8x32xbf16>
    %77 = vector.extract_strided_slice %31 {offsets = [0, 64], sizes = [16, 32], strides = [1, 1]} : vector<16x128xbf16> to vector<16x32xbf16>
    %78 = vector.shape_cast %77 : vector<16x32xbf16> to vector<2x8x32xbf16>
    %79 = vector.extract_strided_slice %32 {offsets = [0, 64], sizes = [16, 32], strides = [1, 1]} : vector<16x128xbf16> to vector<16x32xbf16>
    %80 = vector.shape_cast %79 : vector<16x32xbf16> to vector<2x8x32xbf16>
    "tpu.trace_start"() <{level = 10 : i32, message = "bqd,bkd->bqk"}> : () -> ()
    %cst_21 = arith.constant dense<0.000000e+00> : vector<2x8x8xf32>
    %81 = tpu.matmul %76, %78, %cst_21 {dimension_numbers = #tpu.dot_dimension_numbers<[2], [2], [1], [1], [0, 0, 0, 1, 1, 1], [0], [0]>} : vector<2x8x32xbf16>, vector<2x8x32xbf16>, vector<2x8x8xf32> -> vector<2x8x8xf32>
    "tpu.trace_stop"() : () -> ()
    %cst_22 = arith.constant dense<0xFF800000> : vector<2x8xf32>
    %82 = vector.multi_reduction <maximumf>, %81, %cst_22 [2] : vector<2x8x8xf32> to vector<2x8xf32>
    %83 = vector.shape_cast %82 : vector<2x8xf32> to vector<2x8x1xf32>
    %84 = vector.broadcast %83 : vector<2x8x1xf32> to vector<2x8x8xf32>
    %85 = arith.subf %81, %84 : vector<2x8x8xf32>
    %86 = math.exp %85 : vector<2x8x8xf32>
    %cst_23 = arith.constant dense<0.000000e+00> : vector<2x8xf32>
    %87 = vector.multi_reduction <add>, %86, %cst_23 [2] : vector<2x8x8xf32> to vector<2x8xf32>
    %88 = vector.shape_cast %87 : vector<2x8xf32> to vector<2x8x1xf32>
    %89 = arith.truncf %86 : vector<2x8x8xf32> to vector<2x8x8xbf16>
    "tpu.trace_start"() <{level = 10 : i32, message = "bqk,bkd->bqd"}> : () -> ()
    %cst_24 = arith.constant dense<0.000000e+00> : vector<2x8x32xf32>
    %90 = tpu.matmul %89, %80, %cst_24 {dimension_numbers = #tpu.dot_dimension_numbers<[2], [1], [1], [2], [0, 0, 0, 1, 1, 2], [0], [0]>} : vector<2x8x8xbf16>, vector<2x8x32xbf16>, vector<2x8x32xf32> -> vector<2x8x32xf32>
    "tpu.trace_stop"() : () -> ()
    %91 = tpu.reciprocal %88 {approx = true} : vector<2x8x1xf32> -> vector<2x8x1xf32>
    %92 = vector.broadcast %91 : vector<2x8x1xf32> to vector<2x8x32xf32>
    %93 = arith.mulf %90, %92 : vector<2x8x32xf32>
    %94 = vector.shape_cast %93 : vector<2x8x32xf32> to vector<16x32xf32>
    %95 = arith.truncf %94 : vector<16x32xf32> to vector<16x32xbf16>
    %96 = vector.extract_strided_slice %30 {offsets = [0, 96], sizes = [16, 32], strides = [1, 1]} : vector<16x128xbf16> to vector<16x32xbf16>
    %97 = vector.shape_cast %96 : vector<16x32xbf16> to vector<2x8x32xbf16>
    %98 = vector.extract_strided_slice %31 {offsets = [0, 96], sizes = [16, 32], strides = [1, 1]} : vector<16x128xbf16> to vector<16x32xbf16>
    %99 = vector.shape_cast %98 : vector<16x32xbf16> to vector<2x8x32xbf16>
    %100 = vector.extract_strided_slice %32 {offsets = [0, 96], sizes = [16, 32], strides = [1, 1]} : vector<16x128xbf16> to vector<16x32xbf16>
    %101 = vector.shape_cast %100 : vector<16x32xbf16> to vector<2x8x32xbf16>
    "tpu.trace_start"() <{level = 10 : i32, message = "bqd,bkd->bqk"}> : () -> ()
    %cst_25 = arith.constant dense<0.000000e+00> : vector<2x8x8xf32>
    %102 = tpu.matmul %97, %99, %cst_25 {dimension_numbers = #tpu.dot_dimension_numbers<[2], [2], [1], [1], [0, 0, 0, 1, 1, 1], [0], [0]>} : vector<2x8x32xbf16>, vector<2x8x32xbf16>, vector<2x8x8xf32> -> vector<2x8x8xf32>
    "tpu.trace_stop"() : () -> ()
    %cst_26 = arith.constant dense<0xFF800000> : vector<2x8xf32>
    %103 = vector.multi_reduction <maximumf>, %102, %cst_26 [2] : vector<2x8x8xf32> to vector<2x8xf32>
    %104 = vector.shape_cast %103 : vector<2x8xf32> to vector<2x8x1xf32>
    %105 = vector.broadcast %104 : vector<2x8x1xf32> to vector<2x8x8xf32>
    %106 = arith.subf %102, %105 : vector<2x8x8xf32>
    %107 = math.exp %106 : vector<2x8x8xf32>
    %cst_27 = arith.constant dense<0.000000e+00> : vector<2x8xf32>
    %108 = vector.multi_reduction <add>, %107, %cst_27 [2] : vector<2x8x8xf32> to vector<2x8xf32>
    %109 = vector.shape_cast %108 : vector<2x8xf32> to vector<2x8x1xf32>
    %110 = arith.truncf %107 : vector<2x8x8xf32> to vector<2x8x8xbf16>
    "tpu.trace_start"() <{level = 10 : i32, message = "bqk,bkd->bqd"}> : () -> ()
    %cst_28 = arith.constant dense<0.000000e+00> : vector<2x8x32xf32>
    %111 = tpu.matmul %110, %101, %cst_28 {dimension_numbers = #tpu.dot_dimension_numbers<[2], [1], [1], [2], [0, 0, 0, 1, 1, 2], [0], [0]>} : vector<2x8x8xbf16>, vector<2x8x32xbf16>, vector<2x8x32xf32> -> vector<2x8x32xf32>
    "tpu.trace_stop"() : () -> ()
    %112 = tpu.reciprocal %109 {approx = true} : vector<2x8x1xf32> -> vector<2x8x1xf32>
    %113 = vector.broadcast %112 : vector<2x8x1xf32> to vector<2x8x32xf32>
    %114 = arith.mulf %111, %113 : vector<2x8x32xf32>
    %115 = vector.shape_cast %114 : vector<2x8x32xf32> to vector<16x32xf32>
    %116 = arith.truncf %115 : vector<16x32xf32> to vector<16x32xbf16>
    %117 = tpu.concatenate %53, %74, %95, %116 in 1 : vector<16x32xbf16>, vector<16x32xbf16>, vector<16x32xbf16>, vector<16x32xbf16> -> vector<16x128xbf16>
    %c0_29 = arith.constant 0 : index
    %c0_30 = arith.constant 0 : index
    %118 = vector.load %arg5[%c0_29, %c0_30] : memref<128x128xbf16, #tpu.memory_space<vmem>>, vector<128x128xbf16>
    %cst_31 = arith.constant dense<0.000000e+00> : vector<16x128xf32>
    %119 = tpu.matmul %117, %118, %cst_31 {dimension_numbers = #tpu.dot_dimension_numbers<[1], [0], [0], [1], [0, 0, 1, 1], [], []>} : vector<16x128xbf16>, vector<128x128xbf16>, vector<16x128xf32> -> vector<16x128xf32>
    %c0_32 = arith.constant 0 : index
    %c0_33 = arith.constant 0 : index
    %120 = vector.load %arg6[%c0_32, %c0_33] : memref<1x128xf32, #tpu.memory_space<vmem>>, vector<1x128xf32>
    %121 = vector.broadcast %120 : vector<1x128xf32> to vector<16x128xf32>
    %122 = arith.addf %119, %121 : vector<16x128xf32>
    %cst_34 = arith.constant 4.000000e-01 : f32
    %123 = vector.broadcast %cst_34 : f32 to vector<16x128xf32>
    %124 = arith.mulf %123, %25 : vector<16x128xf32>
    %125 = arith.addf %122, %124 : vector<16x128xf32>
    %126 = arith.addf %1, %125 : vector<16x128xf32>
    %cst_35 = arith.constant dense<0.000000e+00> : vector<16xf32>
    %127 = vector.multi_reduction <add>, %126, %cst_35 [1] : vector<16x128xf32> to vector<16xf32>
    %128 = vector.shape_cast %127 : vector<16xf32> to vector<16x1xf32>
    %cst_36 = arith.constant 1.280000e+02 : f32
    %129 = vector.broadcast %cst_36 : f32 to vector<16x1xf32>
    %130 = arith.divf %128, %129 : vector<16x1xf32>
    %131 = vector.broadcast %130 : vector<16x1xf32> to vector<16x128xf32>
    %132 = arith.subf %126, %131 : vector<16x128xf32>
    %133 = arith.mulf %132, %132 : vector<16x128xf32>
    %cst_37 = arith.constant dense<0.000000e+00> : vector<16xf32>
    %134 = vector.multi_reduction <add>, %133, %cst_37 [1] : vector<16x128xf32> to vector<16xf32>
    %135 = vector.shape_cast %134 : vector<16xf32> to vector<16x1xf32>
    %cst_38 = arith.constant 1.280000e+02 : f32
    %136 = vector.broadcast %cst_38 : f32 to vector<16x1xf32>
    %137 = arith.divf %135, %136 : vector<16x1xf32>
    %138 = vector.broadcast %130 : vector<16x1xf32> to vector<16x128xf32>
    %139 = arith.subf %126, %138 : vector<16x128xf32>
    %cst_39 = arith.constant 9.99999974E-6 : f32
    %140 = vector.broadcast %cst_39 : f32 to vector<16x1xf32>
    %141 = arith.addf %137, %140 : vector<16x1xf32>
    %142 = math.rsqrt %141 : vector<16x1xf32>
    %143 = vector.broadcast %142 : vector<16x1xf32> to vector<16x128xf32>
    %144 = arith.mulf %139, %143 : vector<16x128xf32>
    %c0_40 = arith.constant 0 : index
    %c0_41 = arith.constant 0 : index
    %145 = vector.load %arg7[%c0_40, %c0_41] : memref<1x128xf32, #tpu.memory_space<vmem>>, vector<1x128xf32>
    %146 = vector.broadcast %145 : vector<1x128xf32> to vector<16x128xf32>
    %147 = arith.mulf %144, %146 : vector<16x128xf32>
    %c0_42 = arith.constant 0 : index
    %c0_43 = arith.constant 0 : index
    %148 = vector.load %arg8[%c0_42, %c0_43] : memref<1x128xf32, #tpu.memory_space<vmem>>, vector<1x128xf32>
    %149 = vector.broadcast %148 : vector<1x128xf32> to vector<16x128xf32>
    %150 = arith.addf %147, %149 : vector<16x128xf32>
    %151 = arith.truncf %150 : vector<16x128xf32> to vector<16x128xbf16>
    %c0_44 = arith.constant 0 : index
    %c0_45 = arith.constant 0 : index
    %152 = vector.load %arg9[%c0_44, %c0_45] : memref<128x512xbf16, #tpu.memory_space<vmem>>, vector<128x512xbf16>
    %cst_46 = arith.constant dense<0.000000e+00> : vector<16x512xf32>
    %153 = tpu.matmul %151, %152, %cst_46 {dimension_numbers = #tpu.dot_dimension_numbers<[1], [0], [0], [1], [0, 0, 1, 1], [], []>} : vector<16x128xbf16>, vector<128x512xbf16>, vector<16x512xf32> -> vector<16x512xf32>
    %c0_47 = arith.constant 0 : index
    %c0_48 = arith.constant 0 : index
    %154 = vector.load %arg10[%c0_47, %c0_48] : memref<1x512xf32, #tpu.memory_space<vmem>>, vector<1x512xf32>
    %155 = vector.broadcast %154 : vector<1x512xf32> to vector<16x512xf32>
    %156 = arith.addf %153, %155 : vector<16x512xf32>
    %cst_49 = arith.constant 5.000000e-01 : f32
    %157 = vector.broadcast %cst_49 : f32 to vector<16x512xf32>
    %158 = arith.mulf %157, %156 : vector<16x512xf32>
    %cst_50 = arith.constant 0.707106769 : f32
    %159 = vector.broadcast %cst_50 : f32 to vector<16x512xf32>
    %160 = arith.mulf %156, %159 : vector<16x512xf32>
    %161 = math.erf %160 : vector<16x512xf32>
    %cst_51 = arith.constant 1.000000e+00 : f32
    %162 = vector.broadcast %cst_51 : f32 to vector<16x512xf32>
    %163 = arith.addf %162, %161 : vector<16x512xf32>
    %164 = arith.mulf %158, %163 : vector<16x512xf32>
    %165 = arith.truncf %164 : vector<16x512xf32> to vector<16x512xbf16>
    %c0_52 = arith.constant 0 : index
    %c0_53 = arith.constant 0 : index
    %166 = vector.load %arg11[%c0_52, %c0_53] : memref<512x128xbf16, #tpu.memory_space<vmem>>, vector<512x128xbf16>
    %cst_54 = arith.constant dense<0.000000e+00> : vector<16x128xf32>
    %167 = tpu.matmul %165, %166, %cst_54 {dimension_numbers = #tpu.dot_dimension_numbers<[1], [0], [0], [1], [0, 0, 1, 1], [], []>} : vector<16x512xbf16>, vector<512x128xbf16>, vector<16x128xf32> -> vector<16x128xf32>
    %c0_55 = arith.constant 0 : index
    %c0_56 = arith.constant 0 : index
    %168 = vector.load %arg12[%c0_55, %c0_56] : memref<1x128xf32, #tpu.memory_space<vmem>>, vector<1x128xf32>
    %169 = vector.broadcast %168 : vector<1x128xf32> to vector<16x128xf32>
    %170 = arith.addf %167, %169 : vector<16x128xf32>
    %171 = arith.addf %126, %170 : vector<16x128xf32>
    %172 = vector.shape_cast %171 : vector<16x128xf32> to vector<2x8x128xf32>
    %c0_57 = arith.constant 0 : index
    %c0_58 = arith.constant 0 : index
    %c0_59 = arith.constant 0 : index
    %173 = vector.load %arg13[%c0_57, %c0_58, %c0_59] : memref<2x8x128xf32, #tpu.memory_space<vmem>>, vector<2x8x128xf32>
    tpu.vector_store %arg13[%c0_57, %c0_58, %c0_59], %172 {strides = array<i32>} : memref<2x8x128xf32, #tpu.memory_space<vmem>>, vector<2x8x128xf32>,
    return
  }
  func.func @transform_0(%arg0: i32) -> (i32, i32, i32) {
    %c0_i32 = arith.constant 0 : i32
    %c0_i32_0 = arith.constant 0 : i32
    %c0_i32_1 = arith.constant 0 : i32
    return %arg0, %c0_i32, %c0_i32_0 : i32, i32, i32
  }
  func.func @transform_1(%arg0: i32) -> (i32, i32) {
    %c0_i32 = arith.constant 0 : i32
    %c0_i32_0 = arith.constant 0 : i32
    %c0_i32_1 = arith.constant 0 : i32
    return %c0_i32, %c0_i32_0 : i32, i32
  }
  func.func @transform_2(%arg0: i32) -> (i32, i32) {
    %c0_i32 = arith.constant 0 : i32
    %c0_i32_0 = arith.constant 0 : i32
    %c0_i32_1 = arith.constant 0 : i32
    return %c0_i32, %c0_i32_0 : i32, i32
  }
  func.func @transform_3(%arg0: i32) -> (i32, i32) {
    %c0_i32 = arith.constant 0 : i32
    %c0_i32_0 = arith.constant 0 : i32
    %c0_i32_1 = arith.constant 0 : i32
    return %c0_i32, %c0_i32_0 : i32, i32
  }
  func.func @transform_4(%arg0: i32) -> (i32, i32) {
    %c0_i32 = arith.constant 0 : i32
    %c0_i32_0 = arith.constant 0 : i32
    %c0_i32_1 = arith.constant 0 : i32
    return %c0_i32, %c0_i32_0 : i32, i32
  }
  func.func @transform_5(%arg0: i32) -> (i32, i32) {
    %c0_i32 = arith.constant 0 : i32
    %c0_i32_0 = arith.constant 0 : i32
    %c0_i32_1 = arith.constant 0 : i32
    return %c0_i32, %c0_i32_0 : i32, i32
  }
  func.func @transform_6(%arg0: i32) -> (i32, i32) {
    %c0_i32 = arith.constant 0 : i32
    %c0_i32_0 = arith.constant 0 : i32
    %c0_i32_1 = arith.constant 0 : i32
    return %c0_i32, %c0_i32_0 : i32, i32
  }
  func.func @transform_7(%arg0: i32) -> (i32, i32) {
    %c0_i32 = arith.constant 0 : i32
    %c0_i32_0 = arith.constant 0 : i32
    %c0_i32_1 = arith.constant 0 : i32
    return %c0_i32, %c0_i32_0 : i32, i32
  }
  func.func @transform_8(%arg0: i32) -> (i32, i32) {
    %c0_i32 = arith.constant 0 : i32
    %c0_i32_0 = arith.constant 0 : i32
    %c0_i32_1 = arith.constant 0 : i32
    return %c0_i32, %c0_i32_0 : i32, i32
  }
  func.func @transform_9(%arg0: i32) -> (i32, i32) {
    %c0_i32 = arith.constant 0 : i32
    %c0_i32_0 = arith.constant 0 : i32
    %c0_i32_1 = arith.constant 0 : i32
    return %c0_i32, %c0_i32_0 : i32, i32
  }
  func.func @transform_10(%arg0: i32) -> (i32, i32) {
    %c0_i32 = arith.constant 0 : i32
    %c0_i32_0 = arith.constant 0 : i32
    %c0_i32_1 = arith.constant 0 : i32
    return %c0_i32, %c0_i32_0 : i32, i32
  }
  func.func @transform_11(%arg0: i32) -> (i32, i32) {
    %c0_i32 = arith.constant 0 : i32
    %c0_i32_0 = arith.constant 0 : i32
    %c0_i32_1 = arith.constant 0 : i32
    return %c0_i32, %c0_i32_0 : i32, i32
  }
  func.func @transform_12(%arg0: i32) -> (i32, i32, i32) {
    %c0_i32 = arith.constant 0 : i32
    %c0_i32_0 = arith.constant 0 : i32
    %c0_i32_1 = arith.constant 0 : i32
    return %arg0, %c0_i32, %c0_i32_0 : i32, i32, i32
  }
}

</mosaic_0001>

<bundles_post_ra>
// kernel: tpu_custom_call.1
= control target key start
LH: loop header
LB: loop body
LE: loop exit
PB: predicated region body
PF: predicated region fallthrough
CT: control target
= control target key end

     0   :  { %17 = vsyncpa [#allocation3], 0  ;;  %s3670_s0 = inlined_call_operand.hbm [shape: f32[2,8,128], index: 0, kind: input, shape index: {}]   ;;  %s3671_s1 = inlined_call_operand.hbm [shape: f32[1,128], index: 1, kind: input, shape index: {}]   ;;  %s3672_s2 = inlined_call_operand.hbm [shape: f32[1,128], index: 2, kind: input, shape index: {}]   ;;  %s3673_s3 = inlined_call_operand.hbm [shape: bf16[128,384], index: 3, kind: input, shape index: {}]   ;;  %s3674_s4 = inlined_call_operand.hbm [shape: bf16[128,128], index: 4, kind: input, shape index: {}]   ;;  %s3675_s5 = inlined_call_operand.hbm [shape: f32[1,128], index: 5, kind: input, shape index: {}]   ;;  %s3676_s6 = inlined_call_operand.hbm [shape: f32[1,128], index: 6, kind: input, shape index: {}]   ;;  %s3677_s7 = inlined_call_operand.hbm [shape: f32[1,128], index: 7, kind: input, shape index: {}]   ;;  %s3678_s8 = inlined_call_operand.hbm [shape: bf16[128,512], index: 8, kind: input, shape index: {}]   ;;  %s3679_s9 = inlined_call_operand.hbm [shape: f32[1,512], index: 9, kind: input, shape index: {}]   ;;  %s3680_s10 = inlined_call_operand.hbm [shape: bf16[512,128], index: 10, kind: input, shape index: {}]   ;;  %s3681_s11 = inlined_call_operand.hbm [shape: f32[1,128], index: 11, kind: input, shape index: {}]   ;;  %s3682_s12 = inlined_call_operand.hbm [shape: f32[2,8,128], index: 12, kind: output, shape index: {}]  }
   0x1   :  { %18 = vsyncpa [#allocation6], 0 }
   0x2   :  { %19 = vsyncpa [#allocation9], 0 }
   0x3   :  { %20 = vsyncpa [#allocation12], 0 }
   0x4   :  { %21 = vsyncpa [#allocation15], 0 }
   0x5   :  { %22 = vsyncpa [#allocation18], 0 }
   0x6   :  { %23 = vsyncpa [#allocation21], 0 }
   0x7   :  { %24 = vsyncpa [#allocation4], 0  ;;  %s3133_s21 = smov [#allocation5]   ;;  %s3134_s23 = smov [#allocation8]  }
   0x8   :  { %s43_s22 = sshll.u32 %s3133_s21, 4  ;;  %s62_s24 = sshll.u32 %s3134_s23, 4  ;;  %s44_s22 = int_to_ptr.vmem [resolvable:$true] %s43_s22  ;;  %s3224_s24 = int_to_ptr.vmem [resolvable:$true] %s62_s24 }
   0x9   :  { %s2831_s27 = scalar_lea.hbm %s3671_s1, 16 }
   0xa   :  { %p2832_p0 = scmp.ne.s32.totalorder %s3671_s1, %s2831_s27  ;;  %p2835_p1 = scmp.lt.u32.totalorder %s2831_s27, %s3671_s1 }
   0xc   :  { %p2837_p2 = pnand %p2835_p1, %p2832_p0 }
   0xe   :  { %2840 = shalt.err (!%p2837_p2)
}
   0xf   :  { %s2841_s14 = scalar_lea.vmem %s44_s22, 16  ;;  %s2845_s15 = scalar_lea.vmem %s44_s22, 32 }
  0x10   :  { %p2842_p3 = scmp.ne.s32.totalorder %s44_s22, %s2841_s14  ;;  %p2846_p4 = scmp.lt.s32.totalorder %s44_s22, %s44_s22 }
  0x11   :  { %p2847_p5 = scmp.lt.s32.totalorder %s2845_s15, %s2841_s14 }
  0x13   :  { %p2848_p6 = por %p2847_p5, %p2846_p4 }
  0x15   :  { %p2849_p7 = pnand %p2848_p6, %p2842_p3 }
  0x17   :  { %2852 = shalt.err (!%p2849_p7)
}
  0x18   :  { %46 = dma.hbm_to_vmem [thread:$0]  %s3671_s1, 16, %s44_s22, [#allocation6]  }
  0x19   :  { %s2853_s20 = scalar_lea.hbm %s3673_s3, 3072 }
  0x1a   :  { %p2854_p8 = scmp.ne.s32.totalorder %s3673_s3, %s2853_s20  ;;  %p2857_p9 = scmp.lt.u32.totalorder %s2853_s20, %s3673_s3 }
  0x1c   :  { %p2859_p10 = pnand %p2857_p9, %p2854_p8 }
  0x1e   :  { %2862 = shalt.err (!%p2859_p10)
}
  0x1f   :  { %s2863_s27 = scalar_lea.vmem %s3224_s24, 3072  ;;  %p2868_p12 = scmp.lt.s32.totalorder %s3224_s24, %s3224_s24 }
  0x20   :  { %p2864_p11 = scmp.ne.s32.totalorder %s3224_s24, %s2863_s27  ;;  %p2869_p13 = scmp.lt.s32.totalorder %s2863_s27, %s2863_s27 }
  0x22   :  { %p2870_p0 = por %p2869_p13, %p2868_p12 }
  0x24   :  { %p2871_p1 = pnand %p2870_p0, %p2864_p11 }
  0x26   :  { %2874 = shalt.err (!%p2871_p1)
}
  0x27   :  { %s3135_s1 = smov 192   ;;  %s3136_s22 = smov 12  }
  0x28   :  { %68 = dma.hbm_to_vmem [thread:$0]  %s3673_s3, 3072, %s3224_s24, [#allocation9], %s3135_s1, %s3135_s1, %s3136_s22  }
  0x29   :  { %s3137_s30 = smov [#allocation11]   ;;  %s3138_s14 = smov [#allocation14]  }
  0x2a   :  { %s87_s13 = sshll.u32 %s3137_s30, 4  ;;  %s107_s15 = sshll.u32 %s3138_s14, 4  ;;  %s88_s13 = int_to_ptr.vmem [resolvable:$true] %s87_s13  ;;  %s108_s15 = int_to_ptr.vmem [resolvable:$true] %s107_s15 }
  0x2b   :  { %s2875_s18 = scalar_lea.hbm %s3675_s5, 16 }
  0x2c   :  { %p2876_p2 = scmp.ne.s32.totalorder %s3675_s5, %s2875_s18  ;;  %p2879_p3 = scmp.lt.u32.totalorder %s2875_s18, %s3675_s5 }
  0x2e   :  { %p2881_p4 = pnand %p2879_p3, %p2876_p2 }
  0x30   :  { %2884 = shalt.err (!%p2881_p4)
}
  0x31   :  { %s2885_s3 = scalar_lea.vmem %s88_s13, 16  ;;  %s2889_s24 = scalar_lea.vmem %s88_s13, 32 }
  0x32   :  { %p2886_p5 = scmp.ne.s32.totalorder %s88_s13, %s2885_s3  ;;  %p2890_p6 = scmp.lt.s32.totalorder %s88_s13, %s88_s13 }
  0x33   :  { %p2891_p7 = scmp.lt.s32.totalorder %s2889_s24, %s2885_s3 }
  0x35   :  { %p2892_p8 = por %p2891_p7, %p2890_p6 }
  0x37   :  { %p2893_p9 = pnand %p2892_p8, %p2886_p5 }
  0x39   :  { %2896 = shalt.err (!%p2893_p9)
}
  0x3a   :  { %90 = dma.hbm_to_vmem [thread:$0]  %s3675_s5, 16, %s88_s13, [#allocation12]  }
  0x3b   :  { %s2897_s22 = scalar_lea.hbm %s3677_s7, 16 }
  0x3c   :  { %p2898_p10 = scmp.ne.s32.totalorder %s3677_s7, %s2897_s22  ;;  %p2901_p11 = scmp.lt.u32.totalorder %s2897_s22, %s3677_s7 }
  0x3e   :  { %p2903_p12 = pnand %p2901_p11, %p2898_p10 }
  0x40   :  { %2906 = shalt.err (!%p2903_p12)
}
  0x41   :  { %s2907_s16 = scalar_lea.vmem %s108_s15, 16  ;;  %s2911_s17 = scalar_lea.vmem %s108_s15, 32 }
  0x42   :  { %p2908_p13 = scmp.ne.s32.totalorder %s108_s15, %s2907_s16  ;;  %p2912_p0 = scmp.lt.s32.totalorder %s108_s15, %s108_s15 }
  0x43   :  { %p2913_p1 = scmp.lt.s32.totalorder %s2911_s17, %s2907_s16 }
  0x45   :  { %p2914_p2 = por %p2913_p1, %p2912_p0 }
  0x47   :  { %p2915_p3 = pnand %p2914_p2, %p2908_p13 }
  0x49   :  { %2918 = shalt.err (!%p2915_p3)
}
  0x4a   :  { %110 = dma.hbm_to_vmem [thread:$0]  %s3677_s7, 16, %s108_s15, [#allocation15]  }
  0x4b   :  { %s3139_s18 = smov [#allocation17]   ;;  %s3140_s20 = smov [#allocation2]  }
  0x4c   :  { %s129_s19 = sshll.u32 %s3139_s18, 4  ;;  %s30_s21 = sshll.u32 %s3140_s20, 4  ;;  %s130_s19 = int_to_ptr.vmem [resolvable:$true] %s129_s19  ;;  %s3279_s21 = int_to_ptr.vmem [resolvable:$true] %s30_s21 }
  0x4d   :  { %s2919_s24 = scalar_lea.hbm %s3679_s9, 64 }
  0x4e   :  { %p2920_p4 = scmp.ne.s32.totalorder %s3679_s9, %s2919_s24  ;;  %p2923_p5 = scmp.lt.u32.totalorder %s2919_s24, %s3679_s9 }
  0x50   :  { %p2925_p6 = pnand %p2923_p5, %p2920_p4 }
  0x52   :  { %2928 = shalt.err (!%p2925_p6)
}
  0x53   :  { %s2929_s7 = scalar_lea.vmem %s130_s19, 64  ;;  %p2934_p8 = scmp.lt.s32.totalorder %s130_s19, %s130_s19 }
  0x54   :  { %p2930_p7 = scmp.ne.s32.totalorder %s130_s19, %s2929_s7  ;;  %p2935_p9 = scmp.lt.s32.totalorder %s2929_s7, %s2929_s7 }
  0x56   :  { %p2936_p10 = por %p2935_p9, %p2934_p8 }
  0x58   :  { %p2937_p11 = pnand %p2936_p10, %p2930_p7 }
  0x5a   :  { %2940 = shalt.err (!%p2937_p11)
}
  0x5b   :  { %132 = dma.hbm_to_vmem [thread:$0]  %s3679_s9, 64, %s130_s19, [#allocation18]  }
  0x5c   :  { %s2941_s30 = scalar_lea.hbm %s3670_s0, 256 }
  0x5d   :  { %p2942_p12 = scmp.ne.s32.totalorder %s3670_s0, %s2941_s30  ;;  %p2945_p13 = scmp.lt.u32.totalorder %s2941_s30, %s3670_s0 }
  0x5f   :  { %p2947_p0 = pnand %p2945_p13, %p2942_p12 }
  0x61   :  { %2950 = shalt.err (!%p2947_p0)
}
  0x62   :  { %s2951_s13 = scalar_lea.vmem %s3279_s21, 256  ;;  %p2956_p2 = scmp.lt.s32.totalorder %s3279_s21, %s3279_s21 }
  0x63   :  { %p2952_p1 = scmp.ne.s32.totalorder %s3279_s21, %s2951_s13  ;;  %p2957_p3 = scmp.lt.s32.totalorder %s2951_s13, %s2951_s13 }
  0x65   :  { %p2958_p4 = por %p2957_p3, %p2956_p2 }
  0x67   :  { %p2959_p5 = pnand %p2958_p4, %p2952_p1 }
  0x69   :  { %2962 = shalt.err (!%p2959_p5)
}
  0x6a   :  { %s3141_s9 = smov 128   ;;  %s3142_s18 = smov 8  }
  0x6b   :  { %36 = dma.hbm_to_vmem [thread:$0]  %s3670_s0, 256, %s3279_s21, [#allocation3], %s3141_s9, %s3141_s9, %s3142_s18  }
  0x6c   :  { %s3143_s23 = smov [#allocation7]   ;;  %s3144_s24 = smov [#allocation10]  }
  0x6d   :  { %s53_s3 = sshll.u32 %s3143_s23, 4  ;;  %s74_s25 = sshll.u32 %s3144_s24, 4  ;;  %s54_s3 = int_to_ptr.vmem [resolvable:$true] %s53_s3  ;;  %s3313_s25 = int_to_ptr.vmem [resolvable:$true] %s74_s25 }
  0x6e   :  { %s2963_s1 = scalar_lea.hbm %s3672_s2, 16 }
  0x6f   :  { %p2964_p6 = scmp.ne.s32.totalorder %s3672_s2, %s2963_s1  ;;  %p2967_p7 = scmp.lt.u32.totalorder %s2963_s1, %s3672_s2 }
  0x71   :  { %p2969_p8 = pnand %p2967_p7, %p2964_p6 }
  0x73   :  { %2972 = shalt.err (!%p2969_p8)
}
  0x74   :  { %s2973_s0 = scalar_lea.vmem %s54_s3, 16  ;;  %s2977_s21 = scalar_lea.vmem %s54_s3, 32 }
  0x75   :  { %p2974_p9 = scmp.ne.s32.totalorder %s54_s3, %s2973_s0  ;;  %p2978_p10 = scmp.lt.s32.totalorder %s54_s3, %s54_s3 }
  0x76   :  { %p2979_p11 = scmp.lt.s32.totalorder %s2977_s21, %s2973_s0 }
  0x78   :  { %p2980_p12 = por %p2979_p11, %p2978_p10 }
  0x7a   :  { %p2981_p13 = pnand %p2980_p12, %p2974_p9 }
  0x7c   :  { %2984 = shalt.err (!%p2981_p13)
}
  0x7d   :  { %56 = dma.hbm_to_vmem [thread:$0]  %s3672_s2, 16, %s54_s3, [#allocation6]  }
  0x7e   :  { %s2985_s17 = scalar_lea.hbm %s3674_s4, 1024 }
  0x7f   :  { %p2986_p0 = scmp.ne.s32.totalorder %s3674_s4, %s2985_s17  ;;  %p2989_p1 = scmp.lt.u32.totalorder %s2985_s17, %s3674_s4 }
  0x81   :  { %p2991_p2 = pnand %p2989_p1, %p2986_p0 }
  0x83   :  { %2994 = shalt.err (!%p2991_p2)
}
  0x84   :  { %s2995_s23 = scalar_lea.vmem %s3313_s25, 1024  ;;  %p3000_p4 = scmp.lt.s32.totalorder %s3313_s25, %s3313_s25 }
  0x85   :  { %p2996_p3 = scmp.ne.s32.totalorder %s3313_s25, %s2995_s23  ;;  %p3001_p5 = scmp.lt.s32.totalorder %s2995_s23, %s2995_s23 }
  0x87   :  { %p3002_p6 = por %p3001_p5, %p3000_p4 }
  0x89   :  { %p3003_p7 = pnand %p3002_p6, %p2996_p3 }
  0x8b   :  { %3006 = shalt.err (!%p3003_p7)
}
  0x8c   :  { %s3145_s2 = smov 64   ;;  %s3146_s3 = smov 4  }
  0x8d   :  { %80 = dma.hbm_to_vmem [thread:$0]  %s3674_s4, 1024, %s3313_s25, [#allocation9], %s3145_s2, %s3145_s2, %s3146_s3  }
  0x8e   :  { %s3147_s27 = smov [#allocation13]   ;;  %s3148_s7 = smov [#allocation16]  }
  0x8f   :  { %s97_s1 = sshll.u32 %s3147_s27, 4  ;;  %s116_s15 = sshll.u32 %s3148_s7, 4  ;;  %s98_s1 = int_to_ptr.vmem [resolvable:$true] %s97_s1  ;;  %s3347_s15 = int_to_ptr.vmem [resolvable:$true] %s116_s15 }
  0x90   :  { %s3007_s0 = scalar_lea.hbm %s3676_s6, 16 }
  0x91   :  { %p3008_p8 = scmp.ne.s32.totalorder %s3676_s6, %s3007_s0  ;;  %p3011_p9 = scmp.lt.u32.totalorder %s3007_s0, %s3676_s6 }
  0x93   :  { %p3013_p10 = pnand %p3011_p9, %p3008_p8 }
  0x95   :  { %3016 = shalt.err (!%p3013_p10)
}
  0x96   :  { %s3017_s4 = scalar_lea.vmem %s98_s1, 16  ;;  %s3021_s25 = scalar_lea.vmem %s98_s1, 32 }
  0x97   :  { %p3018_p11 = scmp.ne.s32.totalorder %s98_s1, %s3017_s4  ;;  %p3022_p12 = scmp.lt.s32.totalorder %s98_s1, %s98_s1 }
  0x98   :  { %p3023_p13 = scmp.lt.s32.totalorder %s3021_s25, %s3017_s4 }
  0x9a   :  { %p3024_p0 = por %p3023_p13, %p3022_p12 }
  0x9c   :  { %p3025_p1 = pnand %p3024_p0, %p3018_p11 }
  0x9e   :  { %3028 = shalt.err (!%p3025_p1)
}
  0x9f   :  { %100 = dma.hbm_to_vmem [thread:$0]  %s3676_s6, 16, %s98_s1, [#allocation12]  }
  0xa0   :  { %s3029_s19 = scalar_lea.hbm %s3678_s8, 4096 }
  0xa1   :  { %p3030_p2 = scmp.ne.s32.totalorder %s3678_s8, %s3029_s19  ;;  %p3033_p3 = scmp.lt.u32.totalorder %s3029_s19, %s3678_s8 }
  0xa3   :  { %p3035_p4 = pnand %p3033_p3, %p3030_p2 }
  0xa5   :  { %3038 = shalt.err (!%p3035_p4)
}
  0xa6   :  { %s3039_s27 = scalar_lea.vmem %s3347_s15, 4096  ;;  %p3044_p6 = scmp.lt.s32.totalorder %s3347_s15, %s3347_s15 }
  0xa7   :  { %p3040_p5 = scmp.ne.s32.totalorder %s3347_s15, %s3039_s27  ;;  %p3045_p7 = scmp.lt.s32.totalorder %s3039_s27, %s3039_s27 }
  0xa9   :  { %p3046_p8 = por %p3045_p7, %p3044_p6 }
  0xab   :  { %p3047_p9 = pnand %p3046_p8, %p3040_p5 }
  0xad   :  { %3050 = shalt.err (!%p3047_p9)
}
  0xae   :  { %s3149_s6 = smov 256   ;;  %s3150_s1 = smov 16  }
  0xaf   :  { %122 = dma.hbm_to_vmem [thread:$0]  %s3678_s8, 4096, %s3347_s15, [#allocation15], %s3149_s6, %s3149_s6, %s3150_s1  }
  0xb0   :  { %s3151_s28 = smov [#allocation19]   ;;  %s3152_s21 = smov [#allocation20]  }
  0xb1   :  { %s138_s0 = sshll.u32 %s3151_s28, 4  ;;  %s151_s29 = sshll.u32 %s3152_s21, 4  ;;  %s139_s0 = int_to_ptr.vmem [resolvable:$true] %s138_s0  ;;  %s152_s29 = int_to_ptr.vmem [resolvable:$true] %s151_s29 }
  0xb2   :  { %s3051_s4 = scalar_lea.hbm %s3680_s10, 4096 }
  0xb3   :  { %p3052_p10 = scmp.ne.s32.totalorder %s3680_s10, %s3051_s4  ;;  %p3055_p11 = scmp.lt.u32.totalorder %s3051_s4, %s3680_s10 }
  0xb5   :  { %p3057_p12 = pnand %p3055_p11, %p3052_p10 }
  0xb7   :  { %3060 = shalt.err (!%p3057_p12)
}
  0xb8   :  { %s3061_s8 = scalar_lea.vmem %s139_s0, 4096  ;;  %p3066_p0 = scmp.lt.s32.totalorder %s139_s0, %s139_s0 }
  0xb9   :  { %p3062_p13 = scmp.ne.s32.totalorder %s139_s0, %s3061_s8  ;;  %p3067_p1 = scmp.lt.s32.totalorder %s3061_s8, %s3061_s8 }
  0xbb   :  { %p3068_p2 = por %p3067_p1, %p3066_p0 }
  0xbd   :  { %p3069_p3 = pnand %p3068_p2, %p3062_p13 }
  0xbf   :  { %3072 = shalt.err (!%p3069_p3)
}
  0xc0   :  { %144 = dma.hbm_to_vmem [thread:$0]  %s3680_s10, 4096, %s139_s0, [#allocation18], %s3145_s2, %s3145_s2, %s3146_s3  }
  0xc1   :  { %s3073_s23 = scalar_lea.hbm %s3681_s11, 16 }
  0xc2   :  { %p3074_p4 = scmp.ne.s32.totalorder %s3681_s11, %s3073_s23  ;;  %p3077_p5 = scmp.lt.u32.totalorder %s3073_s23, %s3681_s11 }
  0xc4   :  { %p3079_p6 = pnand %p3077_p5, %p3074_p4 }
  0xc6   :  { %3082 = shalt.err (!%p3079_p6)
}
  0xc7   :  { %s3083_s1 = scalar_lea.vmem %s152_s29, 16  ;;  %s3087_s7 = scalar_lea.vmem %s152_s29, 32 }
  0xc8   :  { %p3084_p7 = scmp.ne.s32.totalorder %s152_s29, %s3083_s1  ;;  %p3088_p8 = scmp.lt.s32.totalorder %s152_s29, %s152_s29 }
  0xc9   :  { %p3089_p9 = scmp.lt.s32.totalorder %s3087_s7, %s3083_s1 }
  0xcb   :  { %p3090_p10 = por %p3089_p9, %p3088_p8 }
  0xcd   :  { %p3091_p11 = pnand %p3090_p10, %p3084_p7 }
  0xcf   :  { %3094 = shalt.err (!%p3091_p11)
}
  0xd0   :  { %154 = dma.hbm_to_vmem [thread:$0]  %s3681_s11, 16, %s152_s29, [#allocation21]  }
  0xd1   :  { %3117 = dma.done.wait [#allocation3], 256  }
  0xd2   :  { %3118 = vsyncadd [#allocation3], 4294967040 }
  0xd3   :  { %3119 = dma.done.wait [#allocation6], 32  }
  0xd4   :  { %3120 = vsyncadd [#allocation6], 4294967264 }
  0xd5   :  { %3121 = dma.done.wait [#allocation9], 4096  }
  0xd6   :  { %3122 = vsyncadd [#allocation9], 4294963200 }
  0xd7   :  { %3123 = dma.done.wait [#allocation12], 32  }
  0xd8   :  { %3124 = vsyncadd [#allocation12], 4294967264 }
  0xd9   :  { %3125 = dma.done.wait [#allocation15], 4112  }
  0xda   :  { %3126 = vsyncadd [#allocation15], 4294963184 }
  0xdb   :  { %3127 = dma.done.wait [#allocation18], 4160  }
  0xdc   :  { %3128 = vsyncadd [#allocation18], 4294963136 }
  0xdd   :  { %3129 = dma.done.wait [#allocation21], 16  }
  0xde   :  { %3130 = vsyncadd [#allocation21], 4294967280  ;;  %v192_v0 = vld [vmem:[#allocation2] sm:$0xff]  ;;  %v193_v1 = vld [vmem:[#allocation2 + $0x8] sm:$0xff]  ;;  %v3153_v4 = vmov 0.0   ;;  %v3154_v30 = vmov 0  }
  0xdf   :  { %194 = vadd.xlane.f32.xlu0 %v192_v0  ;;  %v2653_v2 = vld [vmem:[#allocation8 + $0x4] ss:$12 sps:$4 sm:$0xff]   ;;  %v2655_v3 = vld [vmem:[#allocation8] ss:$12 sps:$4 sm:$0xff]   ;;  %2491 = vmatprep.subr.bf16.mxu1 %v3153_v4  ;;  %v2656_v5 = vld [vmem:[#allocation8 + $0x8] ss:$12 sps:$4 sm:$0xff]  }
  0xe0   :  { %v2657_v6 = vld [vmem:[#allocation8 + $0x1c] ss:$12 sps:$4 sm:$0xff]   ;;  %396 = vmatprep.subr.bf16.mxu0 %v2653_v2  ;;  %2492 = vmatpush3.bf16.msra.mxu1 %v2656_v5  ;;  %v2659_v15 = vld [vmem:[#allocation8 + $0x18] ss:$12 sps:$4 sm:$0xff]   ;;  %v2660_v16 = vld [vmem:[#allocation8 + $0x20] ss:$12 sps:$4 sm:$0xff]  }
  0xe1   :  { %397 = vmatpush1.bf16.msra.mxu0 %v2655_v3  ;;  %2493 = vmatprep.subr.bf16.mxu1 %v3153_v4  ;;  %v2661_v17 = vld [vmem:[#allocation8 + $0x34] ss:$12 sps:$4 sm:$0xff]   ;;  %v2663_v18 = vld [vmem:[#allocation8 + $0x30] ss:$12 sps:$4 sm:$0xff]   ;;  %v2664_v19 = vld [vmem:[#allocation8 + $0x38] ss:$12 sps:$4 sm:$0xff]  }
  0xe2   :  { %398 = vmatprep.subr.bf16.mxu0 %v2657_v6  ;;  %v2665_v20 = vld [vmem:[#allocation8 + $0x4c] ss:$12 sps:$4 sm:$0xff]   ;;  %v2667_v21 = vld [vmem:[#allocation8 + $0x48] ss:$12 sps:$4 sm:$0xff]   ;;  %v2668_v22 = vld [vmem:[#allocation8 + $0x50] ss:$12 sps:$4 sm:$0xff]   ;;  %428 = vmatprep.mubr.bf16.mxu0 %v3154_v30 }
  0xe3   :  { %196 = vadd.xlane.f32.xlu0 %v193_v1  ;;  %v2669_v23 = vld [vmem:[#allocation8 + $0x64] ss:$12 sps:$4 sm:$0xff]   ;;  %v2671_v24 = vld [vmem:[#allocation8 + $0x60] ss:$12 sps:$4 sm:$0xff]   ;;  %v2672_v25 = vld [vmem:[#allocation8 + $0x68] ss:$12 sps:$4 sm:$0xff]  }
  0xe4   :  { %2494 = vmatpush3.bf16.msra.mxu1 %v2660_v16  ;;  %v2673_v26 = vld [vmem:[#allocation8 + $0x7c] ss:$12 sps:$4 sm:$0xff]   ;;  %v2675_v27 = vld [vmem:[#allocation8 + $0x78] ss:$12 sps:$4 sm:$0xff]   ;;  %v2676_v28 = vld [vmem:[#allocation8 + $0x80] ss:$12 sps:$4 sm:$0xff]  }
  0xe5   :  { %399 = vmatpush1.bf16.msra.mxu0 %v2659_v15  ;;  %2495 = vmatprep.subr.bf16.mxu1 %v3153_v4  ;;  %v2677_v29 = vld [vmem:[#allocation8 + $0x94] ss:$12 sps:$4 sm:$0xff]   ;;  %vm3155_vm0 = vmmov 0   ;;  %v2679_v31 = vld [vmem:[#allocation8 + $0x90] ss:$12 sps:$4 sm:$0xff]   ;;  %vm498_vm1 = vcmask 261120  }
  0xe6   :  { %400 = vmatprep.subr.bf16.mxu0 %v2661_v17  ;;  %2507 = vmatprep.mubr.msk.bf16.mxu1 %vm3155_vm0, %v3153_v4  ;;  %v2680_v32 = vld [vmem:[#allocation8 + $0x98] ss:$12 sps:$4 sm:$0xff]   ;;  %v2683_v34 = vld [vmem:[#allocation8 + $0xa8] ss:$12 sps:$4 sm:$0xff]   ;;  %v2684_v35 = vld [vmem:[#allocation8 + $0xb0] ss:$12 sps:$4 sm:$0xff]  }
  0xe7   :  { %v2681_v33 = vld [vmem:[#allocation8 + $0xac] ss:$12 sps:$4 sm:$0xff]   ;;  %v2267_v44 = vld [vmem:[#allocation5] ss:$0 sm:$0xff]  ;;  %v2268_v48 = vld [vmem:[#allocation7] ss:$0 sm:$0xff] }
  0xe8   :  { %2496 = vmatpush3.bf16.msra.mxu1 %v2664_v19  ;;  %s3156_s11 = smov 96   ;;  %vm615_vm2 = vcmask 1043456   ;;  %vm591_vm3 = vcmask 64512   ;;  %s3157_s22 = smov 32   ;;  %vm1385_vm4 = vcmask 523264   ;;  %vm1388_vm5 = vcmask 785408  }
  0xe9   :  { %401 = vmatpush1.bf16.msra.mxu0 %v2663_v18  ;;  %2497 = vmatprep.subr.bf16.mxu1 %v3153_v4 }
  0xea   :  { %402 = vmatprep.subr.bf16.mxu0 %v2665_v20 }
  0xec   :  { %2498 = vmatpush3.bf16.msra.mxu1 %v2668_v22 }
  0xed   :  { %403 = vmatpush1.bf16.msra.mxu0 %v2667_v21  ;;  %2499 = vmatprep.subr.bf16.mxu1 %v3153_v4 }
  0xee   :  { %404 = vmatprep.subr.bf16.mxu0 %v2669_v23 }
  0xf0   :  { %2500 = vmatpush3.bf16.msra.mxu1 %v2672_v25 }
  0xf1   :  { %405 = vmatpush1.bf16.msra.mxu0 %v2671_v24  ;;  %2501 = vmatprep.subr.bf16.mxu1 %v3153_v4 }
  0xf2   :  { %406 = vmatprep.subr.bf16.mxu0 %v2673_v26 }
  0xf4   :  { %2502 = vmatpush3.bf16.msra.mxu1 %v2676_v28 }
  0xf5   :  { %407 = vmatpush1.bf16.msra.mxu0 %v2675_v27  ;;  %2503 = vmatprep.subr.bf16.mxu1 %v3153_v4 }
  0xf6   :  { %408 = vmatprep.subr.bf16.mxu0 %v2677_v29 }
  0xf8   :  { %2504 = vmatpush3.bf16.msra.mxu1 %v2680_v32 }
  0xf9   :  { %409 = vmatpush1.bf16.msra.mxu0 %v2679_v31  ;;  %2505 = vmatprep.subr.bf16.mxu1 %v3153_v4 }
  0xfa   :  { %410 = vmatprep.subr.bf16.mxu0 %v2681_v33 }
  0xfc   :  { %2506 = vmatpush3.bf16.msra.mxu1 %v2684_v35 }
  0xfd   :  { %411 = vmatpush1.bf16.msra.mxu0 %v2683_v34  ;;  %2511 = vmatprep.subr.bf16.mxu1 %v3153_v4 }
  0xfe   :  { %2535 = vmatprep.subr.bf16.mxu0 %v3153_v4 }
 0x16c   :  { %v195_v7 = vpop.xlane.xlu0 %194 }
 0x16d   :  { %v199_v8 = vmul.f32 0.0078125, %v195_v7 }
 0x16f   :  { %v3407_v9 = vsub.f32 %v192_v0, %v199_v8 }
 0x170   :  { %v197_v10 = vpop.xlane.xlu0 %196 }
 0x171   :  { %v200_v11 = vmul.f32 0.0078125, %v197_v10  ;;  %v203_v12 = vmul.f32 %v3407_v9, %v3407_v9 }
 0x173   :  { %v3411_v13 = vsub.f32 %v193_v1, %v200_v11  ;;  %205 = vadd.xlane.f32.xlu1 %v203_v12 }
 0x175   :  { %v204_v14 = vmul.f32 %v3411_v13, %v3411_v13 }
 0x177   :  { %207 = vadd.xlane.f32.xlu1 %v204_v14 }
 0x200   :  { %v206_v36 = vpop.xlane.xlu1 %205 }
 0x201   :  { %v209_v37 = vmul.f32 0.0078125, %v206_v36 }
 0x203   :  { %v211_v38 = vadd.f32 1e-05, %v209_v37 }
 0x204   :  { %v208_v39 = vpop.xlane.xlu1 %207 }
 0x205   :  { %2773 = vrsqrt.f32 %v211_v38  ;;  %v210_v40 = vmul.f32 0.0078125, %v208_v39 }
 0x207   :  { %v212_v41 = vadd.f32 1e-05, %v210_v40 }
 0x209   :  { %2775 = vrsqrt.f32 %v212_v41 }
 0x20f   :  { %v2774_v42 = vpop.eup %2773 }
 0x210   :  { %v215_v43 = vmul.f32 %v2774_v42, %v3407_v9 }
 0x212   :  { %v224_v47 = vmul.f32 %v2267_v44, %v215_v43 }
 0x213   :  { %v2776_v45 = vpop.eup %2775 }
 0x214   :  { %v216_v46 = vmul.f32 %v2776_v45, %v3411_v13  ;;  %v3428_v50 = vadd.f32 %v2268_v48, %v224_v47 }
 0x216   :  { %v225_v49 = vmul.f32 %v2267_v44, %v216_v46 }
 0x218   :  { %v3430_v51 = vadd.f32 %v2268_v48, %v225_v49 }
 0x21a   :  { %v235_v52 = vpack.c.bf16 %v3430_v51, %v3428_v50 }
 0x21c   :  { %429 = vmatmul.mubr.bf16.vlgmr.msra.gmra.mrb[0].mxu0 %v235_v52  ;;  %2508 = vmatmul.mubr.bf16.vlgmr.msra.gmra.mrb[0].mxu1 %v235_v52 }
 0x21d   :  { %2513 = vmatprep.mubr.msk.bf16.mxu1 %vm3155_vm0, %v3153_v4  ;;  %2537 = vmatprep.mubr.msk.bf16.mxu0 %vm3155_vm0, %v3153_v4 }
 0x2ef   :  { %v430_v53 = vpop.f32.mrb[0].mxu0  ;;  %v473_v54 = vpop.f32.mrb[0].mxu1 }
 0x2f0   :  { %v432_v55 = vpop.f32.mrb[1].mxu0  ;;  %v2509_v56 = vpop.f32.mrb[1].mxu1  ;;  %v3447_v0 = vpack.c.bf16 %v430_v53, %v430_v53  ;;  %v3456_v2 = vpack.c.bf16 %v473_v54, %v473_v54 }
 0x2f1   :  { %v3438_v57 = vpack.c.bf16 %v432_v55, %v432_v55  ;;  %v434_v58 = vpop.f32.mrb[2].mxu0  ;;  %v476_v59 = vpop.f32.mrb[2].mxu1 }
 0x2f2   :  { %v436_v60 = vpop.f32.mrb[3].mxu0  ;;  %v2510_v61 = vpop.f32.mrb[3].mxu1  ;;  %v3458_v3 = vpack.c.bf16 %v434_v58, %v434_v58  ;;  %v617_v5 = vsel %vm615_vm2, %v3456_v2, 0  ;;  %v3477_v16 = vpack.c.bf16 %v476_v59, %v476_v59 }
 0x2f3   :  { %v3440_v62 = vpack.c.bf16 %v436_v60, %v436_v60  ;;  %v503_v63 = vsel %vm498_vm1, %v3438_v57, 0 }
 0x2f4   :  { %2512 = vmatpush3.bf16.xpose.msra.mxu1 %v503_v63  ;;  %v663_v32 = vsel %vm615_vm2, %v3477_v16, 0 }
 0x2f5   :  { %762 = vrot.lane.b32.xlu1 %v3440_v62, %s3156_s11  ;;  %2517 = vmatprep.subr.bf16.mxu1 %v3153_v4  ;;  %v549_v1 = vsel %vm498_vm1, %v3440_v62, 0 }
 0x2fb   :  { %2514 = vmatmul.mubr.msk.bf16.vlgmr.msra.gmra.mrb[4].mxu1 %vm498_vm1, %v3447_v0 }
 0x2fc   :  { %2518 = vmatpush3.bf16.xpose.msra.mxu1 %v549_v1  ;;  %2519 = vmatprep.mubr.msk.bf16.mxu1 %vm3155_vm0, %v3153_v4 }
 0x2fd   :  { %2523 = vmatprep.subr.bf16.mxu1 %v3153_v4 }
 0x303   :  { %2520 = vmatmul.mubr.msk.bf16.vlgmr.msra.gmra.mrb[8].mxu1 %vm498_vm1, %v3458_v3 }
 0x304   :  { %2524 = vmatpush3.bf16.msra.mxu1 %v617_v5  ;;  %2525 = vmatprep.mubr.msk.bf16.mxu1 %vm3155_vm0, %v3153_v4 }
 0x305   :  { %2529 = vmatprep.subr.bf16.mxu1 %v3153_v4 }
 0x367   :  { %v763_v20 = vpop.permute.xlu1 %762 }
 0x368   :  { %v768_v36 = vsel %vm498_vm1, %v763_v20, 0 }
 0x3ce   :  { %v539_v6 = vpop.f32.mrb[4].mxu1 }
 0x3cf   :  { %v2515_v7 = vpop.f32.mrb[5].mxu1  ;;  %v592_v8 = vsel %vm591_vm3, %v539_v6, -inf }
 0x3d0   :  { %593 = vmax.xlane.f32.xlu0 %v592_v8  ;;  %v542_v9 = vpop.f32.mrb[6].mxu1 }
 0x3d1   :  { %v2516_v10 = vpop.f32.mrb[7].mxu1 }
 0x3d6   :  { %v585_v11 = vpop.f32.mrb[8].mxu1 }
 0x3d7   :  { %v2521_v12 = vpop.f32.mrb[9].mxu1  ;;  %v595_v13 = vsel %vm591_vm3, %v585_v11, -inf }
 0x3d8   :  { %596 = vmax.xlane.f32.xlu1 %v595_v13  ;;  %v588_v14 = vpop.f32.mrb[10].mxu1 }
 0x3d9   :  { %v2522_v15 = vpop.f32.mrb[11].mxu1 }
 0x3e6   :  { %712 = vrot.lane.b32.xlu0 %v3438_v57, %s3156_s11 }
 0x3e9   :  { %710 = vrot.lane.b32.xlu1 %v3447_v0, %s3156_s11 }
 0x3ea   :  { %830 = vrot.lane.b32.xlu0 %v3456_v2, %s3156_s11 }
 0x3ed   :  { %760 = vrot.lane.b32.xlu1 %v3458_v3, %s3156_s11 }
 0x3f1   :  { %878 = vrot.lane.b32.xlu1 %v3477_v16, %s3156_s11 }
 0x45d   :  { %v594_v17 = vpop.xlane.xlu0 %593 }
 0x45e   :  { %v598_v18 = vsub.f32 %v539_v6, %v594_v17 }
 0x460   :  { %v600_v19 = vmul.f32 1.442695, %v598_v18 }
 0x461   :  { %v713_v21 = vpop.permute.xlu0 %712 }
 0x462   :  { %2777 = vpow2.f32 %v600_v19  ;;  %v718_v22 = vsel %vm498_vm1, %v713_v21, 0 }
 0x463   :  { %2536 = vmatpush3.bf16.xpose.msra.mxu0 %v718_v22 }
 0x464   :  { %2547 = vmatprep.subr.bf16.mxu0 %v3153_v4 }
 0x465   :  { %v597_v23 = vpop.xlane.xlu1 %596  ;;  %v831_v25 = vpop.permute.xlu0 %830 }
 0x466   :  { %v599_v24 = vsub.f32 %v585_v11, %v597_v23  ;;  %v836_v28 = vsel %vm615_vm2, %v831_v25, 0 }
 0x468   :  { %v602_v26 = vmul.f32 1.442695, %v599_v24 }
 0x469   :  { %v711_v27 = vpop.permute.xlu1 %710 }
 0x46a   :  { %2779 = vpow2.f32 %v602_v26  ;;  %2538 = vmatmul.mubr.msk.bf16.vlgmr.msra.gmra.mrb[4].mxu0 %vm498_vm1, %v711_v27 }
 0x46b   :  { %2548 = vmatpush3.bf16.msra.mxu0 %v836_v28  ;;  %2549 = vmatprep.mubr.msk.bf16.mxu0 %vm3155_vm0, %v3153_v4 }
 0x46c   :  { %v3487_v29 = vpop.eup %2777  ;;  %2559 = vmatprep.subr.bf16.mxu0 %v3153_v4 }
 0x46d   :  { %v610_v31 = vpack.c.bf16 %v3487_v29, %v3487_v29  ;;  %v761_v35 = vpop.permute.xlu1 %760 }
 0x46f   :  { %2526 = vmatmul.mubr.msk.bf16.vlgmr.msra.gmra.mrb[12].mxu1 %vm591_vm3, %v610_v31 }
 0x470   :  { %2530 = vmatpush3.bf16.msra.mxu1 %v663_v32  ;;  %2531 = vmatprep.mubr.msk.bf16.mxu1 %vm3155_vm0, %v3153_v4 }
 0x471   :  { %2541 = vmatprep.subr.bf16.mxu1 %v3153_v4  ;;  %v879_v37 = vpop.permute.xlu1 %878 }
 0x472   :  { %v884_v38 = vsel %vm615_vm2, %v879_v37, 0 }
 0x474   :  { %v3498_v33 = vpop.eup %2779 }
 0x475   :  { %v611_v34 = vpack.c.bf16 %v3498_v33, %v3498_v33 }
 0x477   :  { %2532 = vmatmul.mubr.msk.bf16.vlgmr.msra.gmra.mrb[16].mxu1 %vm591_vm3, %v611_v34 }
 0x478   :  { %2543 = vmatprep.mubr.msk.bf16.mxu1 %vm3155_vm0, %v3153_v4 }
 0x479   :  { %2542 = vmatpush3.bf16.xpose.msra.mxu1 %v768_v36 }
 0x47a   :  { %2553 = vmatprep.subr.bf16.mxu1 %v3153_v4 }
 0x480   :  { %2544 = vmatmul.mubr.msk.bf16.vlgmr.msra.gmra.mrb[20].mxu1 %vm498_vm1, %v761_v35 }
 0x481   :  { %2554 = vmatpush3.bf16.msra.mxu1 %v884_v38  ;;  %2555 = vmatprep.mubr.msk.bf16.mxu1 %vm3155_vm0, %v3153_v4 }
 0x482   :  { %2565 = vmatprep.subr.bf16.mxu1 %v3153_v4 }
 0x53d   :  { %v754_v39 = vpop.f32.mrb[4].mxu0 }
 0x53e   :  { %v2539_v40 = vpop.f32.mrb[5].mxu0  ;;  %v810_v41 = vsel %vm591_vm3, %v754_v39, -inf }
 0x53f   :  { %811 = vmax.xlane.f32.xlu0 %v810_v41  ;;  %v757_v42 = vpop.f32.mrb[6].mxu0 }
 0x540   :  { %v2540_v43 = vpop.f32.mrb[7].mxu0 }
 0x542   :  { %v3513_v44 = vpop.f32.mrb[12].mxu1 }
 0x543   :  { %v2527_v45 = vpop.f32.mrb[13].mxu1 }
 0x544   :  { %v656_v46 = vpop.f32.mrb[14].mxu1 }
 0x545   :  { %v2528_v47 = vpop.f32.mrb[15].mxu1 }
 0x54a   :  { %v3515_v48 = vpop.f32.mrb[16].mxu1 }
 0x54b   :  { %v2533_v49 = vpop.f32.mrb[17].mxu1 }
 0x54c   :  { %v702_v52 = vpop.f32.mrb[18].mxu1 }
 0x54d   :  { %v2534_v53 = vpop.f32.mrb[19].mxu1 }
 0x553   :  { %v804_v54 = vpop.f32.mrb[20].mxu1 }
 0x554   :  { %v2545_v55 = vpop.f32.mrb[21].mxu1  ;;  %v813_v56 = vsel %vm591_vm3, %v804_v54, -inf }
 0x555   :  { %814 = vmax.xlane.f32.xlu1 %v813_v56  ;;  %v807_v58 = vpop.f32.mrb[22].mxu1  ;;  %933 = vrot.lane.b32.xlu0 %v3438_v57, %s3145_s2 }
 0x556   :  { %v2546_v59 = vpop.f32.mrb[23].mxu1 }
 0x559   :  { %931 = vrot.lane.b32.xlu0 %v3447_v0, %s3145_s2 }
 0x55d   :  { %1051 = vrot.lane.b32.xlu0 %v3456_v2, %s3145_s2 }
 0x566   :  { %983 = vrot.lane.b32.xlu1 %v3440_v62, %s3145_s2 }
 0x56a   :  { %981 = vrot.lane.b32.xlu1 %v3458_v3, %s3145_s2 }
 0x56e   :  { %1099 = vrot.lane.b32.xlu1 %v3477_v16, %s3145_s2 }
 0x5cc   :  { %v812_v60 = vpop.xlane.xlu0 %811 }
 0x5cd   :  { %v816_v61 = vsub.f32 %v754_v39, %v812_v60 }
 0x5cf   :  { %v818_v63 = vmul.f32 1.442695, %v816_v61 }
 0x5d0   :  { %v934_v1 = vpop.permute.xlu0 %933 }
 0x5d1   :  { %2781 = vpow2.f32 %v818_v63  ;;  %v939_v8 = vsel %vm498_vm1, %v934_v1, 0 }
 0x5d4   :  { %v932_v7 = vpop.permute.xlu0 %931 }
 0x5d8   :  { %v1052_v10 = vpop.permute.xlu0 %1051 }
 0x5d9   :  { %v1057_v13 = vsel %vm615_vm2, %v1052_v10, 0 }
 0x5db   :  { %v3530_v5 = vpop.eup %2781 }
 0x5dc   :  { %v828_v6 = vpack.c.bf16 %v3530_v5, %v3530_v5 }
 0x5de   :  { %2550 = vmatmul.mubr.msk.bf16.vlgmr.msra.gmra.mrb[8].mxu0 %vm591_vm3, %v828_v6 }
 0x5df   :  { %2560 = vmatpush3.bf16.xpose.msra.mxu0 %v939_v8  ;;  %2561 = vmatprep.mubr.msk.bf16.mxu0 %vm3155_vm0, %v3153_v4 }
 0x5e0   :  { %2571 = vmatprep.subr.bf16.mxu0 %v3153_v4 }
 0x5e2   :  { %v815_v9 = vpop.xlane.xlu1 %814 }
 0x5e3   :  { %v817_v11 = vsub.f32 %v804_v54, %v815_v9 }
 0x5e5   :  { %v820_v12 = vmul.f32 1.442695, %v817_v11 }
 0x5e6   :  { %2562 = vmatmul.mubr.msk.bf16.vlgmr.msra.gmra.mrb[12].mxu0 %vm498_vm1, %v932_v7  ;;  %v984_v14 = vpop.permute.xlu1 %983 }
 0x5e7   :  { %2783 = vpow2.f32 %v820_v12  ;;  %2572 = vmatpush3.bf16.msra.mxu0 %v1057_v13  ;;  %2573 = vmatprep.mubr.msk.bf16.mxu0 %vm3155_vm0, %v3153_v4  ;;  %v989_v19 = vsel %vm498_vm1, %v984_v14, 0 }
 0x5e8   :  { %2583 = vmatprep.subr.bf16.mxu0 %v3153_v4 }
 0x5ea   :  { %v982_v18 = vpop.permute.xlu1 %981 }
 0x5ee   :  { %v1100_v20 = vpop.permute.xlu1 %1099 }
 0x5ef   :  { %v1105_v21 = vsel %vm615_vm2, %v1100_v20, 0 }
 0x5f1   :  { %v3544_v15 = vpop.eup %2783 }
 0x5f2   :  { %v829_v17 = vpack.c.bf16 %v3544_v15, %v3544_v15 }
 0x5f4   :  { %2556 = vmatmul.mubr.msk.bf16.vlgmr.msra.gmra.mrb[24].mxu1 %vm591_vm3, %v829_v17 }
 0x5f5   :  { %2566 = vmatpush3.bf16.xpose.msra.mxu1 %v989_v19  ;;  %2567 = vmatprep.mubr.msk.bf16.mxu1 %vm3155_vm0, %v3153_v4 }
 0x5f6   :  { %2577 = vmatprep.subr.bf16.mxu1 %v3153_v4 }
 0x5fc   :  { %2568 = vmatmul.mubr.msk.bf16.vlgmr.msra.gmra.mrb[28].mxu1 %vm498_vm1, %v982_v18 }
 0x5fd   :  { %2578 = vmatpush3.bf16.msra.mxu1 %v1105_v21  ;;  %2579 = vmatprep.mubr.msk.bf16.mxu1 %vm3155_vm0, %v3153_v4 }
 0x5fe   :  { %2589 = vmatprep.subr.bf16.mxu1 %v3153_v4 }
 0x6b1   :  { %v3558_v22 = vpop.f32.mrb[8].mxu0 }
 0x6b2   :  { %v2551_v23 = vpop.f32.mrb[9].mxu0 }
 0x6b3   :  { %v875_v24 = vpop.f32.mrb[10].mxu0  ;;  %v822_v23 = vsel %vm591_vm3, %v3530_v5, 0.0 }
 0x6b4   :  { %v2552_v25 = vpop.f32.mrb[11].mxu0 }
 0x6b9   :  { %v975_v26 = vpop.f32.mrb[12].mxu0 }
 0x6ba   :  { %v2563_v27 = vpop.f32.mrb[13].mxu0  ;;  %v1031_v28 = vsel %vm591_vm3, %v975_v26, -inf }
 0x6bb   :  { %1032 = vmax.xlane.f32.xlu0 %v1031_v28  ;;  %v978_v31 = vpop.f32.mrb[14].mxu0 }
 0x6bc   :  { %v2564_v32 = vpop.f32.mrb[15].mxu0 }
 0x6c7   :  { %v3561_v34 = vpop.f32.mrb[24].mxu1 }
 0x6c8   :  { %v2557_v35 = vpop.f32.mrb[25].mxu1 }
 0x6c9   :  { %v923_v36 = vpop.f32.mrb[26].mxu1 }
 0x6ca   :  { %v2558_v37 = vpop.f32.mrb[27].mxu1 }
 0x6cf   :  { %v1025_v38 = vpop.f32.mrb[28].mxu1 }
 0x6d0   :  { %v2569_v39 = vpop.f32.mrb[29].mxu1  ;;  %v1034_v40 = vsel %vm591_vm3, %v1025_v38, -inf }
 0x6d1   :  { %1035 = vmax.xlane.f32.xlu1 %v1034_v40  ;;  %v1028_v41 = vpop.f32.mrb[30].mxu1  ;;  %1154 = vrot.lane.b32.xlu0 %v3438_v57, %s3157_s22 }
 0x6d2   :  { %v2570_v42 = vpop.f32.mrb[31].mxu1 }
 0x6d5   :  { %1152 = vrot.lane.b32.xlu0 %v3447_v0, %s3157_s22 }
 0x6e2   :  { %1204 = vrot.lane.b32.xlu1 %v3440_v62, %s3157_s22 }
 0x6e6   :  { %1202 = vrot.lane.b32.xlu1 %v3458_v3, %s3157_s22 }
 0x748   :  { %v1033_v43 = vpop.xlane.xlu0 %1032 }
 0x749   :  { %v1037_v45 = vsub.f32 %v975_v26, %v1033_v43  ;;  %v825_v26 = vsel %vm591_vm3, %v3544_v15, 0.0  ;;  %v604_v15 = vsel %vm591_vm3, %v3487_v29, 0.0  ;;  %v607_v29 = vsel %vm591_vm3, %v3498_v33, 0.0 }
 0x74b   :  { %v1039_v46 = vmul.f32 1.442695, %v1037_v45 }
 0x74c   :  { %v1155_v49 = vpop.permute.xlu0 %1154 }
 0x74d   :  { %2785 = vpow2.f32 %v1039_v46  ;;  %v1160_v53 = vsel %vm498_vm1, %v1155_v49, 0 }
 0x750   :  { %v1153_v0 = vpop.permute.xlu0 %1152 }
 0x757   :  { %v2786_v47 = vpop.eup %2785 }
 0x758   :  { %v1049_v52 = vpack.c.bf16 %v2786_v47, %v2786_v47  ;;  %v1043_v24 = vsel %vm591_vm3, %v2786_v47, 0.0 }
 0x75a   :  { %2574 = vmatmul.mubr.msk.bf16.vlgmr.msra.gmra.mrb[16].mxu0 %vm591_vm3, %v1049_v52 }
 0x75b   :  { %2584 = vmatpush3.bf16.xpose.msra.mxu0 %v1160_v53  ;;  %2585 = vmatprep.mubr.msk.bf16.mxu0 %vm3155_vm0, %v3153_v4 }
 0x75c   :  { %2595 = vmatprep.subr.bf16.mxu0 %v3153_v4 }
 0x75e   :  { %v1036_v57 = vpop.xlane.xlu1 %1035 }
 0x75f   :  { %v1038_v62 = vsub.f32 %v1025_v38, %v1036_v57 }
 0x761   :  { %v1041_v3 = vmul.f32 1.442695, %v1038_v62 }
 0x762   :  { %2586 = vmatmul.mubr.msk.bf16.vlgmr.msra.gmra.mrb[20].mxu0 %vm498_vm1, %v1153_v0  ;;  %v1205_v55 = vpop.permute.xlu1 %1204 }
 0x763   :  { %2787 = vpow2.f32 %v1041_v3  ;;  %2597 = vmatprep.mubr.msk.bf16.mxu0 %vm3155_vm0, %v3153_v4  ;;  %v1210_v58 = vsel %vm498_vm1, %v1205_v55, 0 }
 0x766   :  { %v1203_v59 = vpop.permute.xlu1 %1202 }
 0x76d   :  { %v2788_v54 = vpop.eup %2787 }
 0x76e   :  { %v1050_v56 = vpack.c.bf16 %v2788_v54, %v2788_v54  ;;  %v1046_v25 = vsel %vm591_vm3, %v2788_v54, 0.0 }
 0x770   :  { %2580 = vmatmul.mubr.msk.bf16.vlgmr.msra.gmra.mrb[32].mxu1 %vm591_vm3, %v1050_v56 }
 0x771   :  { %2590 = vmatpush3.bf16.xpose.msra.mxu1 %v1210_v58  ;;  %2591 = vmatprep.mubr.msk.bf16.mxu1 %vm3155_vm0, %v3153_v4  ;;  %v2685_v58 = vld [vmem:[#allocation10] sm:$0xff]  }
 0x772   :  { %2601 = vmatprep.subr.bf16.mxu1 %v3153_v4 }
 0x778   :  { %2592 = vmatmul.mubr.msk.bf16.vlgmr.msra.gmra.mrb[36].mxu1 %vm498_vm1, %v1203_v59  ;;  %v2686_v59 = vld [vmem:[#allocation10 + $0x8] sm:$0xff]  }
 0x779   :  { %2603 = vmatprep.mubr.msk.bf16.mxu1 %vm3155_vm0, %v3153_v4 }
 0x82d   :  { %v3588_v60 = vpop.f32.mrb[16].mxu0 }
 0x82e   :  { %v2575_v61 = vpop.f32.mrb[17].mxu0 }
 0x82f   :  { %v1096_v63 = vpop.f32.mrb[18].mxu0  ;;  %v2688_v61 = vld [vmem:[#allocation10 + $0x18] sm:$0xff]  }
 0x830   :  { %v2576_v1 = vpop.f32.mrb[19].mxu0  ;;  %v2691_v63 = vld [vmem:[#allocation10 + $0x30] sm:$0xff]  }
 0x831   :  { %v2692_v1 = vld [vmem:[#allocation10 + $0x38] sm:$0xff]  }
 0x835   :  { %v1196_v6 = vpop.f32.mrb[20].mxu0 }
 0x836   :  { %v2587_v7 = vpop.f32.mrb[21].mxu0  ;;  %v1252_v8 = vsel %vm591_vm3, %v1196_v6, -inf }
 0x837   :  { %1253 = vmax.xlane.f32.xlu0 %v1252_v8  ;;  %v1199_v9 = vpop.f32.mrb[22].mxu0 }
 0x838   :  { %v2588_v10 = vpop.f32.mrb[23].mxu0 }
 0x843   :  { %v1141_v11 = vpop.f32.mrb[32].mxu1 }
 0x844   :  { %v2581_v12 = vpop.f32.mrb[33].mxu1 }
 0x845   :  { %v1144_v13 = vpop.f32.mrb[34].mxu1 }
 0x846   :  { %v2582_v14 = vpop.f32.mrb[35].mxu1 }
 0x84b   :  { %v1246_v17 = vpop.f32.mrb[36].mxu1 }
 0x84c   :  { %v2593_v18 = vpop.f32.mrb[37].mxu1  ;;  %v1255_v19 = vsel %vm591_vm3, %v1246_v17, -inf }
 0x84d   :  { %1256 = vmax.xlane.f32.xlu1 %v1255_v19  ;;  %v1249_v20 = vpop.f32.mrb[38].mxu1  ;;  %1272 = vrot.lane.b32.xlu0 %v3456_v2, %s3157_s22 }
 0x84e   :  { %v2594_v21 = vpop.f32.mrb[39].mxu1 }
 0x85e   :  { %1320 = vrot.lane.b32.xlu1 %v3477_v16, %s3157_s22 }
 0x86c   :  { %823 = vadd.xlane.f32.xlu0 %v822_v23 }
 0x870   :  { %1044 = vadd.xlane.f32.xlu0 %v1043_v24 }
 0x874   :  { %1047 = vadd.xlane.f32.xlu0 %v1046_v25 }
 0x882   :  { %826 = vadd.xlane.f32.xlu1 %v825_v26 }
 0x8c4   :  { %v1254_v27 = vpop.xlane.xlu0 %1253 }
 0x8c5   :  { %v1258_v2 = vsub.f32 %v1196_v6, %v1254_v27 }
 0x8c7   :  { %v1260_v28 = vmul.f32 1.442695, %v1258_v2 }
 0x8c8   :  { %v1273_v31 = vpop.permute.xlu0 %1272 }
 0x8c9   :  { %2789 = vpow2.f32 %v1260_v28  ;;  %v1278_v16 = vsel %vm615_vm2, %v1273_v31, 0 }
 0x8ca   :  { %2596 = vmatpush3.bf16.msra.mxu0 %v1278_v16 }
 0x8cb   :  { %2607 = vmatprep.subr.bf16.mxu0 %v3153_v4 }
 0x8d3   :  { %v2790_v5 = vpop.eup %2789 }
 0x8d4   :  { %v1264_v32 = vsel %vm591_vm3, %v2790_v5, 0.0  ;;  %v1270_v35 = vpack.c.bf16 %v2790_v5, %v2790_v5 }
 0x8d5   :  { %1265 = vadd.xlane.f32.xlu0 %v1264_v32 }
 0x8d6   :  { %2598 = vmatmul.mubr.msk.bf16.vlgmr.msra.gmra.mrb[24].mxu0 %vm591_vm3, %v1270_v35  ;;  %v2315_v35 = vld [vmem:[#allocation11] ss:$0 sm:$0xff] }
 0x8d7   :  { %2623 = vmatprep.mubr.msk.bf16.mxu0 %vm3155_vm0, %v3153_v4  ;;  %2608 = vmatpush3.bf16.msra.mxu0 %v2685_v58 }
 0x8d8   :  { %2609 = vmatprep.subr.bf16.mxu0 %v3153_v4 }
 0x8d9   :  { %605 = vadd.xlane.f32.xlu0 %v604_v15 }
 0x8da   :  { %v1257_v36 = vpop.xlane.xlu1 %1256 }
 0x8db   :  { %v1259_v37 = vsub.f32 %v1246_v17, %v1257_v36  ;;  %2610 = vmatpush3.bf16.msra.mxu0 %v2686_v59 }
 0x8dc   :  { %2611 = vmatprep.subr.bf16.mxu0 %v3153_v4 }
 0x8dd   :  { %v1262_v38 = vmul.f32 1.442695, %v1259_v37  ;;  %v1504_v37 = vmul.f32 0.4, %v3428_v50  ;;  %v2695_v50 = vld [vmem:[#allocation16 + $0x4] ss:$16 sps:$4 sm:$0xff]  }
 0x8de   :  { %v1321_v39 = vpop.permute.xlu1 %1320 }
 0x8df   :  { %2791 = vpow2.f32 %v1262_v38  ;;  %v1326_v40 = vsel %vm615_vm2, %v1321_v39, 0 }
 0x8e0   :  { %2602 = vmatpush3.bf16.msra.mxu1 %v1326_v40 }
 0x8e1   :  { %1765 = vmatprep.subr.bf16.mxu1 %v2695_v50  ;;  %v2747_v50 = vld [vmem:[#allocation19 + $0x8] sm:$0xff]  }
 0x8e9   :  { %v2792_v41 = vpop.eup %2791 }
 0x8ea   :  { %v1267_v42 = vsel %vm591_vm3, %v2792_v41, 0.0  ;;  %v1271_v43 = vpack.c.bf16 %v2792_v41, %v2792_v41 }
 0x8eb   :  { %1268 = vadd.xlane.f32.xlu1 %v1267_v42  ;;  %v1505_v42 = vmul.f32 0.4, %v3430_v51  ;;  %v2699_v51 = vld [vmem:[#allocation16 + $0x20] ss:$16 sps:$4 sm:$0xff]  }
 0x8ec   :  { %2604 = vmatmul.mubr.msk.bf16.vlgmr.msra.gmra.mrb[40].mxu1 %vm591_vm3, %v1271_v43 }
 0x8ed   :  { %1797 = vmatprep.mubr.bf16.mxu1 %v3154_v30 }
 0x8ef   :  { %608 = vadd.xlane.f32.xlu1 %v607_v29 }
 0x8f9   :  { %v824_v45 = vpop.xlane.xlu0 %823 }
 0x8fd   :  { %v1045_v46 = vpop.xlane.xlu0 %1044 }
 0x8fe   :  { %2793 = vrcp.f32 %v1045_v46 }
 0x901   :  { %v1048_v47 = vpop.xlane.xlu0 %1047 }
 0x902   :  { %2795 = vrcp.f32 %v1048_v47  ;;  %v2830_v47 = vld [vmem:[#allocation2 + $0x8] sm:$0xff] }
 0x903   :  { %2797 = vrcp.f32 %v824_v45  ;;  %v2829_v45 = vld [vmem:[#allocation2] sm:$0xff] }
 0x908   :  { %v2794_v49 = vpop.eup %2793 }
 0x909   :  { %v1149_v53 = vmul.f32 %v2794_v49, %v3588_v60  ;;  %v2687_v60 = vld [vmem:[#allocation10 + $0x10] sm:$0xff]  }
 0x90a   :  { %2612 = vmatpush3.bf16.msra.mxu0 %v2687_v60  ;;  %v2693_v49 = vld [vmem:[#allocation16] ss:$16 sps:$4 sm:$0xff]  }
 0x90b   :  { %2613 = vmatprep.subr.bf16.mxu0 %v3153_v4  ;;  %1766 = vmatpush1.bf16.msra.mxu1 %v2693_v49  ;;  %v2746_v49 = vld [vmem:[#allocation19 + $0xc8] sm:$0xff]  }
 0x90c   :  { %v2796_v52 = vpop.eup %2795 }
 0x90d   :  { %v1150_v57 = vmul.f32 %v2796_v52, %v1141_v11  ;;  %v2798_v3 = vpop.eup %2797  ;;  %v2696_v52 = vld [vmem:[#allocation16 + $0x8] ss:$16 sps:$4 sm:$0xff]  }
 0x90e   :  { %v928_v33 = vmul.f32 %v2798_v3, %v3558_v22  ;;  %2614 = vmatpush3.bf16.msra.mxu0 %v2688_v61  ;;  %v2689_v22 = vld [vmem:[#allocation10 + $0x20] sm:$0xff]   ;;  %v2707_v61 = vld [vmem:[#allocation16 + $0x44] ss:$16 sps:$4 sm:$0xff]  }
 0x90f   :  { %v827_v62 = vpop.xlane.xlu1 %826  ;;  %v1151_v0 = vpack.c.bf16 %v1150_v57, %v1149_v53  ;;  %2615 = vmatprep.subr.bf16.mxu0 %v3153_v4  ;;  %v2698_v53 = vld [vmem:[#allocation16 + $0xc] ss:$16 sps:$4 sm:$0xff]   ;;  %v2701_v57 = vld [vmem:[#allocation16 + $0x24] ss:$16 sps:$4 sm:$0xff]  }
 0x910   :  { %2799 = vrcp.f32 %v827_v62  ;;  %v2704_v62 = vld [vmem:[#allocation16 + $0x2c] ss:$16 sps:$4 sm:$0xff]   ;;  %1767 = vmatprep.subr.bf16.mxu1 %v2701_v57  ;;  %v2750_v57 = vld [vmem:[#allocation19 + $0xd0] sm:$0xff]  }
 0x911   :  { %1377 = vrot.lane.b32.xlu1 %v1151_v0, %s3145_s2  ;;  %v2702_v0 = vld [vmem:[#allocation16 + $0x28] ss:$16 sps:$4 sm:$0xff]   ;;  %1768 = vmatpush1.bf16.msra.mxu1 %v2699_v51  ;;  %s3158_s2 = smov [#allocation22]  }
 0x912   :  { %2616 = vmatpush3.bf16.msra.mxu0 %v2689_v22  ;;  %v2710_v22 = vld [vmem:[#allocation16 + $0x4c] ss:$16 sps:$4 sm:$0xff]   ;;  %1769 = vmatprep.subr.bf16.mxu1 %v2707_v61  ;;  %v2752_v51 = vld [vmem:[#allocation19 + $0x90] sm:$0xff]   ;;  %s2249_s28 = sshll.u32 %s3158_s2, 4  ;;  %s2250_s28 = int_to_ptr.vmem [resolvable:$true] %s2249_s28 }
 0x913   :  { %2617 = vmatprep.subr.bf16.mxu0 %v3153_v4  ;;  %v2762_v61 = vld [vmem:[#allocation19 + $0xe8] sm:$0xff]   ;;  %s3095_s0 = scalar_lea.vmem %s2250_s28, 256  ;;  %p3100_p13 = scmp.lt.s32.totalorder %s2250_s28, %s2250_s28 }
 0x914   :  { %p3096_p12 = scmp.ne.s32.totalorder %s2250_s28, %s3095_s0  ;;  %p3101_p0 = scmp.lt.s32.totalorder %s3095_s0, %s3095_s0 }
 0x916   :  { %p3102_p1 = por %p3101_p0, %p3100_p13 }
 0x918   :  { %p3103_p2 = pnand %p3102_p1, %p3096_p12 }
 0x91a   :  { %v2800_v54 = vpop.eup %2799 }
 0x91b   :  { %v929_v55 = vmul.f32 %v2800_v54, %v3561_v34  ;;  %v2690_v34 = vld [vmem:[#allocation10 + $0x28] sm:$0xff]  }
 0x91c   :  { %2618 = vmatpush3.bf16.msra.mxu0 %v2690_v34  ;;  %v2705_v34 = vld [vmem:[#allocation16 + $0x40] ss:$16 sps:$4 sm:$0xff]  }
 0x91d   :  { %v930_v56 = vpack.c.bf16 %v929_v55, %v928_v33  ;;  %2619 = vmatprep.subr.bf16.mxu0 %v3153_v4  ;;  %1770 = vmatpush1.bf16.msra.mxu1 %v2705_v34  ;;  %v2764_v34 = vld [vmem:[#allocation19 + $0xa8] sm:$0xff]  }
 0x91f   :  { %1374 = vrot.lane.b32.xlu0 %v930_v56, %s3157_s22 }
 0x920   :  { %2620 = vmatpush3.bf16.msra.mxu0 %v2691_v63  ;;  %v2708_v63 = vld [vmem:[#allocation16 + $0x48] ss:$16 sps:$4 sm:$0xff]  }
 0x921   :  { %2621 = vmatprep.subr.bf16.mxu0 %v3153_v4 }
 0x924   :  { %2622 = vmatpush3.bf16.msra.mxu0 %v2692_v1  ;;  %v2713_v1 = vld [vmem:[#allocation16 + $0x64] ss:$16 sps:$4 sm:$0xff]  }
 0x925   :  { %1808 = vmatprep.subr.bf16.mxu0 %v2698_v53  ;;  %1771 = vmatprep.subr.bf16.mxu1 %v2713_v1  ;;  %v2749_v53 = vld [vmem:[#allocation19 + $0x50] sm:$0xff]  }
 0x926   :  { %v2766_v1 = vld [vmem:[#allocation19 + $0xf0] sm:$0xff]  }
 0x962   :  { %v1266_v6 = vpop.xlane.xlu0 %1265 }
 0x966   :  { %v606_v7 = vpop.xlane.xlu0 %605 }
 0x967   :  { %2801 = vrcp.f32 %v606_v7  ;;  %v2711_v7 = vld [vmem:[#allocation16 + $0x60] ss:$16 sps:$4 sm:$0xff]  }
 0x968   :  { %1772 = vmatpush1.bf16.msra.mxu1 %v2711_v7  ;;  %v2768_v7 = vld [vmem:[#allocation19 + $0xb0] sm:$0xff]  }
 0x971   :  { %v2802_v10 = vpop.eup %2801 }
 0x972   :  { %v707_v12 = vmul.f32 %v2802_v10, %v3513_v44  ;;  %v2722_v10 = vld [vmem:[#allocation16 + $0x8c] ss:$16 sps:$4 sm:$0xff]  }
 0x978   :  { %v1269_v8 = vpop.xlane.xlu1 %1268 }
 0x97c   :  { %v609_v9 = vpop.xlane.xlu1 %608 }
 0x97d   :  { %2803 = vrcp.f32 %v609_v9  ;;  %v2719_v9 = vld [vmem:[#allocation16 + $0x84] ss:$16 sps:$4 sm:$0xff]  }
 0x97e   :  { %2805 = vrcp.f32 %v1266_v6  ;;  %v2716_v6 = vld [vmem:[#allocation16 + $0x6c] ss:$16 sps:$4 sm:$0xff]   ;;  %1773 = vmatprep.subr.bf16.mxu1 %v2719_v9 }
 0x97f   :  { %2807 = vrcp.f32 %v1269_v8  ;;  %v2714_v8 = vld [vmem:[#allocation16 + $0x68] ss:$16 sps:$4 sm:$0xff]   ;;  %v2770_v9 = vld [vmem:[#allocation19 + $0xf8] sm:$0xff]  }
 0x987   :  { %v2804_v11 = vpop.eup %2803 }
 0x988   :  { %v708_v13 = vmul.f32 %v2804_v11, %v3515_v48  ;;  %v2806_v4 = vpop.eup %2805  ;;  %v1378_v48 = vpop.permute.xlu1 %1377  ;;  %v2717_v11 = vld [vmem:[#allocation16 + $0x80] ss:$16 sps:$4 sm:$0xff]  }
 0x989   :  { %v2808_v21 = vpop.eup %2807  ;;  %1774 = vmatpush1.bf16.msra.mxu1 %v2717_v11  ;;  %v2772_v11 = vld [vmem:[#allocation19 + $0xb8] sm:$0xff]  }
 0x98a   :  { %v709_v14 = vpack.c.bf16 %v708_v13, %v707_v12  ;;  %v2720_v12 = vld [vmem:[#allocation16 + $0x88] ss:$16 sps:$4 sm:$0xff]   ;;  %v2725_v13 = vld [vmem:[#allocation16 + $0xa4] ss:$16 sps:$4 sm:$0xff]  }
 0x98b   :  { %1775 = vmatprep.subr.bf16.mxu1 %v2725_v13 }
 0x991   :  { %v1375_v44 = vpop.permute.xlu0 %1374 }
 0x992   :  { %v1384_v31 = vsel %vm498_vm1, %v709_v14, %v1375_v44  ;;  %v2728_v14 = vld [vmem:[#allocation16 + $0xac] ss:$16 sps:$4 sm:$0xff]  }
 0x993   :  { %v1387_v16 = vsel %vm1385_vm4, %v1384_v31, %v1378_v48 }
 0x9a9   :  { %v1314_v17 = vpop.f32.mrb[24].mxu0 }
 0x9aa   :  { %v2599_v18 = vpop.f32.mrb[25].mxu0  ;;  %v1370_v24 = vmul.f32 %v2806_v4, %v1314_v17  ;;  %v2723_v17 = vld [vmem:[#allocation16 + $0xa0] ss:$16 sps:$4 sm:$0xff]  }
 0x9ab   :  { %v1317_v19 = vpop.f32.mrb[26].mxu0  ;;  %v2726_v18 = vld [vmem:[#allocation16 + $0xa8] ss:$16 sps:$4 sm:$0xff]   ;;  %1776 = vmatpush1.bf16.msra.mxu1 %v2723_v17  ;;  %v2729_v4 = vld [vmem:[#allocation16 + $0xc0] ss:$16 sps:$4 sm:$0xff]  }
 0x9ac   :  { %v2600_v20 = vpop.f32.mrb[27].mxu0  ;;  %v2731_v19 = vld [vmem:[#allocation16 + $0xc4] ss:$16 sps:$4 sm:$0xff]  }
 0x9ad   :  { %v2734_v20 = vld [vmem:[#allocation16 + $0xcc] ss:$16 sps:$4 sm:$0xff]   ;;  %1777 = vmatprep.subr.bf16.mxu1 %v2731_v19 }
 0x9af   :  { %1778 = vmatpush1.bf16.msra.mxu1 %v2729_v4 }
 0x9bf   :  { %v1362_v23 = vpop.f32.mrb[40].mxu1 }
 0x9c0   :  { %v1371_v25 = vmul.f32 %v2808_v21, %v1362_v23  ;;  %v2605_v26 = vpop.f32.mrb[41].mxu1  ;;  %v2732_v21 = vld [vmem:[#allocation16 + $0xc8] ss:$16 sps:$4 sm:$0xff]   ;;  %v2737_v23 = vld [vmem:[#allocation16 + $0xe4] ss:$16 sps:$4 sm:$0xff]  }
 0x9c1   :  { %v1365_v27 = vpop.f32.mrb[42].mxu1  ;;  %v2738_v26 = vld [vmem:[#allocation16 + $0xe8] ss:$16 sps:$4 sm:$0xff]   ;;  %1779 = vmatprep.subr.bf16.mxu1 %v2737_v23 }
 0x9c2   :  { %v1372_v2 = vpack.c.bf16 %v1371_v25, %v1370_v24  ;;  %v2606_v28 = vpop.f32.mrb[43].mxu1  ;;  %v2740_v24 = vld [vmem:[#allocation16 + $0xec] ss:$16 sps:$4 sm:$0xff]   ;;  %v2735_v25 = vld [vmem:[#allocation16 + $0xe0] ss:$16 sps:$4 sm:$0xff]   ;;  %v2741_v27 = vld [vmem:[#allocation19 + $0x40] sm:$0xff]  }
 0x9c3   :  { %1780 = vmatpush1.bf16.msra.mxu1 %v2735_v25 }
 0x9c4   :  { %1380 = vrot.lane.b32.xlu1 %v1372_v2, %s3156_s11  ;;  %v2742_v2 = vld [vmem:[#allocation19 + $0xc0] sm:$0xff]   ;;  %2447 = vmatprep.subr.bf16.mxu1 %v2741_v27 }
 0xa36   :  { %v1381_v5 = vpop.permute.xlu1 %1380 }
 0xa37   :  { %v1390_v32 = vsel %vm1388_vm5, %v1387_v16, %v1381_v5 }
 0xa38   :  { %2624 = vmatmul.mubr.bf16.vlgmr.msra.gmra.mrb[28].mxu0 %v1390_v32 }
 0xa39   :  { %1840 = vmatprep.mubr.bf16.mxu0 %v3154_v30  ;;  %1809 = vmatpush1.bf16.msra.mxu0 %v2696_v52  ;;  %v2748_v52 = vld [vmem:[#allocation19 + $0x88] sm:$0xff]  }
 0xa3a   :  { %1810 = vmatprep.subr.bf16.mxu0 %v2704_v62  ;;  %v2751_v62 = vld [vmem:[#allocation19 + $0x10] sm:$0xff]  }
 0xa3d   :  { %1811 = vmatpush1.bf16.msra.mxu0 %v2702_v0  ;;  %v2753_v0 = vld [vmem:[#allocation19 + $0x58] sm:$0xff]  }
 0xa3e   :  { %1812 = vmatprep.subr.bf16.mxu0 %v2710_v22  ;;  %v2763_v22 = vld [vmem:[#allocation19 + $0x28] sm:$0xff]  }
 0xa41   :  { %1813 = vmatpush1.bf16.msra.mxu0 %v2708_v63  ;;  %v2765_v63 = vld [vmem:[#allocation19 + $0x70] sm:$0xff]  }
 0xa42   :  { %1814 = vmatprep.subr.bf16.mxu0 %v2716_v6  ;;  %v2767_v6 = vld [vmem:[#allocation19 + $0x30] sm:$0xff]  }
 0xa45   :  { %1815 = vmatpush1.bf16.msra.mxu0 %v2714_v8  ;;  %v2769_v8 = vld [vmem:[#allocation19 + $0x78] sm:$0xff]  }
 0xa46   :  { %1816 = vmatprep.subr.bf16.mxu0 %v2722_v10  ;;  %v2771_v10 = vld [vmem:[#allocation19 + $0x38] sm:$0xff]  }
 0xa49   :  { %1817 = vmatpush1.bf16.msra.mxu0 %v2720_v12  ;;  %v1585_v12 = vlaneseq }
 0xa4a   :  { %1818 = vmatprep.subr.bf16.mxu0 %v2728_v14 }
 0xa4b   :  { %v1586_v13 = vshrl.u32 %v1585_v12, 7 }
 0xa4d   :  { %1819 = vmatpush1.bf16.msra.mxu0 %v2726_v18  ;;  %v1587_v14 = vsub.s32 0, %v1586_v13  ;;  %v1595_v17 = vsub.s32 2, %v1586_v13  ;;  %v1583_v18 = vld [vmem:[#allocation17] sm:$0xf]  ;;  %v1591_v19 = vsub.s32 1, %v1586_v13 }
 0xa4e   :  { %1820 = vmatprep.subr.bf16.mxu0 %v2734_v20  ;;  %v1599_v20 = vsub.s32 3, %v1586_v13 }
 0xa4f   :  { %v1588_v4 = vrot.slane %v1583_v18, %v1587_v14  ;;  %v1592_v23 = vrot.slane %v1583_v18, %v1591_v19 }
 0xa51   :  { %1821 = vmatpush1.bf16.msra.mxu0 %v2732_v21  ;;  %v1596_v21 = vrot.slane %v1583_v18, %v1595_v17 }
 0xa52   :  { %1822 = vmatprep.subr.bf16.mxu0 %v2740_v24  ;;  %v1600_v24 = vrot.slane %v1583_v18, %v1599_v20 }
 0xa55   :  { %1823 = vmatpush1.bf16.msra.mxu0 %v2738_v26 }
 0xa56   :  { %2469 = vmatprep.subr.bf16.mxu0 %v2742_v2 }
 0xb0b   :  { %v1497_v15 = vpop.f32.mrb[28].mxu0 }
 0xb0c   :  { %v1498_v36 = vadd.f32 %v2315_v35, %v1497_v15  ;;  %v2625_v38 = vpop.f32.mrb[29].mxu0  ;;  %v2324_v15 = vld [vmem:[#allocation13] ss:$0 sm:$0xff] }
 0xb0d   :  { %v1500_v39 = vpop.f32.mrb[30].mxu0 }
 0xb0e   :  { %v1506_v40 = vadd.f32 %v1504_v37, %v1498_v36  ;;  %v1501_v41 = vadd.f32 %v2315_v35, %v1500_v39  ;;  %v2626_v43 = vpop.f32.mrb[31].mxu0  ;;  %v2325_v39 = vld [vmem:[#allocation14] ss:$0 sm:$0xff] }
 0xb0f   :  { %v2743_v43 = vld [vmem:[#allocation19] sm:$0xff]  }
 0xb10   :  { %v1507_v29 = vadd.f32 %v1505_v42, %v1501_v41  ;;  %v3635_v46 = vadd.f32 %v2829_v45, %v1506_v40 }
 0xb12   :  { %1510 = vadd.xlane.f32.xlu1 %v3635_v46  ;;  %v3638_v30 = vadd.f32 %v2830_v47, %v1507_v29  ;;  %v2744_v29 = vld [vmem:[#allocation19 + $0x80] sm:$0xff]   ;;  %v2745_v47 = vld [vmem:[#allocation19 + $0x48] sm:$0xff]  }
 0xb14   :  { %1512 = vadd.xlane.f32.xlu0 %v3638_v30 }
 0xb9f   :  { %v1511_v3 = vpop.xlane.xlu1 %1510 }
 0xba0   :  { %v1514_v54 = vmul.f32 0.0078125, %v1511_v3  ;;  %v2754_v3 = vld [vmem:[#allocation19 + $0xd8] sm:$0xff]  }
 0xba1   :  { %v1513_v33 = vpop.xlane.xlu0 %1512 }
 0xba2   :  { %v3642_v55 = vsub.f32 %v3635_v46, %v1514_v54  ;;  %v1515_v56 = vmul.f32 0.0078125, %v1513_v33  ;;  %v2755_v54 = vld [vmem:[#allocation19 + $0x18] sm:$0xff]  }
 0xba3   :  { %v2756_v33 = vld [vmem:[#allocation19 + $0x98] sm:$0xff]  }
 0xba4   :  { %v3645_v58 = vsub.f32 %v3638_v30, %v1515_v56  ;;  %v1518_v59 = vmul.f32 %v3642_v55, %v3642_v55  ;;  %v2758_v56 = vld [vmem:[#allocation19 + $0xe0] sm:$0xff]  }
 0xba6   :  { %1520 = vadd.xlane.f32.xlu0 %v1518_v59  ;;  %v1519_v60 = vmul.f32 %v3645_v58, %v3645_v58  ;;  %v2760_v59 = vld [vmem:[#allocation19 + $0xa0] sm:$0xff]  }
 0xbaa   :  { %1522 = vadd.xlane.f32.xlu0 %v1519_v60  ;;  %v2761_v60 = vld [vmem:[#allocation19 + $0x68] sm:$0xff]  }
 0xc33   :  { %v1521_v28 = vpop.xlane.xlu0 %1520 }
 0xc34   :  { %v1524_v44 = vmul.f32 0.0078125, %v1521_v28 }
 0xc36   :  { %v1526_v48 = vadd.f32 1e-05, %v1524_v44 }
 0xc37   :  { %v1523_v31 = vpop.xlane.xlu0 %1522 }
 0xc38   :  { %2809 = vrsqrt.f32 %v1526_v48  ;;  %v1525_v16 = vmul.f32 0.0078125, %v1523_v31 }
 0xc3a   :  { %v1527_v5 = vadd.f32 1e-05, %v1525_v16 }
 0xc3c   :  { %2811 = vrsqrt.f32 %v1527_v5 }
 0xc42   :  { %v2810_v32 = vpop.eup %2809 }
 0xc43   :  { %v1530_v35 = vmul.f32 %v2810_v32, %v3642_v55  ;;  %v2757_v55 = vld [vmem:[#allocation19 + $0x60] sm:$0xff]  }
 0xc45   :  { %v1539_v38 = vmul.f32 %v2324_v15, %v1530_v35 }
 0xc46   :  { %v2812_v36 = vpop.eup %2811 }
 0xc47   :  { %v1531_v37 = vmul.f32 %v2812_v36, %v3645_v58  ;;  %v1548_v41 = vadd.f32 %v2325_v39, %v1539_v38  ;;  %v2759_v58 = vld [vmem:[#allocation19 + $0x20] sm:$0xff]  }
 0xc49   :  { %v1540_v40 = vmul.f32 %v2324_v15, %v1531_v37 }
 0xc4b   :  { %v1549_v42 = vadd.f32 %v2325_v39, %v1540_v40 }
 0xc4d   :  { %v1550_v45 = vpack.c.bf16 %v1549_v42, %v1548_v41 }
 0xc4f   :  { %1798 = vmatmul.mubr.bf16.vlgmr.msra.gmra.mrb[44].mxu1 %v1550_v45  ;;  %1841 = vmatmul.mubr.bf16.vlgmr.msra.gmra.mrb[32].mxu0 %v1550_v45 }
 0xc50   :  { %2448 = vmatpush3.bf16.msra.mxu1 %v2743_v43  ;;  %2470 = vmatpush3.bf16.msra.mxu0 %v2744_v29 }
 0xc51   :  { %2449 = vmatprep.subr.bf16.mxu1 %v2745_v47  ;;  %2471 = vmatprep.subr.bf16.mxu0 %v2746_v49 }
 0xc54   :  { %2450 = vmatpush3.bf16.msra.mxu1 %v2747_v50  ;;  %2472 = vmatpush3.bf16.msra.mxu0 %v2748_v52 }
 0xc55   :  { %2451 = vmatprep.subr.bf16.mxu1 %v2749_v53  ;;  %2473 = vmatprep.subr.bf16.mxu0 %v2750_v57 }
 0xc58   :  { %2452 = vmatpush3.bf16.msra.mxu1 %v2751_v62  ;;  %2474 = vmatpush3.bf16.msra.mxu0 %v2752_v51 }
 0xc59   :  { %2453 = vmatprep.subr.bf16.mxu1 %v2753_v0  ;;  %2475 = vmatprep.subr.bf16.mxu0 %v2754_v3 }
 0xc5c   :  { %2454 = vmatpush3.bf16.msra.mxu1 %v2755_v54  ;;  %2476 = vmatpush3.bf16.msra.mxu0 %v2756_v33 }
 0xc5d   :  { %2455 = vmatprep.subr.bf16.mxu1 %v2757_v55  ;;  %2477 = vmatprep.subr.bf16.mxu0 %v2758_v56 }
 0xc60   :  { %2456 = vmatpush3.bf16.msra.mxu1 %v2759_v58  ;;  %2478 = vmatpush3.bf16.msra.mxu0 %v2760_v59 }
 0xc61   :  { %2457 = vmatprep.subr.bf16.mxu1 %v2761_v60  ;;  %2479 = vmatprep.subr.bf16.mxu0 %v2762_v61 }
 0xc64   :  { %2458 = vmatpush3.bf16.msra.mxu1 %v2763_v22  ;;  %2480 = vmatpush3.bf16.msra.mxu0 %v2764_v34 }
 0xc65   :  { %2459 = vmatprep.subr.bf16.mxu1 %v2765_v63  ;;  %2481 = vmatprep.subr.bf16.mxu0 %v2766_v1 }
 0xc68   :  { %2460 = vmatpush3.bf16.msra.mxu1 %v2767_v6  ;;  %2482 = vmatpush3.bf16.msra.mxu0 %v2768_v7 }
 0xc69   :  { %2461 = vmatprep.subr.bf16.mxu1 %v2769_v8  ;;  %2483 = vmatprep.subr.bf16.mxu0 %v2770_v9 }
 0xc6c   :  { %2462 = vmatpush3.bf16.msra.mxu1 %v2771_v10  ;;  %2484 = vmatpush3.bf16.msra.mxu0 %v2772_v11 }
 0xd22   :  { %v1799_v25 = vpop.f32.mrb[44].mxu1  ;;  %v1842_v26 = vpop.f32.mrb[32].mxu0 }
 0xd23   :  { %v1800_v27 = vadd.f32 %v1799_v25, %v1588_v4  ;;  %v1843_v2 = vadd.f32 %v1842_v26, %v1596_v21  ;;  %v1801_v28 = vpop.f32.mrb[45].mxu1  ;;  %v1844_v44 = vpop.f32.mrb[33].mxu0  ;;  %v2358_v25 = vld [vmem:[#allocation20] ss:$0 sm:$0xff] }
 0xd24   :  { %v1802_v48 = vadd.f32 %v1801_v28, %v1592_v23  ;;  %v1845_v31 = vadd.f32 %v1844_v44, %v1600_v24  ;;  %v1803_v16 = vpop.f32.mrb[46].mxu1  ;;  %v1846_v5 = vpop.f32.mrb[34].mxu0 }
 0xd25   :  { %v1859_v32 = vmul.f32 0.70710677, %v1800_v27  ;;  %v1861_v35 = vmul.f32 0.70710677, %v1843_v2  ;;  %v1804_v37 = vadd.f32 %v1803_v16, %v1588_v4  ;;  %v1847_v38 = vadd.f32 %v1846_v5, %v1596_v21  ;;  %v1805_v39 = vpop.f32.mrb[47].mxu1  ;;  %v1848_v40 = vpop.f32.mrb[35].mxu0 }
 0xd26   :  { %v1860_v15 = vmul.f32 0.70710677, %v1802_v48  ;;  %v1862_v36 = vmul.f32 0.70710677, %v1845_v31  ;;  %v1806_v41 = vadd.f32 %v1805_v39, %v1592_v23  ;;  %v1849_v42 = vadd.f32 %v1848_v40, %v1600_v24 }
 0xd27   :  { %2813 = verf.f32 %v1859_v32  ;;  %v1863_v43 = vmul.f32 0.70710677, %v1804_v37  ;;  %v1865_v29 = vmul.f32 0.70710677, %v1847_v38  ;;  %v1851_v51 = vmul.f32 0.5, %v1800_v27 }
 0xd28   :  { %2815 = verf.f32 %v1861_v35  ;;  %v1864_v45 = vmul.f32 0.70710677, %v1806_v41  ;;  %v1866_v47 = vmul.f32 0.70710677, %v1849_v42  ;;  %v1853_v0 = vmul.f32 0.5, %v1843_v2 }
 0xd29   :  { %2817 = verf.f32 %v1860_v15  ;;  %v1852_v33 = vmul.f32 0.5, %v1802_v48  ;;  %v1855_v56 = vmul.f32 0.5, %v1804_v37  ;;  %v1854_v60 = vmul.f32 0.5, %v1845_v31 }
 0xd2a   :  { %2819 = verf.f32 %v1862_v36  ;;  %v1857_v22 = vmul.f32 0.5, %v1847_v38  ;;  %v1856_v7 = vmul.f32 0.5, %v1806_v41  ;;  %v1858_v11 = vmul.f32 0.5, %v1849_v42 }
 0xd2b   :  { %2821 = verf.f32 %v1863_v43 }
 0xd2c   :  { %2823 = verf.f32 %v1865_v29 }
 0xd2d   :  { %2825 = verf.f32 %v1864_v45 }
 0xd2e   :  { %2827 = verf.f32 %v1866_v47 }
 0xd31   :  { %v2814_v49 = vpop.eup %2813 }
 0xd32   :  { %v2816_v50 = vpop.eup %2815  ;;  %v1875_v57 = vadd.f32 1.0, %v2814_v49 }
 0xd33   :  { %v2818_v52 = vpop.eup %2817  ;;  %v1877_v3 = vadd.f32 1.0, %v2816_v50 }
 0xd34   :  { %v2820_v53 = vpop.eup %2819  ;;  %v1876_v55 = vadd.f32 1.0, %v2818_v52  ;;  %v1883_v1 = vmul.f32 %v1875_v57, %v1851_v51 }
 0xd35   :  { %v2822_v62 = vpop.eup %2821  ;;  %v1878_v61 = vadd.f32 1.0, %v2820_v53  ;;  %v1885_v9 = vmul.f32 %v1877_v3, %v1853_v0 }
 0xd36   :  { %v2824_v54 = vpop.eup %2823  ;;  %v1879_v58 = vadd.f32 1.0, %v2822_v62  ;;  %v1884_v13 = vmul.f32 %v1876_v55, %v1852_v33 }
 0xd37   :  { %v2826_v59 = vpop.eup %2825  ;;  %v1881_v34 = vadd.f32 1.0, %v2824_v54  ;;  %v1886_v18 = vmul.f32 %v1878_v61, %v1854_v60 }
 0xd38   :  { %v2828_v63 = vpop.eup %2827  ;;  %v1887_v6 = vmul.f32 %v1879_v58, %v1855_v56  ;;  %v1880_v8 = vadd.f32 1.0, %v2826_v59 }
 0xd39   :  { %v1889_v10 = vmul.f32 %v1881_v34, %v1857_v22  ;;  %v1882_v12 = vadd.f32 1.0, %v2828_v63 }
 0xd3a   :  { %v1891_v14 = vpack.c.bf16 %v1887_v6, %v1883_v1  ;;  %v1888_v17 = vmul.f32 %v1880_v8, %v1856_v7 }
 0xd3b   :  { %v1893_v19 = vpack.c.bf16 %v1889_v10, %v1885_v9  ;;  %v1890_v20 = vmul.f32 %v1882_v12, %v1858_v11 }
 0xd3c   :  { %v1892_v4 = vpack.c.bf16 %v1888_v17, %v1884_v13 }
 0xd3d   :  { %v1894_v21 = vpack.c.bf16 %v1890_v20, %v1886_v18 }
 0xd3e   :  { %2190 = vmatprep.mubr.bf16.mxu1 %v1892_v4 }
 0xd3f   :  { %2231 = vmatprep.mubr.bf16.mxu0 %v1894_v21  ;;  %2191 = vmatmul.mubr.bf16.vlgmr.msra.gmra.mrb[48].mxu1 %v1891_v14 }
 0xd40   :  { %2232 = vmatmul.mubr.bf16.vlgmr.msra.gmra.mrb[36].mxu0 %v1893_v19 }
 0xe12   :  { %v2463_v23 = vpop.f32.mrb[48].mxu1 }
 0xe13   :  { %v2485_v24 = vpop.f32.mrb[36].mxu0  ;;  %v2464_v26 = vpop.f32.mrb[49].mxu1 }
 0xe14   :  { %v2465_v27 = vadd.f32 %v2464_v26, %v2463_v23  ;;  %v2486_v2 = vpop.f32.mrb[37].mxu0  ;;  %v2466_v28 = vpop.f32.mrb[50].mxu1 }
 0xe15   :  { %v2487_v44 = vadd.f32 %v2486_v2, %v2485_v24  ;;  %v2488_v48 = vpop.f32.mrb[38].mxu0  ;;  %v2467_v31 = vpop.f32.mrb[51].mxu1 }
 0xe16   :  { %v2193_v16 = vadd.f32 %v2465_v27, %v2358_v25  ;;  %v2468_v5 = vadd.f32 %v2467_v31, %v2466_v28  ;;  %v2489_v32 = vpop.f32.mrb[39].mxu0 }
 0xe17   :  { %v2490_v35 = vadd.f32 %v2489_v32, %v2488_v48 }
 0xe18   :  { %v2234_v15 = vadd.f32 %v2487_v44, %v2193_v16  ;;  %v2196_v36 = vadd.f32 %v2468_v5, %v2358_v25 }
 0xe1a   :  { %v2240_v37 = vadd.f32 %v2234_v15, %v3635_v46  ;;  %v2237_v38 = vadd.f32 %v2490_v35, %v2196_v36 }
 0xe1c   :  { %2242 = vst [vmem:[#allocation22] sm:$0xff] %v2240_v37  ;;  %v2241_v39 = vadd.f32 %v2237_v38, %v3638_v30 }
 0xe1e   :  { %2243 = vst [vmem:[#allocation22 + $0x8] sm:$0xff] %v2241_v39 }
 0xe1f   :  { %3106 = shalt.err (!%p3103_p2)
}
 0xe20   :  { %s3107_s30 = scalar_lea.hbm %s3682_s12, 256 }
 0xe21   :  { %p3108_p3 = scmp.ne.s32.totalorder %s3682_s12, %s3107_s30  ;;  %p3111_p4 = scmp.lt.u32.totalorder %s3107_s30, %s3682_s12 }
 0xe23   :  { %p3113_p5 = pnand %p3111_p4, %p3108_p3 }
 0xe25   :  { %3116 = shalt.err (!%p3113_p5)
}
 0xe26   :  { %2255 = dma.vmem_to_hbm [thread:$0]  %s2250_s28, 256, %s3682_s12, [#allocation4], %s3141_s9, %s3141_s9, %s3142_s18  }
 0xe27   :  { %3131 = dma.done.wait [#allocation4], 256  }
 0xe28   :  { %3132 = vsyncadd [#allocation4], 4294967040 }
 0xe29   :  { %2259 = vsyncpa [#allocation3], 1 }
 0xe2a   :  { %2260 = vsyncpa [#allocation6], 1 }
 0xe2b   :  { %2261 = vsyncpa [#allocation9], 1 }
 0xe2c   :  { %2262 = vsyncpa [#allocation12], 1 }
 0xe2d   :  { %2263 = vsyncpa [#allocation15], 1 }
 0xe2e   :  { %2264 = vsyncpa [#allocation18], 1 }
 0xe2f   :  { %2265 = vsyncpa [#allocation21], 1 }
 0xe30   :  { %2266 = vsyncpa [#allocation4], 1 }

// kernel: tpu_custom_call.1
= control target key start
LH: loop header
LB: loop body
LE: loop exit
PB: predicated region body
PF: predicated region fallthrough
CT: control target
= control target key end

     0   :  { %17 = vsyncpa [#allocation3], 0  ;;  %s3670_s0 = inlined_call_operand.hbm [shape: f32[2,8,128], index: 0, kind: input, shape index: {}]   ;;  %s3671_s1 = inlined_call_operand.hbm [shape: f32[1,128], index: 1, kind: input, shape index: {}]   ;;  %s3672_s2 = inlined_call_operand.hbm [shape: f32[1,128], index: 2, kind: input, shape index: {}]   ;;  %s3673_s3 = inlined_call_operand.hbm [shape: bf16[128,384], index: 3, kind: input, shape index: {}]   ;;  %s3674_s4 = inlined_call_operand.hbm [shape: bf16[128,128], index: 4, kind: input, shape index: {}]   ;;  %s3675_s5 = inlined_call_operand.hbm [shape: f32[1,128], index: 5, kind: input, shape index: {}]   ;;  %s3676_s6 = inlined_call_operand.hbm [shape: f32[1,128], index: 6, kind: input, shape index: {}]   ;;  %s3677_s7 = inlined_call_operand.hbm [shape: f32[1,128], index: 7, kind: input, shape index: {}]   ;;  %s3678_s8 = inlined_call_operand.hbm [shape: bf16[128,512], index: 8, kind: input, shape index: {}]   ;;  %s3679_s9 = inlined_call_operand.hbm [shape: f32[1,512], index: 9, kind: input, shape index: {}]   ;;  %s3680_s10 = inlined_call_operand.hbm [shape: bf16[512,128], index: 10, kind: input, shape index: {}]   ;;  %s3681_s11 = inlined_call_operand.hbm [shape: f32[1,128], index: 11, kind: input, shape index: {}]   ;;  %s3682_s12 = inlined_call_operand.hbm [shape: f32[2,8,128], index: 12, kind: output, shape index: {}]  }
   0x1   :  { %18 = vsyncpa [#allocation6], 0 }
   0x2   :  { %19 = vsyncpa [#allocation9], 0 }
   0x3   :  { %20 = vsyncpa [#allocation12], 0 }
   0x4   :  { %21 = vsyncpa [#allocation15], 0 }
   0x5   :  { %22 = vsyncpa [#allocation18], 0 }
   0x6   :  { %23 = vsyncpa [#allocation21], 0 }
   0x7   :  { %24 = vsyncpa [#allocation4], 0  ;;  %s3133_s21 = smov [#allocation5]   ;;  %s3134_s23 = smov [#allocation8]  }
   0x8   :  { %s43_s22 = sshll.u32 %s3133_s21, 4  ;;  %s62_s24 = sshll.u32 %s3134_s23, 4  ;;  %s44_s22 = int_to_ptr.vmem [resolvable:$true] %s43_s22  ;;  %s3224_s24 = int_to_ptr.vmem [resolvable:$true] %s62_s24 }
   0x9   :  { %s2831_s27 = scalar_lea.hbm %s3671_s1, 16 }
   0xa   :  { %p2832_p0 = scmp.ne.s32.totalorder %s3671_s1, %s2831_s27  ;;  %p2835_p1 = scmp.lt.u32.totalorder %s2831_s27, %s3671_s1 }
   0xc   :  { %p2837_p2 = pnand %p2835_p1, %p2832_p0 }
   0xe   :  { %2840 = shalt.err (!%p2837_p2)
}
   0xf   :  { %s2841_s14 = scalar_lea.vmem %s44_s22, 16  ;;  %s2845_s15 = scalar_lea.vmem %s44_s22, 32 }
  0x10   :  { %p2842_p3 = scmp.ne.s32.totalorder %s44_s22, %s2841_s14  ;;  %p2846_p4 = scmp.lt.s32.totalorder %s44_s22, %s44_s22 }
  0x11   :  { %p2847_p5 = scmp.lt.s32.totalorder %s2845_s15, %s2841_s14 }
  0x13   :  { %p2848_p6 = por %p2847_p5, %p2846_p4 }
  0x15   :  { %p2849_p7 = pnand %p2848_p6, %p2842_p3 }
  0x17   :  { %2852 = shalt.err (!%p2849_p7)
}
  0x18   :  { %46 = dma.hbm_to_vmem [thread:$0]  %s3671_s1, 16, %s44_s22, [#allocation6]  }
  0x19   :  { %s2853_s20 = scalar_lea.hbm %s3673_s3, 3072 }
  0x1a   :  { %p2854_p8 = scmp.ne.s32.totalorder %s3673_s3, %s2853_s20  ;;  %p2857_p9 = scmp.lt.u32.totalorder %s2853_s20, %s3673_s3 }
  0x1c   :  { %p2859_p10 = pnand %p2857_p9, %p2854_p8 }
  0x1e   :  { %2862 = shalt.err (!%p2859_p10)
}
  0x1f   :  { %s2863_s27 = scalar_lea.vmem %s3224_s24, 3072  ;;  %p2868_p12 = scmp.lt.s32.totalorder %s3224_s24, %s3224_s24 }
  0x20   :  { %p2864_p11 = scmp.ne.s32.totalorder %s3224_s24, %s2863_s27  ;;  %p2869_p13 = scmp.lt.s32.totalorder %s2863_s27, %s2863_s27 }
  0x22   :  { %p2870_p0 = por %p2869_p13, %p2868_p12 }
  0x24   :  { %p2871_p1 = pnand %p2870_p0, %p2864_p11 }
  0x26   :  { %2874 = shalt.err (!%p2871_p1)
}
  0x27   :  { %s3135_s1 = smov 192   ;;  %s3136_s22 = smov 12  }
  0x28   :  { %68 = dma.hbm_to_vmem [thread:$0]  %s3673_s3, 3072, %s3224_s24, [#allocation9], %s3135_s1, %s3135_s1, %s3136_s22  }
  0x29   :  { %s3137_s30 = smov [#allocation11]   ;;  %s3138_s14 = smov [#allocation14]  }
  0x2a   :  { %s87_s13 = sshll.u32 %s3137_s30, 4  ;;  %s107_s15 = sshll.u32 %s3138_s14, 4  ;;  %s88_s13 = int_to_ptr.vmem [resolvable:$true] %s87_s13  ;;  %s108_s15 = int_to_ptr.vmem [resolvable:$true] %s107_s15 }
  0x2b   :  { %s2875_s18 = scalar_lea.hbm %s3675_s5, 16 }
  0x2c   :  { %p2876_p2 = scmp.ne.s32.totalorder %s3675_s5, %s2875_s18  ;;  %p2879_p3 = scmp.lt.u32.totalorder %s2875_s18, %s3675_s5 }
  0x2e   :  { %p2881_p4 = pnand %p2879_p3, %p2876_p2 }
  0x30   :  { %2884 = shalt.err (!%p2881_p4)
}
  0x31   :  { %s2885_s3 = scalar_lea.vmem %s88_s13, 16  ;;  %s2889_s24 = scalar_lea.vmem %s88_s13, 32 }
  0x32   :  { %p2886_p5 = scmp.ne.s32.totalorder %s88_s13, %s2885_s3  ;;  %p2890_p6 = scmp.lt.s32.totalorder %s88_s13, %s88_s13 }
  0x33   :  { %p2891_p7 = scmp.lt.s32.totalorder %s2889_s24, %s2885_s3 }
  0x35   :  { %p2892_p8 = por %p2891_p7, %p2890_p6 }
  0x37   :  { %p2893_p9 = pnand %p2892_p8, %p2886_p5 }
  0x39   :  { %2896 = shalt.err (!%p2893_p9)
}
  0x3a   :  { %90 = dma.hbm_to_vmem [thread:$0]  %s3675_s5, 16, %s88_s13, [#allocation12]  }
  0x3b   :  { %s2897_s22 = scalar_lea.hbm %s3677_s7, 16 }
  0x3c   :  { %p2898_p10 = scmp.ne.s32.totalorder %s3677_s7, %s2897_s22  ;;  %p2901_p11 = scmp.lt.u32.totalorder %s2897_s22, %s3677_s7 }
  0x3e   :  { %p2903_p12 = pnand %p2901_p11, %p2898_p10 }
  0x40   :  { %2906 = shalt.err (!%p2903_p12)
}
  0x41   :  { %s2907_s16 = scalar_lea.vmem %s108_s15, 16  ;;  %s2911_s17 = scalar_lea.vmem %s108_s15, 32 }
  0x42   :  { %p2908_p13 = scmp.ne.s32.totalorder %s108_s15, %s2907_s16  ;;  %p2912_p0 = scmp.lt.s32.totalorder %s108_s15, %s108_s15 }
  0x43   :  { %p2913_p1 = scmp.lt.s32.totalorder %s2911_s17, %s2907_s16 }
  0x45   :  { %p2914_p2 = por %p2913_p1, %p2912_p0 }
  0x47   :  { %p2915_p3 = pnand %p2914_p2, %p2908_p13 }
  0x49   :  { %2918 = shalt.err (!%p2915_p3)
}
  0x4a   :  { %110 = dma.hbm_to_vmem [thread:$0]  %s3677_s7, 16, %s108_s15, [#allocation15]  }
  0x4b   :  { %s3139_s18 = smov [#allocation17]   ;;  %s3140_s20 = smov [#allocation2]  }
  0x4c   :  { %s129_s19 = sshll.u32 %s3139_s18, 4  ;;  %s30_s21 = sshll.u32 %s3140_s20, 4  ;;  %s130_s19 = int_to_ptr.vmem [resolvable:$true] %s129_s19  ;;  %s3279_s21 = int_to_ptr.vmem [resolvable:$true] %s30_s21 }
  0x4d   :  { %s2919_s24 = scalar_lea.hbm %s3679_s9, 64 }
  0x4e   :  { %p2920_p4 = scmp.ne.s32.totalorder %s3679_s9, %s2919_s24  ;;  %p2923_p5 = scmp.lt.u32.totalorder %s2919_s24, %s3679_s9 }
  0x50   :  { %p2925_p6 = pnand %p2923_p5, %p2920_p4 }
  0x52   :  { %2928 = shalt.err (!%p2925_p6)
}
  0x53   :  { %s2929_s7 = scalar_lea.vmem %s130_s19, 64  ;;  %p2934_p8 = scmp.lt.s32.totalorder %s130_s19, %s130_s19 }
  0x54   :  { %p2930_p7 = scmp.ne.s32.totalorder %s130_s19, %s2929_s7  ;;  %p2935_p9 = scmp.lt.s32.totalorder %s2929_s7, %s2929_s7 }
  0x56   :  { %p2936_p10 = por %p2935_p9, %p2934_p8 }
  0x58   :  { %p2937_p11 = pnand %p2936_p10, %p2930_p7 }
  0x5a   :  { %2940 = shalt.err (!%p2937_p11)
}
  0x5b   :  { %132 = dma.hbm_to_vmem [thread:$0]  %s3679_s9, 64, %s130_s19, [#allocation18]  }
  0x5c   :  { %s2941_s30 = scalar_lea.hbm %s3670_s0, 256 }
  0x5d   :  { %p2942_p12 = scmp.ne.s32.totalorder %s3670_s0, %s2941_s30  ;;  %p2945_p13 = scmp.lt.u32.totalorder %s2941_s30, %s3670_s0 }
  0x5f   :  { %p2947_p0 = pnand %p2945_p13, %p2942_p12 }
  0x61   :  { %2950 = shalt.err (!%p2947_p0)
}
  0x62   :  { %s2951_s13 = scalar_lea.vmem %s3279_s21, 256  ;;  %p2956_p2 = scmp.lt.s32.totalorder %s3279_s21, %s3279_s21 }
  0x63   :  { %p2952_p1 = scmp.ne.s32.totalorder %s3279_s21, %s2951_s13  ;;  %p2957_p3 = scmp.lt.s32.totalorder %s2951_s13, %s2951_s13 }
  0x65   :  { %p2958_p4 = por %p2957_p3, %p2956_p2 }
  0x67   :  { %p2959_p5 = pnand %p2958_p4, %p2952_p1 }
  0x69   :  { %2962 = shalt.err (!%p2959_p5)
}
  0x6a   :  { %s3141_s9 = smov 128   ;;  %s3142_s18 = smov 8  }
  0x6b   :  { %36 = dma.hbm_to_vmem [thread:$0]  %s3670_s0, 256, %s3279_s21, [#allocation3], %s3141_s9, %s3141_s9, %s3142_s18  }
  0x6c   :  { %s3143_s23 = smov [#allocation7]   ;;  %s3144_s24 = smov [#allocation10]  }
  0x6d   :  { %s53_s3 = sshll.u32 %s3143_s23, 4  ;;  %s74_s25 = sshll.u32 %s3144_s24, 4  ;;  %s54_s3 = int_to_ptr.vmem [resolvable:$true] %s53_s3  ;;  %s3313_s25 = int_to_ptr.vmem [resolvable:$true] %s74_s25 }
  0x6e   :  { %s2963_s1 = scalar_lea.hbm %s3672_s2, 16 }
  0x6f   :  { %p2964_p6 = scmp.ne.s32.totalorder %s3672_s2, %s2963_s1  ;;  %p2967_p7 = scmp.lt.u32.totalorder %s2963_s1, %s3672_s2 }
  0x71   :  { %p2969_p8 = pnand %p2967_p7, %p2964_p6 }
  0x73   :  { %2972 = shalt.err (!%p2969_p8)
}
  0x74   :  { %s2973_s0 = scalar_lea.vmem %s54_s3, 16  ;;  %s2977_s21 = scalar_lea.vmem %s54_s3, 32 }
  0x75   :  { %p2974_p9 = scmp.ne.s32.totalorder %s54_s3, %s2973_s0  ;;  %p2978_p10 = scmp.lt.s32.totalorder %s54_s3, %s54_s3 }
  0x76   :  { %p2979_p11 = scmp.lt.s32.totalorder %s2977_s21, %s2973_s0 }
  0x78   :  { %p2980_p12 = por %p2979_p11, %p2978_p10 }
  0x7a   :  { %p2981_p13 = pnand %p2980_p12, %p2974_p9 }
  0x7c   :  { %2984 = shalt.err (!%p2981_p13)
}
  0x7d   :  { %56 = dma.hbm_to_vmem [thread:$0]  %s3672_s2, 16, %s54_s3, [#allocation6]  }
  0x7e   :  { %s2985_s17 = scalar_lea.hbm %s3674_s4, 1024 }
  0x7f   :  { %p2986_p0 = scmp.ne.s32.totalorder %s3674_s4, %s2985_s17  ;;  %p2989_p1 = scmp.lt.u32.totalorder %s2985_s17, %s3674_s4 }
  0x81   :  { %p2991_p2 = pnand %p2989_p1, %p2986_p0 }
  0x83   :  { %2994 = shalt.err (!%p2991_p2)
}
  0x84   :  { %s2995_s23 = scalar_lea.vmem %s3313_s25, 1024  ;;  %p3000_p4 = scmp.lt.s32.totalorder %s3313_s25, %s3313_s25 }
  0x85   :  { %p2996_p3 = scmp.ne.s32.totalorder %s3313_s25, %s2995_s23  ;;  %p3001_p5 = scmp.lt.s32.totalorder %s2995_s23, %s2995_s23 }
  0x87   :  { %p3002_p6 = por %p3001_p5, %p3000_p4 }
  0x89   :  { %p3003_p7 = pnand %p3002_p6, %p2996_p3 }
  0x8b   :  { %3006 = shalt.err (!%p3003_p7)
}
  0x8c   :  { %s3145_s2 = smov 64   ;;  %s3146_s3 = smov 4  }
  0x8d   :  { %80 = dma.hbm_to_vmem [thread:$0]  %s3674_s4, 1024, %s3313_s25, [#allocation9], %s3145_s2, %s3145_s2, %s3146_s3  }
  0x8e   :  { %s3147_s27 = smov [#allocation13]   ;;  %s3148_s7 = smov [#allocation16]  }
  0x8f   :  { %s97_s1 = sshll.u32 %s3147_s27, 4  ;;  %s116_s15 = sshll.u32 %s3148_s7, 4  ;;  %s98_s1 = int_to_ptr.vmem [resolvable:$true] %s97_s1  ;;  %s3347_s15 = int_to_ptr.vmem [resolvable:$true] %s116_s15 }
  0x90   :  { %s3007_s0 = scalar_lea.hbm %s3676_s6, 16 }
  0x91   :  { %p3008_p8 = scmp.ne.s32.totalorder %s3676_s6, %s3007_s0  ;;  %p3011_p9 = scmp.lt.u32.totalorder %s3007_s0, %s3676_s6 }
  0x93   :  { %p3013_p10 = pnand %p3011_p9, %p3008_p8 }
  0x95   :  { %3016 = shalt.err (!%p3013_p10)
}
  0x96   :  { %s3017_s4 = scalar_lea.vmem %s98_s1, 16  ;;  %s3021_s25 = scalar_lea.vmem %s98_s1, 32 }
  0x97   :  { %p3018_p11 = scmp.ne.s32.totalorder %s98_s1, %s3017_s4  ;;  %p3022_p12 = scmp.lt.s32.totalorder %s98_s1, %s98_s1 }
  0x98   :  { %p3023_p13 = scmp.lt.s32.totalorder %s3021_s25, %s3017_s4 }
  0x9a   :  { %p3024_p0 = por %p3023_p13, %p3022_p12 }
  0x9c   :  { %p3025_p1 = pnand %p3024_p0, %p3018_p11 }
  0x9e   :  { %3028 = shalt.err (!%p3025_p1)
}
  0x9f   :  { %100 = dma.hbm_to_vmem [thread:$0]  %s3676_s6, 16, %s98_s1, [#allocation12]  }
  0xa0   :  { %s3029_s19 = scalar_lea.hbm %s3678_s8, 4096 }
  0xa1   :  { %p3030_p2 = scmp.ne.s32.totalorder %s3678_s8, %s3029_s19  ;;  %p3033_p3 = scmp.lt.u32.totalorder %s3029_s19, %s3678_s8 }
  0xa3   :  { %p3035_p4 = pnand %p3033_p3, %p3030_p2 }
  0xa5   :  { %3038 = shalt.err (!%p3035_p4)
}
  0xa6   :  { %s3039_s27 = scalar_lea.vmem %s3347_s15, 4096  ;;  %p3044_p6 = scmp.lt.s32.totalorder %s3347_s15, %s3347_s15 }
  0xa7   :  { %p3040_p5 = scmp.ne.s32.totalorder %s3347_s15, %s3039_s27  ;;  %p3045_p7 = scmp.lt.s32.totalorder %s3039_s27, %s3039_s27 }
  0xa9   :  { %p3046_p8 = por %p3045_p7, %p3044_p6 }
  0xab   :  { %p3047_p9 = pnand %p3046_p8, %p3040_p5 }
  0xad   :  { %3050 = shalt.err (!%p3047_p9)
}
  0xae   :  { %s3149_s6 = smov 256   ;;  %s3150_s1 = smov 16  }
  0xaf   :  { %122 = dma.hbm_to_vmem [thread:$0]  %s3678_s8, 4096, %s3347_s15, [#allocation15], %s3149_s6, %s3149_s6, %s3150_s1  }
  0xb0   :  { %s3151_s28 = smov [#allocation19]   ;;  %s3152_s21 = smov [#allocation20]  }
  0xb1   :  { %s138_s0 = sshll.u32 %s3151_s28, 4  ;;  %s151_s29 = sshll.u32 %s3152_s21, 4  ;;  %s139_s0 = int_to_ptr.vmem [resolvable:$true] %s138_s0  ;;  %s152_s29 = int_to_ptr.vmem [resolvable:$true] %s151_s29 }
  0xb2   :  { %s3051_s4 = scalar_lea.hbm %s3680_s10, 4096 }
  0xb3   :  { %p3052_p10 = scmp.ne.s32.totalorder %s3680_s10, %s3051_s4  ;;  %p3055_p11 = scmp.lt.u32.totalorder %s3051_s4, %s3680_s10 }
  0xb5   :  { %p3057_p12 = pnand %p3055_p11, %p3052_p10 }
  0xb7   :  { %3060 = shalt.err (!%p3057_p12)
}
  0xb8   :  { %s3061_s8 = scalar_lea.vmem %s139_s0, 4096  ;;  %p3066_p0 = scmp.lt.s32.totalorder %s139_s0, %s139_s0 }
  0xb9   :  { %p3062_p13 = scmp.ne.s32.totalorder %s139_s0, %s3061_s8  ;;  %p3067_p1 = scmp.lt.s32.totalorder %s3061_s8, %s3061_s8 }
  0xbb   :  { %p3068_p2 = por %p3067_p1, %p3066_p0 }
  0xbd   :  { %p3069_p3 = pnand %p3068_p2, %p3062_p13 }
  0xbf   :  { %3072 = shalt.err (!%p3069_p3)
}
  0xc0   :  { %144 = dma.hbm_to_vmem [thread:$0]  %s3680_s10, 4096, %s139_s0, [#allocation18], %s3145_s2, %s3145_s2, %s3146_s3  }
  0xc1   :  { %s3073_s23 = scalar_lea.hbm %s3681_s11, 16 }
  0xc2   :  { %p3074_p4 = scmp.ne.s32.totalorder %s3681_s11, %s3073_s23  ;;  %p3077_p5 = scmp.lt.u32.totalorder %s3073_s23, %s3681_s11 }
  0xc4   :  { %p3079_p6 = pnand %p3077_p5, %p3074_p4 }
  0xc6   :  { %3082 = shalt.err (!%p3079_p6)
}
  0xc7   :  { %s3083_s1 = scalar_lea.vmem %s152_s29, 16  ;;  %s3087_s7 = scalar_lea.vmem %s152_s29, 32 }
  0xc8   :  { %p3084_p7 = scmp.ne.s32.totalorder %s152_s29, %s3083_s1  ;;  %p3088_p8 = scmp.lt.s32.totalorder %s152_s29, %s152_s29 }
  0xc9   :  { %p3089_p9 = scmp.lt.s32.totalorder %s3087_s7, %s3083_s1 }
  0xcb   :  { %p3090_p10 = por %p3089_p9, %p3088_p8 }
  0xcd   :  { %p3091_p11 = pnand %p3090_p10, %p3084_p7 }
  0xcf   :  { %3094 = shalt.err (!%p3091_p11)
}
  0xd0   :  { %154 = dma.hbm_to_vmem [thread:$0]  %s3681_s11, 16, %s152_s29, [#allocation21]  }
  0xd1   :  { %3117 = dma.done.wait [#allocation3], 256  }
  0xd2   :  { %3118 = vsyncadd [#allocation3], 4294967040 }
  0xd3   :  { %3119 = dma.done.wait [#allocation6], 32  }
  0xd4   :  { %3120 = vsyncadd [#allocation6], 4294967264 }
  0xd5   :  { %3121 = dma.done.wait [#allocation9], 4096  }
  0xd6   :  { %3122 = vsyncadd [#allocation9], 4294963200 }
  0xd7   :  { %3123 = dma.done.wait [#allocation12], 32  }
  0xd8   :  { %3124 = vsyncadd [#allocation12], 4294967264 }
  0xd9   :  { %3125 = dma.done.wait [#allocation15], 4112  }
  0xda   :  { %3126 = vsyncadd [#allocation15], 4294963184 }
  0xdb   :  { %3127 = dma.done.wait [#allocation18], 4160  }
  0xdc   :  { %3128 = vsyncadd [#allocation18], 4294963136 }
  0xdd   :  { %3129 = dma.done.wait [#allocation21], 16  }
  0xde   :  { %3130 = vsyncadd [#allocation21], 4294967280  ;;  %v192_v0 = vld [vmem:[#allocation2] sm:$0xff]  ;;  %v193_v1 = vld [vmem:[#allocation2 + $0x8] sm:$0xff]  ;;  %v3153_v4 = vmov 0.0   ;;  %v3154_v30 = vmov 0  }
  0xdf   :  { %194 = vadd.xlane.f32.xlu0 %v192_v0  ;;  %v2653_v2 = vld [vmem:[#allocation8 + $0x4] ss:$12 sps:$4 sm:$0xff]   ;;  %v2655_v3 = vld [vmem:[#allocation8] ss:$12 sps:$4 sm:$0xff]   ;;  %2491 = vmatprep.subr.bf16.mxu1 %v3153_v4  ;;  %v2656_v5 = vld [vmem:[#allocation8 + $0x8] ss:$12 sps:$4 sm:$0xff]  }
  0xe0   :  { %v2657_v6 = vld [vmem:[#allocation8 + $0x1c] ss:$12 sps:$4 sm:$0xff]   ;;  %396 = vmatprep.subr.bf16.mxu0 %v2653_v2  ;;  %2492 = vmatpush3.bf16.msra.mxu1 %v2656_v5  ;;  %v2659_v15 = vld [vmem:[#allocation8 + $0x18] ss:$12 sps:$4 sm:$0xff]   ;;  %v2660_v16 = vld [vmem:[#allocation8 + $0x20] ss:$12 sps:$4 sm:$0xff]  }
  0xe1   :  { %397 = vmatpush1.bf16.msra.mxu0 %v2655_v3  ;;  %2493 = vmatprep.subr.bf16.mxu1 %v3153_v4  ;;  %v2661_v17 = vld [vmem:[#allocation8 + $0x34] ss:$12 sps:$4 sm:$0xff]   ;;  %v2663_v18 = vld [vmem:[#allocation8 + $0x30] ss:$12 sps:$4 sm:$0xff]   ;;  %v2664_v19 = vld [vmem:[#allocation8 + $0x38] ss:$12 sps:$4 sm:$0xff]  }
  0xe2   :  { %398 = vmatprep.subr.bf16.mxu0 %v2657_v6  ;;  %v2665_v20 = vld [vmem:[#allocation8 + $0x4c] ss:$12 sps:$4 sm:$0xff]   ;;  %v2667_v21 = vld [vmem:[#allocation8 + $0x48] ss:$12 sps:$4 sm:$0xff]   ;;  %v2668_v22 = vld [vmem:[#allocation8 + $0x50] ss:$12 sps:$4 sm:$0xff]   ;;  %428 = vmatprep.mubr.bf16.mxu0 %v3154_v30 }
  0xe3   :  { %196 = vadd.xlane.f32.xlu0 %v193_v1  ;;  %v2669_v23 = vld [vmem:[#allocation8 + $0x64] ss:$12 sps:$4 sm:$0xff]   ;;  %v2671_v24 = vld [vmem:[#allocation8 + $0x60] ss:$12 sps:$4 sm:$0xff]   ;;  %v2672_v25 = vld [vmem:[#allocation8 + $0x68] ss:$12 sps:$4 sm:$0xff]  }
  0xe4   :  { %2494 = vmatpush3.bf16.msra.mxu1 %v2660_v16  ;;  %v2673_v26 = vld [vmem:[#allocation8 + $0x7c] ss:$12 sps:$4 sm:$0xff]   ;;  %v2675_v27 = vld [vmem:[#allocation8 + $0x78] ss:$12 sps:$4 sm:$0xff]   ;;  %v2676_v28 = vld [vmem:[#allocation8 + $0x80] ss:$12 sps:$4 sm:$0xff]  }
  0xe5   :  { %399 = vmatpush1.bf16.msra.mxu0 %v2659_v15  ;;  %2495 = vmatprep.subr.bf16.mxu1 %v3153_v4  ;;  %v2677_v29 = vld [vmem:[#allocation8 + $0x94] ss:$12 sps:$4 sm:$0xff]   ;;  %vm3155_vm0 = vmmov 0   ;;  %v2679_v31 = vld [vmem:[#allocation8 + $0x90] ss:$12 sps:$4 sm:$0xff]   ;;  %vm498_vm1 = vcmask 261120  }
  0xe6   :  { %400 = vmatprep.subr.bf16.mxu0 %v2661_v17  ;;  %2507 = vmatprep.mubr.msk.bf16.mxu1 %vm3155_vm0, %v3153_v4  ;;  %v2680_v32 = vld [vmem:[#allocation8 + $0x98] ss:$12 sps:$4 sm:$0xff]   ;;  %v2683_v34 = vld [vmem:[#allocation8 + $0xa8] ss:$12 sps:$4 sm:$0xff]   ;;  %v2684_v35 = vld [vmem:[#allocation8 + $0xb0] ss:$12 sps:$4 sm:$0xff]  }
  0xe7   :  { %v2681_v33 = vld [vmem:[#allocation8 + $0xac] ss:$12 sps:$4 sm:$0xff]   ;;  %v2267_v44 = vld [vmem:[#allocation5] ss:$0 sm:$0xff]  ;;  %v2268_v48 = vld [vmem:[#allocation7] ss:$0 sm:$0xff] }
  0xe8   :  { %2496 = vmatpush3.bf16.msra.mxu1 %v2664_v19  ;;  %s3156_s11 = smov 96   ;;  %vm615_vm2 = vcmask 1043456   ;;  %vm591_vm3 = vcmask 64512   ;;  %s3157_s22 = smov 32   ;;  %vm1385_vm4 = vcmask 523264   ;;  %vm1388_vm5 = vcmask 785408  }
  0xe9   :  { %401 = vmatpush1.bf16.msra.mxu0 %v2663_v18  ;;  %2497 = vmatprep.subr.bf16.mxu1 %v3153_v4 }
  0xea   :  { %402 = vmatprep.subr.bf16.mxu0 %v2665_v20 }
  0xec   :  { %2498 = vmatpush3.bf16.msra.mxu1 %v2668_v22 }
  0xed   :  { %403 = vmatpush1.bf16.msra.mxu0 %v2667_v21  ;;  %2499 = vmatprep.subr.bf16.mxu1 %v3153_v4 }
  0xee   :  { %404 = vmatprep.subr.bf16.mxu0 %v2669_v23 }
  0xf0   :  { %2500 = vmatpush3.bf16.msra.mxu1 %v2672_v25 }
  0xf1   :  { %405 = vmatpush1.bf16.msra.mxu0 %v2671_v24  ;;  %2501 = vmatprep.subr.bf16.mxu1 %v3153_v4 }
  0xf2   :  { %406 = vmatprep.subr.bf16.mxu0 %v2673_v26 }
  0xf4   :  { %2502 = vmatpush3.bf16.msra.mxu1 %v2676_v28 }
  0xf5   :  { %407 = vmatpush1.bf16.msra.mxu0 %v2675_v27  ;;  %2503 = vmatprep.subr.bf16.mxu1 %v3153_v4 }
  0xf6   :  { %408 = vmatprep.subr.bf16.mxu0 %v2677_v29 }
  0xf8   :  { %2504 = vmatpush3.bf16.msra.mxu1 %v2680_v32 }
  0xf9   :  { %409 = vmatpush1.bf16.msra.mxu0 %v2679_v31  ;;  %2505 = vmatprep.subr.bf16.mxu1 %v3153_v4 }
  0xfa   :  { %410 = vmatprep.subr.bf16.mxu0 %v2681_v33 }
  0xfc   :  { %2506 = vmatpush3.bf16.msra.mxu1 %v2684_v35 }
  0xfd   :  { %411 = vmatpush1.bf16.msra.mxu0 %v2683_v34  ;;  %2511 = vmatprep.subr.bf16.mxu1 %v3153_v4 }
  0xfe   :  { %2535 = vmatprep.subr.bf16.mxu0 %v3153_v4 }
 0x16c   :  { %v195_v7 = vpop.xlane.xlu0 %194 }
 0x16d   :  { %v199_v8 = vmul.f32 0.0078125, %v195_v7 }
 0x16f   :  { %v3407_v9 = vsub.f32 %v192_v0, %v199_v8 }
 0x170   :  { %v197_v10 = vpop.xlane.xlu0 %196 }
 0x171   :  { %v200_v11 = vmul.f32 0.0078125, %v197_v10  ;;  %v203_v12 = vmul.f32 %v3407_v9, %v3407_v9 }
 0x173   :  { %v3411_v13 = vsub.f32 %v193_v1, %v200_v11  ;;  %205 = vadd.xlane.f32.xlu1 %v203_v12 }
 0x175   :  { %v204_v14 = vmul.f32 %v3411_v13, %v3411_v13 }
 0x177   :  { %207 = vadd.xlane.f32.xlu1 %v204_v14 }
 0x200   :  { %v206_v36 = vpop.xlane.xlu1 %205 }
 0x201   :  { %v209_v37 = vmul.f32 0.0078125, %v206_v36 }
 0x203   :  { %v211_v38 = vadd.f32 1e-05, %v209_v37 }
 0x204   :  { %v208_v39 = vpop.xlane.xlu1 %207 }
 0x205   :  { %2773 = vrsqrt.f32 %v211_v38  ;;  %v210_v40 = vmul.f32 0.0078125, %v208_v39 }
 0x207   :  { %v212_v41 = vadd.f32 1e-05, %v210_v40 }
 0x209   :  { %2775 = vrsqrt.f32 %v212_v41 }
 0x20f   :  { %v2774_v42 = vpop.eup %2773 }
 0x210   :  { %v215_v43 = vmul.f32 %v2774_v42, %v3407_v9 }
 0x212   :  { %v224_v47 = vmul.f32 %v2267_v44, %v215_v43 }
 0x213   :  { %v2776_v45 = vpop.eup %2775 }
 0x214   :  { %v216_v46 = vmul.f32 %v2776_v45, %v3411_v13  ;;  %v3428_v50 = vadd.f32 %v2268_v48, %v224_v47 }
 0x216   :  { %v225_v49 = vmul.f32 %v2267_v44, %v216_v46 }
 0x218   :  { %v3430_v51 = vadd.f32 %v2268_v48, %v225_v49 }
 0x21a   :  { %v235_v52 = vpack.c.bf16 %v3430_v51, %v3428_v50 }
 0x21c   :  { %429 = vmatmul.mubr.bf16.vlgmr.msra.gmra.mrb[0].mxu0 %v235_v52  ;;  %2508 = vmatmul.mubr.bf16.vlgmr.msra.gmra.mrb[0].mxu1 %v235_v52 }
 0x21d   :  { %2513 = vmatprep.mubr.msk.bf16.mxu1 %vm3155_vm0, %v3153_v4  ;;  %2537 = vmatprep.mubr.msk.bf16.mxu0 %vm3155_vm0, %v3153_v4 }
 0x2ef   :  { %v430_v53 = vpop.f32.mrb[0].mxu0  ;;  %v473_v54 = vpop.f32.mrb[0].mxu1 }
 0x2f0   :  { %v432_v55 = vpop.f32.mrb[1].mxu0  ;;  %v2509_v56 = vpop.f32.mrb[1].mxu1  ;;  %v3447_v0 = vpack.c.bf16 %v430_v53, %v430_v53  ;;  %v3456_v2 = vpack.c.bf16 %v473_v54, %v473_v54 }
 0x2f1   :  { %v3438_v57 = vpack.c.bf16 %v432_v55, %v432_v55  ;;  %v434_v58 = vpop.f32.mrb[2].mxu0  ;;  %v476_v59 = vpop.f32.mrb[2].mxu1 }
 0x2f2   :  { %v436_v60 = vpop.f32.mrb[3].mxu0  ;;  %v2510_v61 = vpop.f32.mrb[3].mxu1  ;;  %v3458_v3 = vpack.c.bf16 %v434_v58, %v434_v58  ;;  %v617_v5 = vsel %vm615_vm2, %v3456_v2, 0  ;;  %v3477_v16 = vpack.c.bf16 %v476_v59, %v476_v59 }
 0x2f3   :  { %v3440_v62 = vpack.c.bf16 %v436_v60, %v436_v60  ;;  %v503_v63 = vsel %vm498_vm1, %v3438_v57, 0 }
 0x2f4   :  { %2512 = vmatpush3.bf16.xpose.msra.mxu1 %v503_v63  ;;  %v663_v32 = vsel %vm615_vm2, %v3477_v16, 0 }
 0x2f5   :  { %762 = vrot.lane.b32.xlu1 %v3440_v62, %s3156_s11  ;;  %2517 = vmatprep.subr.bf16.mxu1 %v3153_v4  ;;  %v549_v1 = vsel %vm498_vm1, %v3440_v62, 0 }
 0x2fb   :  { %2514 = vmatmul.mubr.msk.bf16.vlgmr.msra.gmra.mrb[4].mxu1 %vm498_vm1, %v3447_v0 }
 0x2fc   :  { %2518 = vmatpush3.bf16.xpose.msra.mxu1 %v549_v1  ;;  %2519 = vmatprep.mubr.msk.bf16.mxu1 %vm3155_vm0, %v3153_v4 }
 0x2fd   :  { %2523 = vmatprep.subr.bf16.mxu1 %v3153_v4 }
 0x303   :  { %2520 = vmatmul.mubr.msk.bf16.vlgmr.msra.gmra.mrb[8].mxu1 %vm498_vm1, %v3458_v3 }
 0x304   :  { %2524 = vmatpush3.bf16.msra.mxu1 %v617_v5  ;;  %2525 = vmatprep.mubr.msk.bf16.mxu1 %vm3155_vm0, %v3153_v4 }
 0x305   :  { %2529 = vmatprep.subr.bf16.mxu1 %v3153_v4 }
 0x367   :  { %v763_v20 = vpop.permute.xlu1 %762 }
 0x368   :  { %v768_v36 = vsel %vm498_vm1, %v763_v20, 0 }
 0x3ce   :  { %v539_v6 = vpop.f32.mrb[4].mxu1 }
 0x3cf   :  { %v2515_v7 = vpop.f32.mrb[5].mxu1  ;;  %v592_v8 = vsel %vm591_vm3, %v539_v6, -inf }
 0x3d0   :  { %593 = vmax.xlane.f32.xlu0 %v592_v8  ;;  %v542_v9 = vpop.f32.mrb[6].mxu1 }
 0x3d1   :  { %v2516_v10 = vpop.f32.mrb[7].mxu1 }
 0x3d6   :  { %v585_v11 = vpop.f32.mrb[8].mxu1 }
 0x3d7   :  { %v2521_v12 = vpop.f32.mrb[9].mxu1  ;;  %v595_v13 = vsel %vm591_vm3, %v585_v11, -inf }
 0x3d8   :  { %596 = vmax.xlane.f32.xlu1 %v595_v13  ;;  %v588_v14 = vpop.f32.mrb[10].mxu1 }
 0x3d9   :  { %v2522_v15 = vpop.f32.mrb[11].mxu1 }
 0x3e6   :  { %712 = vrot.lane.b32.xlu0 %v3438_v57, %s3156_s11 }
 0x3e9   :  { %710 = vrot.lane.b32.xlu1 %v3447_v0, %s3156_s11 }
 0x3ea   :  { %830 = vrot.lane.b32.xlu0 %v3456_v2, %s3156_s11 }
 0x3ed   :  { %760 = vrot.lane.b32.xlu1 %v3458_v3, %s3156_s11 }
 0x3f1   :  { %878 = vrot.lane.b32.xlu1 %v3477_v16, %s3156_s11 }
 0x45d   :  { %v594_v17 = vpop.xlane.xlu0 %593 }
 0x45e   :  { %v598_v18 = vsub.f32 %v539_v6, %v594_v17 }
 0x460   :  { %v600_v19 = vmul.f32 1.442695, %v598_v18 }
 0x461   :  { %v713_v21 = vpop.permute.xlu0 %712 }
 0x462   :  { %2777 = vpow2.f32 %v600_v19  ;;  %v718_v22 = vsel %vm498_vm1, %v713_v21, 0 }
 0x463   :  { %2536 = vmatpush3.bf16.xpose.msra.mxu0 %v718_v22 }
 0x464   :  { %2547 = vmatprep.subr.bf16.mxu0 %v3153_v4 }
 0x465   :  { %v597_v23 = vpop.xlane.xlu1 %596  ;;  %v831_v25 = vpop.permute.xlu0 %830 }
 0x466   :  { %v599_v24 = vsub.f32 %v585_v11, %v597_v23  ;;  %v836_v28 = vsel %vm615_vm2, %v831_v25, 0 }
 0x468   :  { %v602_v26 = vmul.f32 1.442695, %v599_v24 }
 0x469   :  { %v711_v27 = vpop.permute.xlu1 %710 }
 0x46a   :  { %2779 = vpow2.f32 %v602_v26  ;;  %2538 = vmatmul.mubr.msk.bf16.vlgmr.msra.gmra.mrb[4].mxu0 %vm498_vm1, %v711_v27 }
 0x46b   :  { %2548 = vmatpush3.bf16.msra.mxu0 %v836_v28  ;;  %2549 = vmatprep.mubr.msk.bf16.mxu0 %vm3155_vm0, %v3153_v4 }
 0x46c   :  { %v3487_v29 = vpop.eup %2777  ;;  %2559 = vmatprep.subr.bf16.mxu0 %v3153_v4 }
 0x46d   :  { %v610_v31 = vpack.c.bf16 %v3487_v29, %v3487_v29  ;;  %v761_v35 = vpop.permute.xlu1 %760 }
 0x46f   :  { %2526 = vmatmul.mubr.msk.bf16.vlgmr.msra.gmra.mrb[12].mxu1 %vm591_vm3, %v610_v31 }
 0x470   :  { %2530 = vmatpush3.bf16.msra.mxu1 %v663_v32  ;;  %2531 = vmatprep.mubr.msk.bf16.mxu1 %vm3155_vm0, %v3153_v4 }
 0x471   :  { %2541 = vmatprep.subr.bf16.mxu1 %v3153_v4  ;;  %v879_v37 = vpop.permute.xlu1 %878 }
 0x472   :  { %v884_v38 = vsel %vm615_vm2, %v879_v37, 0 }
 0x474   :  { %v3498_v33 = vpop.eup %2779 }
 0x475   :  { %v611_v34 = vpack.c.bf16 %v3498_v33, %v3498_v33 }
 0x477   :  { %2532 = vmatmul.mubr.msk.bf16.vlgmr.msra.gmra.mrb[16].mxu1 %vm591_vm3, %v611_v34 }
 0x478   :  { %2543 = vmatprep.mubr.msk.bf16.mxu1 %vm3155_vm0, %v3153_v4 }
 0x479   :  { %2542 = vmatpush3.bf16.xpose.msra.mxu1 %v768_v36 }
 0x47a   :  { %2553 = vmatprep.subr.bf16.mxu1 %v3153_v4 }
 0x480   :  { %2544 = vmatmul.mubr.msk.bf16.vlgmr.msra.gmra.mrb[20].mxu1 %vm498_vm1, %v761_v35 }
 0x481   :  { %2554 = vmatpush3.bf16.msra.mxu1 %v884_v38  ;;  %2555 = vmatprep.mubr.msk.bf16.mxu1 %vm3155_vm0, %v3153_v4 }
 0x482   :  { %2565 = vmatprep.subr.bf16.mxu1 %v3153_v4 }
 0x53d   :  { %v754_v39 = vpop.f32.mrb[4].mxu0 }
 0x53e   :  { %v2539_v40 = vpop.f32.mrb[5].mxu0  ;;  %v810_v41 = vsel %vm591_vm3, %v754_v39, -inf }
 0x53f   :  { %811 = vmax.xlane.f32.xlu0 %v810_v41  ;;  %v757_v42 = vpop.f32.mrb[6].mxu0 }
 0x540   :  { %v2540_v43 = vpop.f32.mrb[7].mxu0 }
 0x542   :  { %v3513_v44 = vpop.f32.mrb[12].mxu1 }
 0x543   :  { %v2527_v45 = vpop.f32.mrb[13].mxu1 }
 0x544   :  { %v656_v46 = vpop.f32.mrb[14].mxu1 }
 0x545   :  { %v2528_v47 = vpop.f32.mrb[15].mxu1 }
 0x54a   :  { %v3515_v48 = vpop.f32.mrb[16].mxu1 }
 0x54b   :  { %v2533_v49 = vpop.f32.mrb[17].mxu1 }
 0x54c   :  { %v702_v52 = vpop.f32.mrb[18].mxu1 }
 0x54d   :  { %v2534_v53 = vpop.f32.mrb[19].mxu1 }
 0x553   :  { %v804_v54 = vpop.f32.mrb[20].mxu1 }
 0x554   :  { %v2545_v55 = vpop.f32.mrb[21].mxu1  ;;  %v813_v56 = vsel %vm591_vm3, %v804_v54, -inf }
 0x555   :  { %814 = vmax.xlane.f32.xlu1 %v813_v56  ;;  %v807_v58 = vpop.f32.mrb[22].mxu1  ;;  %933 = vrot.lane.b32.xlu0 %v3438_v57, %s3145_s2 }
 0x556   :  { %v2546_v59 = vpop.f32.mrb[23].mxu1 }
 0x559   :  { %931 = vrot.lane.b32.xlu0 %v3447_v0, %s3145_s2 }
 0x55d   :  { %1051 = vrot.lane.b32.xlu0 %v3456_v2, %s3145_s2 }
 0x566   :  { %983 = vrot.lane.b32.xlu1 %v3440_v62, %s3145_s2 }
 0x56a   :  { %981 = vrot.lane.b32.xlu1 %v3458_v3, %s3145_s2 }
 0x56e   :  { %1099 = vrot.lane.b32.xlu1 %v3477_v16, %s3145_s2 }
 0x5cc   :  { %v812_v60 = vpop.xlane.xlu0 %811 }
 0x5cd   :  { %v816_v61 = vsub.f32 %v754_v39, %v812_v60 }
 0x5cf   :  { %v818_v63 = vmul.f32 1.442695, %v816_v61 }
 0x5d0   :  { %v934_v1 = vpop.permute.xlu0 %933 }
 0x5d1   :  { %2781 = vpow2.f32 %v818_v63  ;;  %v939_v8 = vsel %vm498_vm1, %v934_v1, 0 }
 0x5d4   :  { %v932_v7 = vpop.permute.xlu0 %931 }
 0x5d8   :  { %v1052_v10 = vpop.permute.xlu0 %1051 }
 0x5d9   :  { %v1057_v13 = vsel %vm615_vm2, %v1052_v10, 0 }
 0x5db   :  { %v3530_v5 = vpop.eup %2781 }
 0x5dc   :  { %v828_v6 = vpack.c.bf16 %v3530_v5, %v3530_v5 }
 0x5de   :  { %2550 = vmatmul.mubr.msk.bf16.vlgmr.msra.gmra.mrb[8].mxu0 %vm591_vm3, %v828_v6 }
 0x5df   :  { %2560 = vmatpush3.bf16.xpose.msra.mxu0 %v939_v8  ;;  %2561 = vmatprep.mubr.msk.bf16.mxu0 %vm3155_vm0, %v3153_v4 }
 0x5e0   :  { %2571 = vmatprep.subr.bf16.mxu0 %v3153_v4 }
 0x5e2   :  { %v815_v9 = vpop.xlane.xlu1 %814 }
 0x5e3   :  { %v817_v11 = vsub.f32 %v804_v54, %v815_v9 }
 0x5e5   :  { %v820_v12 = vmul.f32 1.442695, %v817_v11 }
 0x5e6   :  { %2562 = vmatmul.mubr.msk.bf16.vlgmr.msra.gmra.mrb[12].mxu0 %vm498_vm1, %v932_v7  ;;  %v984_v14 = vpop.permute.xlu1 %983 }
 0x5e7   :  { %2783 = vpow2.f32 %v820_v12  ;;  %2572 = vmatpush3.bf16.msra.mxu0 %v1057_v13  ;;  %2573 = vmatprep.mubr.msk.bf16.mxu0 %vm3155_vm0, %v3153_v4  ;;  %v989_v19 = vsel %vm498_vm1, %v984_v14, 0 }
 0x5e8   :  { %2583 = vmatprep.subr.bf16.mxu0 %v3153_v4 }
 0x5ea   :  { %v982_v18 = vpop.permute.xlu1 %981 }
 0x5ee   :  { %v1100_v20 = vpop.permute.xlu1 %1099 }
 0x5ef   :  { %v1105_v21 = vsel %vm615_vm2, %v1100_v20, 0 }
 0x5f1   :  { %v3544_v15 = vpop.eup %2783 }
 0x5f2   :  { %v829_v17 = vpack.c.bf16 %v3544_v15, %v3544_v15 }
 0x5f4   :  { %2556 = vmatmul.mubr.msk.bf16.vlgmr.msra.gmra.mrb[24].mxu1 %vm591_vm3, %v829_v17 }
 0x5f5   :  { %2566 = vmatpush3.bf16.xpose.msra.mxu1 %v989_v19  ;;  %2567 = vmatprep.mubr.msk.bf16.mxu1 %vm3155_vm0, %v3153_v4 }
 0x5f6   :  { %2577 = vmatprep.subr.bf16.mxu1 %v3153_v4 }
 0x5fc   :  { %2568 = vmatmul.mubr.msk.bf16.vlgmr.msra.gmra.mrb[28].mxu1 %vm498_vm1, %v982_v18 }
 0x5fd   :  { %2578 = vmatpush3.bf16.msra.mxu1 %v1105_v21  ;;  %2579 = vmatprep.mubr.msk.bf16.mxu1 %vm3155_vm0, %v3153_v4 }
 0x5fe   :  { %2589 = vmatprep.subr.bf16.mxu1 %v3153_v4 }
 0x6b1   :  { %v3558_v22 = vpop.f32.mrb[8].mxu0 }
 0x6b2   :  { %v2551_v23 = vpop.f32.mrb[9].mxu0 }
 0x6b3   :  { %v875_v24 = vpop.f32.mrb[10].mxu0  ;;  %v822_v23 = vsel %vm591_vm3, %v3530_v5, 0.0 }
 0x6b4   :  { %v2552_v25 = vpop.f32.mrb[11].mxu0 }
 0x6b9   :  { %v975_v26 = vpop.f32.mrb[12].mxu0 }
 0x6ba   :  { %v2563_v27 = vpop.f32.mrb[13].mxu0  ;;  %v1031_v28 = vsel %vm591_vm3, %v975_v26, -inf }
 0x6bb   :  { %1032 = vmax.xlane.f32.xlu0 %v1031_v28  ;;  %v978_v31 = vpop.f32.mrb[14].mxu0 }
 0x6bc   :  { %v2564_v32 = vpop.f32.mrb[15].mxu0 }
 0x6c7   :  { %v3561_v34 = vpop.f32.mrb[24].mxu1 }
 0x6c8   :  { %v2557_v35 = vpop.f32.mrb[25].mxu1 }
 0x6c9   :  { %v923_v36 = vpop.f32.mrb[26].mxu1 }
 0x6ca   :  { %v2558_v37 = vpop.f32.mrb[27].mxu1 }
 0x6cf   :  { %v1025_v38 = vpop.f32.mrb[28].mxu1 }
 0x6d0   :  { %v2569_v39 = vpop.f32.mrb[29].mxu1  ;;  %v1034_v40 = vsel %vm591_vm3, %v1025_v38, -inf }
 0x6d1   :  { %1035 = vmax.xlane.f32.xlu1 %v1034_v40  ;;  %v1028_v41 = vpop.f32.mrb[30].mxu1  ;;  %1154 = vrot.lane.b32.xlu0 %v3438_v57, %s3157_s22 }
 0x6d2   :  { %v2570_v42 = vpop.f32.mrb[31].mxu1 }
 0x6d5   :  { %1152 = vrot.lane.b32.xlu0 %v3447_v0, %s3157_s22 }
 0x6e2   :  { %1204 = vrot.lane.b32.xlu1 %v3440_v62, %s3157_s22 }
 0x6e6   :  { %1202 = vrot.lane.b32.xlu1 %v3458_v3, %s3157_s22 }
 0x748   :  { %v1033_v43 = vpop.xlane.xlu0 %1032 }
 0x749   :  { %v1037_v45 = vsub.f32 %v975_v26, %v1033_v43  ;;  %v825_v26 = vsel %vm591_vm3, %v3544_v15, 0.0  ;;  %v604_v15 = vsel %vm591_vm3, %v3487_v29, 0.0  ;;  %v607_v29 = vsel %vm591_vm3, %v3498_v33, 0.0 }
 0x74b   :  { %v1039_v46 = vmul.f32 1.442695, %v1037_v45 }
 0x74c   :  { %v1155_v49 = vpop.permute.xlu0 %1154 }
 0x74d   :  { %2785 = vpow2.f32 %v1039_v46  ;;  %v1160_v53 = vsel %vm498_vm1, %v1155_v49, 0 }
 0x750   :  { %v1153_v0 = vpop.permute.xlu0 %1152 }
 0x757   :  { %v2786_v47 = vpop.eup %2785 }
 0x758   :  { %v1049_v52 = vpack.c.bf16 %v2786_v47, %v2786_v47  ;;  %v1043_v24 = vsel %vm591_vm3, %v2786_v47, 0.0 }
 0x75a   :  { %2574 = vmatmul.mubr.msk.bf16.vlgmr.msra.gmra.mrb[16].mxu0 %vm591_vm3, %v1049_v52 }
 0x75b   :  { %2584 = vmatpush3.bf16.xpose.msra.mxu0 %v1160_v53  ;;  %2585 = vmatprep.mubr.msk.bf16.mxu0 %vm3155_vm0, %v3153_v4 }
 0x75c   :  { %2595 = vmatprep.subr.bf16.mxu0 %v3153_v4 }
 0x75e   :  { %v1036_v57 = vpop.xlane.xlu1 %1035 }
 0x75f   :  { %v1038_v62 = vsub.f32 %v1025_v38, %v1036_v57 }
 0x761   :  { %v1041_v3 = vmul.f32 1.442695, %v1038_v62 }
 0x762   :  { %2586 = vmatmul.mubr.msk.bf16.vlgmr.msra.gmra.mrb[20].mxu0 %vm498_vm1, %v1153_v0  ;;  %v1205_v55 = vpop.permute.xlu1 %1204 }
 0x763   :  { %2787 = vpow2.f32 %v1041_v3  ;;  %2597 = vmatprep.mubr.msk.bf16.mxu0 %vm3155_vm0, %v3153_v4  ;;  %v1210_v58 = vsel %vm498_vm1, %v1205_v55, 0 }
 0x766   :  { %v1203_v59 = vpop.permute.xlu1 %1202 }
 0x76d   :  { %v2788_v54 = vpop.eup %2787 }
 0x76e   :  { %v1050_v56 = vpack.c.bf16 %v2788_v54, %v2788_v54  ;;  %v1046_v25 = vsel %vm591_vm3, %v2788_v54, 0.0 }
 0x770   :  { %2580 = vmatmul.mubr.msk.bf16.vlgmr.msra.gmra.mrb[32].mxu1 %vm591_vm3, %v1050_v56 }
 0x771   :  { %2590 = vmatpush3.bf16.xpose.msra.mxu1 %v1210_v58  ;;  %2591 = vmatprep.mubr.msk.bf16.mxu1 %vm3155_vm0, %v3153_v4  ;;  %v2685_v58 = vld [vmem:[#allocation10] sm:$0xff]  }
 0x772   :  { %2601 = vmatprep.subr.bf16.mxu1 %v3153_v4 }
 0x778   :  { %2592 = vmatmul.mubr.msk.bf16.vlgmr.msra.gmra.mrb[36].mxu1 %vm498_vm1, %v1203_v59  ;;  %v2686_v59 = vld [vmem:[#allocation10 + $0x8] sm:$0xff]  }
 0x779   :  { %2603 = vmatprep.mubr.msk.bf16.mxu1 %vm3155_vm0, %v3153_v4 }
 0x82d   :  { %v3588_v60 = vpop.f32.mrb[16].mxu0 }
 0x82e   :  { %v2575_v61 = vpop.f32.mrb[17].mxu0 }
 0x82f   :  { %v1096_v63 = vpop.f32.mrb[18].mxu0  ;;  %v2688_v61 = vld [vmem:[#allocation10 + $0x18] sm:$0xff]  }
 0x830   :  { %v2576_v1 = vpop.f32.mrb[19].mxu0  ;;  %v2691_v63 = vld [vmem:[#allocation10 + $0x30] sm:$0xff]  }
 0x831   :  { %v2692_v1 = vld [vmem:[#allocation10 + $0x38] sm:$0xff]  }
 0x835   :  { %v1196_v6 = vpop.f32.mrb[20].mxu0 }
 0x836   :  { %v2587_v7 = vpop.f32.mrb[21].mxu0  ;;  %v1252_v8 = vsel %vm591_vm3, %v1196_v6, -inf }
 0x837   :  { %1253 = vmax.xlane.f32.xlu0 %v1252_v8  ;;  %v1199_v9 = vpop.f32.mrb[22].mxu0 }
 0x838   :  { %v2588_v10 = vpop.f32.mrb[23].mxu0 }
 0x843   :  { %v1141_v11 = vpop.f32.mrb[32].mxu1 }
 0x844   :  { %v2581_v12 = vpop.f32.mrb[33].mxu1 }
 0x845   :  { %v1144_v13 = vpop.f32.mrb[34].mxu1 }
 0x846   :  { %v2582_v14 = vpop.f32.mrb[35].mxu1 }
 0x84b   :  { %v1246_v17 = vpop.f32.mrb[36].mxu1 }
 0x84c   :  { %v2593_v18 = vpop.f32.mrb[37].mxu1  ;;  %v1255_v19 = vsel %vm591_vm3, %v1246_v17, -inf }
 0x84d   :  { %1256 = vmax.xlane.f32.xlu1 %v1255_v19  ;;  %v1249_v20 = vpop.f32.mrb[38].mxu1  ;;  %1272 = vrot.lane.b32.xlu0 %v3456_v2, %s3157_s22 }
 0x84e   :  { %v2594_v21 = vpop.f32.mrb[39].mxu1 }
 0x85e   :  { %1320 = vrot.lane.b32.xlu1 %v3477_v16, %s3157_s22 }
 0x86c   :  { %823 = vadd.xlane.f32.xlu0 %v822_v23 }
 0x870   :  { %1044 = vadd.xlane.f32.xlu0 %v1043_v24 }
 0x874   :  { %1047 = vadd.xlane.f32.xlu0 %v1046_v25 }
 0x882   :  { %826 = vadd.xlane.f32.xlu1 %v825_v26 }
 0x8c4   :  { %v1254_v27 = vpop.xlane.xlu0 %1253 }
 0x8c5   :  { %v1258_v2 = vsub.f32 %v1196_v6, %v1254_v27 }
 0x8c7   :  { %v1260_v28 = vmul.f32 1.442695, %v1258_v2 }
 0x8c8   :  { %v1273_v31 = vpop.permute.xlu0 %1272 }
 0x8c9   :  { %2789 = vpow2.f32 %v1260_v28  ;;  %v1278_v16 = vsel %vm615_vm2, %v1273_v31, 0 }
 0x8ca   :  { %2596 = vmatpush3.bf16.msra.mxu0 %v1278_v16 }
 0x8cb   :  { %2607 = vmatprep.subr.bf16.mxu0 %v3153_v4 }
 0x8d3   :  { %v2790_v5 = vpop.eup %2789 }
 0x8d4   :  { %v1264_v32 = vsel %vm591_vm3, %v2790_v5, 0.0  ;;  %v1270_v35 = vpack.c.bf16 %v2790_v5, %v2790_v5 }
 0x8d5   :  { %1265 = vadd.xlane.f32.xlu0 %v1264_v32 }
 0x8d6   :  { %2598 = vmatmul.mubr.msk.bf16.vlgmr.msra.gmra.mrb[24].mxu0 %vm591_vm3, %v1270_v35  ;;  %v2315_v35 = vld [vmem:[#allocation11] ss:$0 sm:$0xff] }
 0x8d7   :  { %2623 = vmatprep.mubr.msk.bf16.mxu0 %vm3155_vm0, %v3153_v4  ;;  %2608 = vmatpush3.bf16.msra.mxu0 %v2685_v58 }
 0x8d8   :  { %2609 = vmatprep.subr.bf16.mxu0 %v3153_v4 }
 0x8d9   :  { %605 = vadd.xlane.f32.xlu0 %v604_v15 }
 0x8da   :  { %v1257_v36 = vpop.xlane.xlu1 %1256 }
 0x8db   :  { %v1259_v37 = vsub.f32 %v1246_v17, %v1257_v36  ;;  %2610 = vmatpush3.bf16.msra.mxu0 %v2686_v59 }
 0x8dc   :  { %2611 = vmatprep.subr.bf16.mxu0 %v3153_v4 }
 0x8dd   :  { %v1262_v38 = vmul.f32 1.442695, %v1259_v37  ;;  %v1504_v37 = vmul.f32 0.4, %v3428_v50  ;;  %v2695_v50 = vld [vmem:[#allocation16 + $0x4] ss:$16 sps:$4 sm:$0xff]  }
 0x8de   :  { %v1321_v39 = vpop.permute.xlu1 %1320 }
 0x8df   :  { %2791 = vpow2.f32 %v1262_v38  ;;  %v1326_v40 = vsel %vm615_vm2, %v1321_v39, 0 }
 0x8e0   :  { %2602 = vmatpush3.bf16.msra.mxu1 %v1326_v40 }
 0x8e1   :  { %1765 = vmatprep.subr.bf16.mxu1 %v2695_v50  ;;  %v2747_v50 = vld [vmem:[#allocation19 + $0x8] sm:$0xff]  }
 0x8e9   :  { %v2792_v41 = vpop.eup %2791 }
 0x8ea   :  { %v1267_v42 = vsel %vm591_vm3, %v2792_v41, 0.0  ;;  %v1271_v43 = vpack.c.bf16 %v2792_v41, %v2792_v41 }
 0x8eb   :  { %1268 = vadd.xlane.f32.xlu1 %v1267_v42  ;;  %v1505_v42 = vmul.f32 0.4, %v3430_v51  ;;  %v2699_v51 = vld [vmem:[#allocation16 + $0x20] ss:$16 sps:$4 sm:$0xff]  }
 0x8ec   :  { %2604 = vmatmul.mubr.msk.bf16.vlgmr.msra.gmra.mrb[40].mxu1 %vm591_vm3, %v1271_v43 }
 0x8ed   :  { %1797 = vmatprep.mubr.bf16.mxu1 %v3154_v30 }
 0x8ef   :  { %608 = vadd.xlane.f32.xlu1 %v607_v29 }
 0x8f9   :  { %v824_v45 = vpop.xlane.xlu0 %823 }
 0x8fd   :  { %v1045_v46 = vpop.xlane.xlu0 %1044 }
 0x8fe   :  { %2793 = vrcp.f32 %v1045_v46 }
 0x901   :  { %v1048_v47 = vpop.xlane.xlu0 %1047 }
 0x902   :  { %2795 = vrcp.f32 %v1048_v47  ;;  %v2830_v47 = vld [vmem:[#allocation2 + $0x8] sm:$0xff] }
 0x903   :  { %2797 = vrcp.f32 %v824_v45  ;;  %v2829_v45 = vld [vmem:[#allocation2] sm:$0xff] }
 0x908   :  { %v2794_v49 = vpop.eup %2793 }
 0x909   :  { %v1149_v53 = vmul.f32 %v2794_v49, %v3588_v60  ;;  %v2687_v60 = vld [vmem:[#allocation10 + $0x10] sm:$0xff]  }
 0x90a   :  { %2612 = vmatpush3.bf16.msra.mxu0 %v2687_v60  ;;  %v2693_v49 = vld [vmem:[#allocation16] ss:$16 sps:$4 sm:$0xff]  }
 0x90b   :  { %2613 = vmatprep.subr.bf16.mxu0 %v3153_v4  ;;  %1766 = vmatpush1.bf16.msra.mxu1 %v2693_v49  ;;  %v2746_v49 = vld [vmem:[#allocation19 + $0xc8] sm:$0xff]  }
 0x90c   :  { %v2796_v52 = vpop.eup %2795 }
 0x90d   :  { %v1150_v57 = vmul.f32 %v2796_v52, %v1141_v11  ;;  %v2798_v3 = vpop.eup %2797  ;;  %v2696_v52 = vld [vmem:[#allocation16 + $0x8] ss:$16 sps:$4 sm:$0xff]  }
 0x90e   :  { %v928_v33 = vmul.f32 %v2798_v3, %v3558_v22  ;;  %2614 = vmatpush3.bf16.msra.mxu0 %v2688_v61  ;;  %v2689_v22 = vld [vmem:[#allocation10 + $0x20] sm:$0xff]   ;;  %v2707_v61 = vld [vmem:[#allocation16 + $0x44] ss:$16 sps:$4 sm:$0xff]  }
 0x90f   :  { %v827_v62 = vpop.xlane.xlu1 %826  ;;  %v1151_v0 = vpack.c.bf16 %v1150_v57, %v1149_v53  ;;  %2615 = vmatprep.subr.bf16.mxu0 %v3153_v4  ;;  %v2698_v53 = vld [vmem:[#allocation16 + $0xc] ss:$16 sps:$4 sm:$0xff]   ;;  %v2701_v57 = vld [vmem:[#allocation16 + $0x24] ss:$16 sps:$4 sm:$0xff]  }
 0x910   :  { %2799 = vrcp.f32 %v827_v62  ;;  %v2704_v62 = vld [vmem:[#allocation16 + $0x2c] ss:$16 sps:$4 sm:$0xff]   ;;  %1767 = vmatprep.subr.bf16.mxu1 %v2701_v57  ;;  %v2750_v57 = vld [vmem:[#allocation19 + $0xd0] sm:$0xff]  }
 0x911   :  { %1377 = vrot.lane.b32.xlu1 %v1151_v0, %s3145_s2  ;;  %v2702_v0 = vld [vmem:[#allocation16 + $0x28] ss:$16 sps:$4 sm:$0xff]   ;;  %1768 = vmatpush1.bf16.msra.mxu1 %v2699_v51  ;;  %s3158_s2 = smov [#allocation22]  }
 0x912   :  { %2616 = vmatpush3.bf16.msra.mxu0 %v2689_v22  ;;  %v2710_v22 = vld [vmem:[#allocation16 + $0x4c] ss:$16 sps:$4 sm:$0xff]   ;;  %1769 = vmatprep.subr.bf16.mxu1 %v2707_v61  ;;  %v2752_v51 = vld [vmem:[#allocation19 + $0x90] sm:$0xff]   ;;  %s2249_s28 = sshll.u32 %s3158_s2, 4  ;;  %s2250_s28 = int_to_ptr.vmem [resolvable:$true] %s2249_s28 }
 0x913   :  { %2617 = vmatprep.subr.bf16.mxu0 %v3153_v4  ;;  %v2762_v61 = vld [vmem:[#allocation19 + $0xe8] sm:$0xff]   ;;  %s3095_s0 = scalar_lea.vmem %s2250_s28, 256  ;;  %p3100_p13 = scmp.lt.s32.totalorder %s2250_s28, %s2250_s28 }
 0x914   :  { %p3096_p12 = scmp.ne.s32.totalorder %s2250_s28, %s3095_s0  ;;  %p3101_p0 = scmp.lt.s32.totalorder %s3095_s0, %s3095_s0 }
 0x916   :  { %p3102_p1 = por %p3101_p0, %p3100_p13 }
 0x918   :  { %p3103_p2 = pnand %p3102_p1, %p3096_p12 }
 0x91a   :  { %v2800_v54 = vpop.eup %2799 }
 0x91b   :  { %v929_v55 = vmul.f32 %v2800_v54, %v3561_v34  ;;  %v2690_v34 = vld [vmem:[#allocation10 + $0x28] sm:$0xff]  }
 0x91c   :  { %2618 = vmatpush3.bf16.msra.mxu0 %v2690_v34  ;;  %v2705_v34 = vld [vmem:[#allocation16 + $0x40] ss:$16 sps:$4 sm:$0xff]  }
 0x91d   :  { %v930_v56 = vpack.c.bf16 %v929_v55, %v928_v33  ;;  %2619 = vmatprep.subr.bf16.mxu0 %v3153_v4  ;;  %1770 = vmatpush1.bf16.msra.mxu1 %v2705_v34  ;;  %v2764_v34 = vld [vmem:[#allocation19 + $0xa8] sm:$0xff]  }
 0x91f   :  { %1374 = vrot.lane.b32.xlu0 %v930_v56, %s3157_s22 }
 0x920   :  { %2620 = vmatpush3.bf16.msra.mxu0 %v2691_v63  ;;  %v2708_v63 = vld [vmem:[#allocation16 + $0x48] ss:$16 sps:$4 sm:$0xff]  }
 0x921   :  { %2621 = vmatprep.subr.bf16.mxu0 %v3153_v4 }
 0x924   :  { %2622 = vmatpush3.bf16.msra.mxu0 %v2692_v1  ;;  %v2713_v1 = vld [vmem:[#allocation16 + $0x64] ss:$16 sps:$4 sm:$0xff]  }
 0x925   :  { %1808 = vmatprep.subr.bf16.mxu0 %v2698_v53  ;;  %1771 = vmatprep.subr.bf16.mxu1 %v2713_v1  ;;  %v2749_v53 = vld [vmem:[#allocation19 + $0x50] sm:$0xff]  }
 0x926   :  { %v2766_v1 = vld [vmem:[#allocation19 + $0xf0] sm:$0xff]  }
 0x962   :  { %v1266_v6 = vpop.xlane.xlu0 %1265 }
 0x966   :  { %v606_v7 = vpop.xlane.xlu0 %605 }
 0x967   :  { %2801 = vrcp.f32 %v606_v7  ;;  %v2711_v7 = vld [vmem:[#allocation16 + $0x60] ss:$16 sps:$4 sm:$0xff]  }
 0x968   :  { %1772 = vmatpush1.bf16.msra.mxu1 %v2711_v7  ;;  %v2768_v7 = vld [vmem:[#allocation19 + $0xb0] sm:$0xff]  }
 0x971   :  { %v2802_v10 = vpop.eup %2801 }
 0x972   :  { %v707_v12 = vmul.f32 %v2802_v10, %v3513_v44  ;;  %v2722_v10 = vld [vmem:[#allocation16 + $0x8c] ss:$16 sps:$4 sm:$0xff]  }
 0x978   :  { %v1269_v8 = vpop.xlane.xlu1 %1268 }
 0x97c   :  { %v609_v9 = vpop.xlane.xlu1 %608 }
 0x97d   :  { %2803 = vrcp.f32 %v609_v9  ;;  %v2719_v9 = vld [vmem:[#allocation16 + $0x84] ss:$16 sps:$4 sm:$0xff]  }
 0x97e   :  { %2805 = vrcp.f32 %v1266_v6  ;;  %v2716_v6 = vld [vmem:[#allocation16 + $0x6c] ss:$16 sps:$4 sm:$0xff]   ;;  %1773 = vmatprep.subr.bf16.mxu1 %v2719_v9 }
 0x97f   :  { %2807 = vrcp.f32 %v1269_v8  ;;  %v2714_v8 = vld [vmem:[#allocation16 + $0x68] ss:$16 sps:$4 sm:$0xff]   ;;  %v2770_v9 = vld [vmem:[#allocation19 + $0xf8] sm:$0xff]  }
 0x987   :  { %v2804_v11 = vpop.eup %2803 }
 0x988   :  { %v708_v13 = vmul.f32 %v2804_v11, %v3515_v48  ;;  %v2806_v4 = vpop.eup %2805  ;;  %v1378_v48 = vpop.permute.xlu1 %1377  ;;  %v2717_v11 = vld [vmem:[#allocation16 + $0x80] ss:$16 sps:$4 sm:$0xff]  }
 0x989   :  { %v2808_v21 = vpop.eup %2807  ;;  %1774 = vmatpush1.bf16.msra.mxu1 %v2717_v11  ;;  %v2772_v11 = vld [vmem:[#allocation19 + $0xb8] sm:$0xff]  }
 0x98a   :  { %v709_v14 = vpack.c.bf16 %v708_v13, %v707_v12  ;;  %v2720_v12 = vld [vmem:[#allocation16 + $0x88] ss:$16 sps:$4 sm:$0xff]   ;;  %v2725_v13 = vld [vmem:[#allocation16 + $0xa4] ss:$16 sps:$4 sm:$0xff]  }
 0x98b   :  { %1775 = vmatprep.subr.bf16.mxu1 %v2725_v13 }
 0x991   :  { %v1375_v44 = vpop.permute.xlu0 %1374 }
 0x992   :  { %v1384_v31 = vsel %vm498_vm1, %v709_v14, %v1375_v44  ;;  %v2728_v14 = vld [vmem:[#allocation16 + $0xac] ss:$16 sps:$4 sm:$0xff]  }
 0x993   :  { %v1387_v16 = vsel %vm1385_vm4, %v1384_v31, %v1378_v48 }
 0x9a9   :  { %v1314_v17 = vpop.f32.mrb[24].mxu0 }
 0x9aa   :  { %v2599_v18 = vpop.f32.mrb[25].mxu0  ;;  %v1370_v24 = vmul.f32 %v2806_v4, %v1314_v17  ;;  %v2723_v17 = vld [vmem:[#allocation16 + $0xa0] ss:$16 sps:$4 sm:$0xff]  }
 0x9ab   :  { %v1317_v19 = vpop.f32.mrb[26].mxu0  ;;  %v2726_v18 = vld [vmem:[#allocation16 + $0xa8] ss:$16 sps:$4 sm:$0xff]   ;;  %1776 = vmatpush1.bf16.msra.mxu1 %v2723_v17  ;;  %v2729_v4 = vld [vmem:[#allocation16 + $0xc0] ss:$16 sps:$4 sm:$0xff]  }
 0x9ac   :  { %v2600_v20 = vpop.f32.mrb[27].mxu0  ;;  %v2731_v19 = vld [vmem:[#allocation16 + $0xc4] ss:$16 sps:$4 sm:$0xff]  }
 0x9ad   :  { %v2734_v20 = vld [vmem:[#allocation16 + $0xcc] ss:$16 sps:$4 sm:$0xff]   ;;  %1777 = vmatprep.subr.bf16.mxu1 %v2731_v19 }
 0x9af   :  { %1778 = vmatpush1.bf16.msra.mxu1 %v2729_v4 }
 0x9bf   :  { %v1362_v23 = vpop.f32.mrb[40].mxu1 }
 0x9c0   :  { %v1371_v25 = vmul.f32 %v2808_v21, %v1362_v23  ;;  %v2605_v26 = vpop.f32.mrb[41].mxu1  ;;  %v2732_v21 = vld [vmem:[#allocation16 + $0xc8] ss:$16 sps:$4 sm:$0xff]   ;;  %v2737_v23 = vld [vmem:[#allocation16 + $0xe4] ss:$16 sps:$4 sm:$0xff]  }
 0x9c1   :  { %v1365_v27 = vpop.f32.mrb[42].mxu1  ;;  %v2738_v26 = vld [vmem:[#allocation16 + $0xe8] ss:$16 sps:$4 sm:$0xff]   ;;  %1779 = vmatprep.subr.bf16.mxu1 %v2737_v23 }
 0x9c2   :  { %v1372_v2 = vpack.c.bf16 %v1371_v25, %v1370_v24  ;;  %v2606_v28 = vpop.f32.mrb[43].mxu1  ;;  %v2740_v24 = vld [vmem:[#allocation16 + $0xec] ss:$16 sps:$4 sm:$0xff]   ;;  %v2735_v25 = vld [vmem:[#allocation16 + $0xe0] ss:$16 sps:$4 sm:$0xff]   ;;  %v2741_v27 = vld [vmem:[#allocation19 + $0x40] sm:$0xff]  }
 0x9c3   :  { %1780 = vmatpush1.bf16.msra.mxu1 %v2735_v25 }
 0x9c4   :  { %1380 = vrot.lane.b32.xlu1 %v1372_v2, %s3156_s11  ;;  %v2742_v2 = vld [vmem:[#allocation19 + $0xc0] sm:$0xff]   ;;  %2447 = vmatprep.subr.bf16.mxu1 %v2741_v27 }
 0xa36   :  { %v1381_v5 = vpop.permute.xlu1 %1380 }
 0xa37   :  { %v1390_v32 = vsel %vm1388_vm5, %v1387_v16, %v1381_v5 }
 0xa38   :  { %2624 = vmatmul.mubr.bf16.vlgmr.msra.gmra.mrb[28].mxu0 %v1390_v32 }
 0xa39   :  { %1840 = vmatprep.mubr.bf16.mxu0 %v3154_v30  ;;  %1809 = vmatpush1.bf16.msra.mxu0 %v2696_v52  ;;  %v2748_v52 = vld [vmem:[#allocation19 + $0x88] sm:$0xff]  }
 0xa3a   :  { %1810 = vmatprep.subr.bf16.mxu0 %v2704_v62  ;;  %v2751_v62 = vld [vmem:[#allocation19 + $0x10] sm:$0xff]  }
 0xa3d   :  { %1811 = vmatpush1.bf16.msra.mxu0 %v2702_v0  ;;  %v2753_v0 = vld [vmem:[#allocation19 + $0x58] sm:$0xff]  }
 0xa3e   :  { %1812 = vmatprep.subr.bf16.mxu0 %v2710_v22  ;;  %v2763_v22 = vld [vmem:[#allocation19 + $0x28] sm:$0xff]  }
 0xa41   :  { %1813 = vmatpush1.bf16.msra.mxu0 %v2708_v63  ;;  %v2765_v63 = vld [vmem:[#allocation19 + $0x70] sm:$0xff]  }
 0xa42   :  { %1814 = vmatprep.subr.bf16.mxu0 %v2716_v6  ;;  %v2767_v6 = vld [vmem:[#allocation19 + $0x30] sm:$0xff]  }
 0xa45   :  { %1815 = vmatpush1.bf16.msra.mxu0 %v2714_v8  ;;  %v2769_v8 = vld [vmem:[#allocation19 + $0x78] sm:$0xff]  }
 0xa46   :  { %1816 = vmatprep.subr.bf16.mxu0 %v2722_v10  ;;  %v2771_v10 = vld [vmem:[#allocation19 + $0x38] sm:$0xff]  }
 0xa49   :  { %1817 = vmatpush1.bf16.msra.mxu0 %v2720_v12  ;;  %v1585_v12 = vlaneseq }
 0xa4a   :  { %1818 = vmatprep.subr.bf16.mxu0 %v2728_v14 }
 0xa4b   :  { %v1586_v13 = vshrl.u32 %v1585_v12, 7 }
 0xa4d   :  { %1819 = vmatpush1.bf16.msra.mxu0 %v2726_v18  ;;  %v1587_v14 = vsub.s32 0, %v1586_v13  ;;  %v1595_v17 = vsub.s32 2, %v1586_v13  ;;  %v1583_v18 = vld [vmem:[#allocation17] sm:$0xf]  ;;  %v1591_v19 = vsub.s32 1, %v1586_v13 }
 0xa4e   :  { %1820 = vmatprep.subr.bf16.mxu0 %v2734_v20  ;;  %v1599_v20 = vsub.s32 3, %v1586_v13 }
 0xa4f   :  { %v1588_v4 = vrot.slane %v1583_v18, %v1587_v14  ;;  %v1592_v23 = vrot.slane %v1583_v18, %v1591_v19 }
 0xa51   :  { %1821 = vmatpush1.bf16.msra.mxu0 %v2732_v21  ;;  %v1596_v21 = vrot.slane %v1583_v18, %v1595_v17 }
 0xa52   :  { %1822 = vmatprep.subr.bf16.mxu0 %v2740_v24  ;;  %v1600_v24 = vrot.slane %v1583_v18, %v1599_v20 }
 0xa55   :  { %1823 = vmatpush1.bf16.msra.mxu0 %v2738_v26 }
 0xa56   :  { %2469 = vmatprep.subr.bf16.mxu0 %v2742_v2 }
 0xb0b   :  { %v1497_v15 = vpop.f32.mrb[28].mxu0 }
 0xb0c   :  { %v1498_v36 = vadd.f32 %v2315_v35, %v1497_v15  ;;  %v2625_v38 = vpop.f32.mrb[29].mxu0  ;;  %v2324_v15 = vld [vmem:[#allocation13] ss:$0 sm:$0xff] }
 0xb0d   :  { %v1500_v39 = vpop.f32.mrb[30].mxu0 }
 0xb0e   :  { %v1506_v40 = vadd.f32 %v1504_v37, %v1498_v36  ;;  %v1501_v41 = vadd.f32 %v2315_v35, %v1500_v39  ;;  %v2626_v43 = vpop.f32.mrb[31].mxu0  ;;  %v2325_v39 = vld [vmem:[#allocation14] ss:$0 sm:$0xff] }
 0xb0f   :  { %v2743_v43 = vld [vmem:[#allocation19] sm:$0xff]  }
 0xb10   :  { %v1507_v29 = vadd.f32 %v1505_v42, %v1501_v41  ;;  %v3635_v46 = vadd.f32 %v2829_v45, %v1506_v40 }
 0xb12   :  { %1510 = vadd.xlane.f32.xlu1 %v3635_v46  ;;  %v3638_v30 = vadd.f32 %v2830_v47, %v1507_v29  ;;  %v2744_v29 = vld [vmem:[#allocation19 + $0x80] sm:$0xff]   ;;  %v2745_v47 = vld [vmem:[#allocation19 + $0x48] sm:$0xff]  }
 0xb14   :  { %1512 = vadd.xlane.f32.xlu0 %v3638_v30 }
 0xb9f   :  { %v1511_v3 = vpop.xlane.xlu1 %1510 }
 0xba0   :  { %v1514_v54 = vmul.f32 0.0078125, %v1511_v3  ;;  %v2754_v3 = vld [vmem:[#allocation19 + $0xd8] sm:$0xff]  }
 0xba1   :  { %v1513_v33 = vpop.xlane.xlu0 %1512 }
 0xba2   :  { %v3642_v55 = vsub.f32 %v3635_v46, %v1514_v54  ;;  %v1515_v56 = vmul.f32 0.0078125, %v1513_v33  ;;  %v2755_v54 = vld [vmem:[#allocation19 + $0x18] sm:$0xff]  }
 0xba3   :  { %v2756_v33 = vld [vmem:[#allocation19 + $0x98] sm:$0xff]  }
 0xba4   :  { %v3645_v58 = vsub.f32 %v3638_v30, %v1515_v56  ;;  %v1518_v59 = vmul.f32 %v3642_v55, %v3642_v55  ;;  %v2758_v56 = vld [vmem:[#allocation19 + $0xe0] sm:$0xff]  }
 0xba6   :  { %1520 = vadd.xlane.f32.xlu0 %v1518_v59  ;;  %v1519_v60 = vmul.f32 %v3645_v58, %v3645_v58  ;;  %v2760_v59 = vld [vmem:[#allocation19 + $0xa0] sm:$0xff]  }
 0xbaa   :  { %1522 = vadd.xlane.f32.xlu0 %v1519_v60  ;;  %v2761_v60 = vld [vmem:[#allocation19 + $0x68] sm:$0xff]  }
 0xc33   :  { %v1521_v28 = vpop.xlane.xlu0 %1520 }
 0xc34   :  { %v1524_v44 = vmul.f32 0.0078125, %v1521_v28 }
 0xc36   :  { %v1526_v48 = vadd.f32 1e-05, %v1524_v44 }
 0xc37   :  { %v1523_v31 = vpop.xlane.xlu0 %1522 }
 0xc38   :  { %2809 = vrsqrt.f32 %v1526_v48  ;;  %v1525_v16 = vmul.f32 0.0078125, %v1523_v31 }
 0xc3a   :  { %v1527_v5 = vadd.f32 1e-05, %v1525_v16 }
 0xc3c   :  { %2811 = vrsqrt.f32 %v1527_v5 }
 0xc42   :  { %v2810_v32 = vpop.eup %2809 }
 0xc43   :  { %v1530_v35 = vmul.f32 %v2810_v32, %v3642_v55  ;;  %v2757_v55 = vld [vmem:[#allocation19 + $0x60] sm:$0xff]  }
 0xc45   :  { %v1539_v38 = vmul.f32 %v2324_v15, %v1530_v35 }
 0xc46   :  { %v2812_v36 = vpop.eup %2811 }
 0xc47   :  { %v1531_v37 = vmul.f32 %v2812_v36, %v3645_v58  ;;  %v1548_v41 = vadd.f32 %v2325_v39, %v1539_v38  ;;  %v2759_v58 = vld [vmem:[#allocation19 + $0x20] sm:$0xff]  }
 0xc49   :  { %v1540_v40 = vmul.f32 %v2324_v15, %v1531_v37 }
 0xc4b   :  { %v1549_v42 = vadd.f32 %v2325_v39, %v1540_v40 }
 0xc4d   :  { %v1550_v45 = vpack.c.bf16 %v1549_v42, %v1548_v41 }
 0xc4f   :  { %1798 = vmatmul.mubr.bf16.vlgmr.msra.gmra.mrb[44].mxu1 %v1550_v45  ;;  %1841 = vmatmul.mubr.bf16.vlgmr.msra.gmra.mrb[32].mxu0 %v1550_v45 }
 0xc50   :  { %2448 = vmatpush3.bf16.msra.mxu1 %v2743_v43  ;;  %2470 = vmatpush3.bf16.msra.mxu0 %v2744_v29 }
 0xc51   :  { %2449 = vmatprep.subr.bf16.mxu1 %v2745_v47  ;;  %2471 = vmatprep.subr.bf16.mxu0 %v2746_v49 }
 0xc54   :  { %2450 = vmatpush3.bf16.msra.mxu1 %v2747_v50  ;;  %2472 = vmatpush3.bf16.msra.mxu0 %v2748_v52 }
 0xc55   :  { %2451 = vmatprep.subr.bf16.mxu1 %v2749_v53  ;;  %2473 = vmatprep.subr.bf16.mxu0 %v2750_v57 }
 0xc58   :  { %2452 = vmatpush3.bf16.msra.mxu1 %v2751_v62  ;;  %2474 = vmatpush3.bf16.msra.mxu0 %v2752_v51 }
 0xc59   :  { %2453 = vmatprep.subr.bf16.mxu1 %v2753_v0  ;;  %2475 = vmatprep.subr.bf16.mxu0 %v2754_v3 }
 0xc5c   :  { %2454 = vmatpush3.bf16.msra.mxu1 %v2755_v54  ;;  %2476 = vmatpush3.bf16.msra.mxu0 %v2756_v33 }
 0xc5d   :  { %2455 = vmatprep.subr.bf16.mxu1 %v2757_v55  ;;  %2477 = vmatprep.subr.bf16.mxu0 %v2758_v56 }
 0xc60   :  { %2456 = vmatpush3.bf16.msra.mxu1 %v2759_v58  ;;  %2478 = vmatpush3.bf16.msra.mxu0 %v2760_v59 }
 0xc61   :  { %2457 = vmatprep.subr.bf16.mxu1 %v2761_v60  ;;  %2479 = vmatprep.subr.bf16.mxu0 %v2762_v61 }
 0xc64   :  { %2458 = vmatpush3.bf16.msra.mxu1 %v2763_v22  ;;  %2480 = vmatpush3.bf16.msra.mxu0 %v2764_v34 }
 0xc65   :  { %2459 = vmatprep.subr.bf16.mxu1 %v2765_v63  ;;  %2481 = vmatprep.subr.bf16.mxu0 %v2766_v1 }
 0xc68   :  { %2460 = vmatpush3.bf16.msra.mxu1 %v2767_v6  ;;  %2482 = vmatpush3.bf16.msra.mxu0 %v2768_v7 }
 0xc69   :  { %2461 = vmatprep.subr.bf16.mxu1 %v2769_v8  ;;  %2483 = vmatprep.subr.bf16.mxu0 %v2770_v9 }
 0xc6c   :  { %2462 = vmatpush3.bf16.msra.mxu1 %v2771_v10  ;;  %2484 = vmatpush3.bf16.msra.mxu0 %v2772_v11 }
 0xd22   :  { %v1799_v25 = vpop.f32.mrb[44].mxu1  ;;  %v1842_v26 = vpop.f32.mrb[32].mxu0 }
 0xd23   :  { %v1800_v27 = vadd.f32 %v1799_v25, %v1588_v4  ;;  %v1843_v2 = vadd.f32 %v1842_v26, %v1596_v21  ;;  %v1801_v28 = vpop.f32.mrb[45].mxu1  ;;  %v1844_v44 = vpop.f32.mrb[33].mxu0  ;;  %v2358_v25 = vld [vmem:[#allocation20] ss:$0 sm:$0xff] }
 0xd24   :  { %v1802_v48 = vadd.f32 %v1801_v28, %v1592_v23  ;;  %v1845_v31 = vadd.f32 %v1844_v44, %v1600_v24  ;;  %v1803_v16 = vpop.f32.mrb[46].mxu1  ;;  %v1846_v5 = vpop.f32.mrb[34].mxu0 }
 0xd25   :  { %v1859_v32 = vmul.f32 0.70710677, %v1800_v27  ;;  %v1861_v35 = vmul.f32 0.70710677, %v1843_v2  ;;  %v1804_v37 = vadd.f32 %v1803_v16, %v1588_v4  ;;  %v1847_v38 = vadd.f32 %v1846_v5, %v1596_v21  ;;  %v1805_v39 = vpop.f32.mrb[47].mxu1  ;;  %v1848_v40 = vpop.f32.mrb[35].mxu0 }
 0xd26   :  { %v1860_v15 = vmul.f32 0.70710677, %v1802_v48  ;;  %v1862_v36 = vmul.f32 0.70710677, %v1845_v31  ;;  %v1806_v41 = vadd.f32 %v1805_v39, %v1592_v23  ;;  %v1849_v42 = vadd.f32 %v1848_v40, %v1600_v24 }
 0xd27   :  { %2813 = verf.f32 %v1859_v32  ;;  %v1863_v43 = vmul.f32 0.70710677, %v1804_v37  ;;  %v1865_v29 = vmul.f32 0.70710677, %v1847_v38  ;;  %v1851_v51 = vmul.f32 0.5, %v1800_v27 }
 0xd28   :  { %2815 = verf.f32 %v1861_v35  ;;  %v1864_v45 = vmul.f32 0.70710677, %v1806_v41  ;;  %v1866_v47 = vmul.f32 0.70710677, %v1849_v42  ;;  %v1853_v0 = vmul.f32 0.5, %v1843_v2 }
 0xd29   :  { %2817 = verf.f32 %v1860_v15  ;;  %v1852_v33 = vmul.f32 0.5, %v1802_v48  ;;  %v1855_v56 = vmul.f32 0.5, %v1804_v37  ;;  %v1854_v60 = vmul.f32 0.5, %v1845_v31 }
 0xd2a   :  { %2819 = verf.f32 %v1862_v36  ;;  %v1857_v22 = vmul.f32 0.5, %v1847_v38  ;;  %v1856_v7 = vmul.f32 0.5, %v1806_v41  ;;  %v1858_v11 = vmul.f32 0.5, %v1849_v42 }
 0xd2b   :  { %2821 = verf.f32 %v1863_v43 }
 0xd2c   :  { %2823 = verf.f32 %v1865_v29 }
 0xd2d   :  { %2825 = verf.f32 %v1864_v45 }
 0xd2e   :  { %2827 = verf.f32 %v1866_v47 }
 0xd31   :  { %v2814_v49 = vpop.eup %2813 }
 0xd32   :  { %v2816_v50 = vpop.eup %2815  ;;  %v1875_v57 = vadd.f32 1.0, %v2814_v49 }
 0xd33   :  { %v2818_v52 = vpop.eup %2817  ;;  %v1877_v3 = vadd.f32 1.0, %v2816_v50 }
 0xd34   :  { %v2820_v53 = vpop.eup %2819  ;;  %v1876_v55 = vadd.f32 1.0, %v2818_v52  ;;  %v1883_v1 = vmul.f32 %v1875_v57, %v1851_v51 }
 0xd35   :  { %v2822_v62 = vpop.eup %2821  ;;  %v1878_v61 = vadd.f32 1.0, %v2820_v53  ;;  %v1885_v9 = vmul.f32 %v1877_v3, %v1853_v0 }
 0xd36   :  { %v2824_v54 = vpop.eup %2823  ;;  %v1879_v58 = vadd.f32 1.0, %v2822_v62  ;;  %v1884_v13 = vmul.f32 %v1876_v55, %v1852_v33 }
 0xd37   :  { %v2826_v59 = vpop.eup %2825  ;;  %v1881_v34 = vadd.f32 1.0, %v2824_v54  ;;  %v1886_v18 = vmul.f32 %v1878_v61, %v1854_v60 }
 0xd38   :  { %v2828_v63 = vpop.eup %2827  ;;  %v1887_v6 = vmul.f32 %v1879_v58, %v1855_v56  ;;  %v1880_v8 = vadd.f32 1.0, %v2826_v59 }
 0xd39   :  { %v1889_v10 = vmul.f32 %v1881_v34, %v1857_v22  ;;  %v1882_v12 = vadd.f32 1.0, %v2828_v63 }
 0xd3a   :  { %v1891_v14 = vpack.c.bf16 %v1887_v6, %v1883_v1  ;;  %v1888_v17 = vmul.f32 %v1880_v8, %v1856_v7 }
 0xd3b   :  { %v1893_v19 = vpack.c.bf16 %v1889_v10, %v1885_v9  ;;  %v1890_v20 = vmul.f32 %v1882_v12, %v1858_v11 }
 0xd3c   :  { %v1892_v4 = vpack.c.bf16 %v1888_v17, %v1884_v13 }
 0xd3d   :  { %v1894_v21 = vpack.c.bf16 %v1890_v20, %v1886_v18 }
 0xd3e   :  { %2190 = vmatprep.mubr.bf16.mxu1 %v1892_v4 }
 0xd3f   :  { %2231 = vmatprep.mubr.bf16.mxu0 %v1894_v21  ;;  %2191 = vmatmul.mubr.bf16.vlgmr.msra.gmra.mrb[48].mxu1 %v1891_v14 }
 0xd40   :  { %2232 = vmatmul.mubr.bf16.vlgmr.msra.gmra.mrb[36].mxu0 %v1893_v19 }
 0xe12   :  { %v2463_v23 = vpop.f32.mrb[48].mxu1 }
 0xe13   :  { %v2485_v24 = vpop.f32.mrb[36].mxu0  ;;  %v2464_v26 = vpop.f32.mrb[49].mxu1 }
 0xe14   :  { %v2465_v27 = vadd.f32 %v2464_v26, %v2463_v23  ;;  %v2486_v2 = vpop.f32.mrb[37].mxu0  ;;  %v2466_v28 = vpop.f32.mrb[50].mxu1 }
 0xe15   :  { %v2487_v44 = vadd.f32 %v2486_v2, %v2485_v24  ;;  %v2488_v48 = vpop.f32.mrb[38].mxu0  ;;  %v2467_v31 = vpop.f32.mrb[51].mxu1 }
 0xe16   :  { %v2193_v16 = vadd.f32 %v2465_v27, %v2358_v25  ;;  %v2468_v5 = vadd.f32 %v2467_v31, %v2466_v28  ;;  %v2489_v32 = vpop.f32.mrb[39].mxu0 }
 0xe17   :  { %v2490_v35 = vadd.f32 %v2489_v32, %v2488_v48 }
 0xe18   :  { %v2234_v15 = vadd.f32 %v2487_v44, %v2193_v16  ;;  %v2196_v36 = vadd.f32 %v2468_v5, %v2358_v25 }
 0xe1a   :  { %v2240_v37 = vadd.f32 %v2234_v15, %v3635_v46  ;;  %v2237_v38 = vadd.f32 %v2490_v35, %v2196_v36 }
 0xe1c   :  { %2242 = vst [vmem:[#allocation22] sm:$0xff] %v2240_v37  ;;  %v2241_v39 = vadd.f32 %v2237_v38, %v3638_v30 }
 0xe1e   :  { %2243 = vst [vmem:[#allocation22 + $0x8] sm:$0xff] %v2241_v39 }
 0xe1f   :  { %3106 = shalt.err (!%p3103_p2)
}
 0xe20   :  { %s3107_s30 = scalar_lea.hbm %s3682_s12, 256 }
 0xe21   :  { %p3108_p3 = scmp.ne.s32.totalorder %s3682_s12, %s3107_s30  ;;  %p3111_p4 = scmp.lt.u32.totalorder %s3107_s30, %s3682_s12 }
 0xe23   :  { %p3113_p5 = pnand %p3111_p4, %p3108_p3 }
 0xe25   :  { %3116 = shalt.err (!%p3113_p5)
}
 0xe26   :  { %2255 = dma.vmem_to_hbm [thread:$0]  %s2250_s28, 256, %s3682_s12, [#allocation4], %s3141_s9, %s3141_s9, %s3142_s18  }
 0xe27   :  { %3131 = dma.done.wait [#allocation4], 256  }
 0xe28   :  { %3132 = vsyncadd [#allocation4], 4294967040 }
 0xe29   :  { %2259 = vsyncpa [#allocation3], 1 }
 0xe2a   :  { %2260 = vsyncpa [#allocation6], 1 }
 0xe2b   :  { %2261 = vsyncpa [#allocation9], 1 }
 0xe2c   :  { %2262 = vsyncpa [#allocation12], 1 }
 0xe2d   :  { %2263 = vsyncpa [#allocation15], 1 }
 0xe2e   :  { %2264 = vsyncpa [#allocation18], 1 }
 0xe2f   :  { %2265 = vsyncpa [#allocation21], 1 }
 0xe30   :  { %2266 = vsyncpa [#allocation4], 1 }

</bundles_post_ra>
